<compile_context>
chip_gen: v6e
topology: v6e:2x2x1
jax: 0.10.0
libtpu: 0.0.40
codegen_flags: <defaults>
</compile_context>

<pallas_src>
import jax
import jax.numpy as jnp
from jax.experimental import pallas as pl
from jax.experimental.pallas import tpu as pltpu


# ---------------------------------------------------------------------------
# plain-JAX glue: trilinear x2 upsample (align_corners=False), channels-last
# ---------------------------------------------------------------------------
def _upsample_axis_x2(x, axis):
    s = x.shape[axis]
    # PyTorch align_corners=False source coordinate, clamped at 0.
    coord = jnp.maximum((jnp.arange(2 * s, dtype=jnp.float32) + 0.5) * 0.5 - 0.5, 0.0)
    i0 = jnp.clip(jnp.floor(coord).astype(jnp.int32), 0, s - 1)
    i1 = jnp.minimum(i0 + 1, s - 1)
    w1 = coord - i0.astype(jnp.float32)
    w0 = 1.0 - w1
    bshape = [1] * x.ndim
    bshape[axis] = 2 * s
    return (jnp.take(x, i0, axis=axis) * w0.reshape(bshape)
            + jnp.take(x, i1, axis=axis) * w1.reshape(bshape))


def trilinear_upsample_x2_ndhwc(x):
    # x: [N, D, H, W, C]
    # TODO(synk): irregular gather of the trilinear upsample stays in plain JAX.
    for ax in (1, 2, 3):
        x = _upsample_axis_x2(x, ax)
    return x


# ---------------------------------------------------------------------------
# forward
# ---------------------------------------------------------------------------
def up_conv_forward(x, weight, bias, gamma, beta, eps=1e-5):
    # x: [N, Cin, D, H, W] (NCDHW, like PyTorch)
    del bias  # exactly cancelled by train-mode BN mean subtraction

    N, Cin, D, H, W = x.shape
    Cout = weight.shape[0]
    Cout_pad = ((Cout + 127) // 128) * 128          # lane-dense output channels
    D2, H2, W2 = 2 * D, 2 * H, 2 * W
    H2p, W2p = H2 + 2, W2 + 2                       # +/-1 spatial halo
    HW = H2 * W2
    M = N * D2 * HW

    # channels-last (transpose the small pre-upsample tensor), upsample in f32,
    # pad spatially by 1, keep the big intermediate in bf16.
    x_cl = jnp.transpose(x, (0, 2, 3, 4, 1)).astype(jnp.float32)   # [N,D,H,W,Cin]
    xu = trilinear_upsample_x2_ndhwc(x_cl)                          # [N,D2,H2,W2,Cin]
    xp = jnp.pad(xu.astype(jnp.bfloat16),
                 ((0, 0), (1, 1), (1, 1), (1, 1), (0, 0)))          # [N,D2+2,H2p,W2p,Cin]

    # weights: [Cout, Cin, 3,3,3] -> [27, Cin, Cout_pad] (tap = kd*9+kh*3+kw), bf16
    w_taps = jnp.transpose(weight, (2, 3, 4, 1, 0)).reshape(27, Cin, Cout)
    w_taps = jnp.pad(w_taps, ((0, 0), (0, 0), (0, Cout_pad - Cout))).astype(jnp.bfloat16)

    # -------------------------------------------------------------------
    # conv kernel: 27 shifted matmuls into an f32 accumulator + BN partials
    # -------------------------------------------------------------------
    def conv_stats_kernel(x0_ref, x1_ref, x2_ref, w_ref, o_ref, s_ref, q_ref):
        # x{kd}_ref: [1,1,H2p,W2p,Cin] bf16  (padded depth slice d+kd)
        # w_ref:     [27,Cin,Cout_pad] bf16
        # o_ref:     [1,1,HW,Cout_pad] f32
        # s_ref/q_ref: [1,1,1,Cout_pad] f32 (per-tile sum / sum-of-squares)
        acc = jnp.zeros((HW, Cout_pad), jnp.float32)
        for kd, xr in enumerate((x0_ref, x1_ref, x2_ref)):
            for kh in range(3):
                for kw in range(3):
                    patch = xr[0, 0, kh:kh + H2, kw:kw + W2, :]      # [H2,W2,Cin]
                    lhs = patch.reshape(HW, Cin)
                    acc = acc + jnp.dot(lhs, w_ref[kd * 9 + kh * 3 + kw],
                                        preferred_element_type=jnp.float32)
        o_ref[0, 0] = acc
        s_ref[0, 0] = jnp.sum(acc, axis=0, keepdims=True)
        q_ref[0, 0] = jnp.sum(acc * acc, axis=0, keepdims=True)

    def x_spec(kd):
        return pl.BlockSpec((1, 1, H2p, W2p, Cin),
                            lambda n, d, kd=kd: (n, d + kd, 0, 0, 0))

    cost = pl.CostEstimate(
        flops=2 * M * Cin * 27 * Cout_pad,
        transcendentals=0,
        bytes_accessed=(3 * N * D2 * H2p * W2p * Cin * 2
                        + 27 * Cin * Cout_pad * 2
                        + M * Cout_pad * 4
                        + 2 * N * D2 * Cout_pad * 4),
    )

    conv_out, psum, psq = pl.pallas_call(
        conv_stats_kernel,
        out_shape=(
            jax.ShapeDtypeStruct((N, D2, HW, Cout_pad), jnp.float32),
            jax.ShapeDtypeStruct((N, D2, 1, Cout_pad), jnp.float32),
            jax.ShapeDtypeStruct((N, D2, 1, Cout_pad), jnp.float32),
        ),
        grid_spec=pltpu.PrefetchScalarGridSpec(
            num_scalar_prefetch=0,
            grid=(N, D2),
            in_specs=[
                x_spec(0), x_spec(1), x_spec(2),
                pl.BlockSpec((27, Cin, Cout_pad), lambda n, d: (0, 0, 0)),
            ],
            out_specs=(
                pl.BlockSpec((1, 1, HW, Cout_pad), lambda n, d: (n, d, 0, 0)),
                pl.BlockSpec((1, 1, 1, Cout_pad), lambda n, d: (n, d, 0, 0)),
                pl.BlockSpec((1, 1, 1, Cout_pad), lambda n, d: (n, d, 0, 0)),
            ),
        ),
        compiler_params=pltpu.CompilerParams(
            dimension_semantics=("parallel", "parallel"),
            vmem_limit_bytes=32 * 1024 * 1024,   # safe on v5e/v6e/v7x
        ),
        cost_estimate=cost,
    )(xp, xp, xp, w_taps)

    # -------------------------------------------------------------------
    # BN batch stats from the fused partials (tiny arrays; plain JAX)
    # -------------------------------------------------------------------
    gamma_p = jnp.pad(gamma.astype(jnp.float32), (0, Cout_pad - Cout))
    beta_p = jnp.pad(beta.astype(jnp.float32), (0, Cout_pad - Cout))
    total = jnp.sum(psum, axis=(0, 1, 2))                    # [Cout_pad]
    total_sq = jnp.sum(psq, axis=(0, 1, 2))                  # [Cout_pad]
    mean = total / M
    # biased variance; f32 E[x^2]-E[x]^2 clamped at 0 (values are conv outputs,
    # mean is small relative to spread, so cancellation is benign here)
    var = jnp.maximum(total_sq / M - mean * mean, 0.0)
    inv_std = jax.lax.rsqrt(var + eps)
    scale = (gamma_p * inv_std).reshape(1, Cout_pad)
    shift = (beta_p - mean * gamma_p * inv_std).reshape(1, Cout_pad)

    # -------------------------------------------------------------------
    # fused BN-affine + ReLU on large, lane-dense row tiles (f32 epilogue)
    # -------------------------------------------------------------------
    def bn_relu_kernel(y_ref, sc_ref, sh_ref, o_ref):
        o_ref[...] = jnp.maximum(y_ref[...] * sc_ref[...] + sh_ref[...], 0.0)

    y2d = conv_out.reshape(M, Cout_pad)                      # free (contiguous)
    n_slices = N * D2
    slices_per_tile = max(1, min(n_slices, 4096 // max(HW, 1)))
    while n_slices % slices_per_tile:
        slices_per_tile -= 1
    tile_rows = slices_per_tile * HW
    if tile_rows % 8 != 0:
        tile_rows = M                                        # full-dim block is always legal

    out2d = pl.pallas_call(
        bn_relu_kernel,
        out_shape=jax.ShapeDtypeStruct((M, Cout_pad), jnp.float32),
        grid_spec=pltpu.PrefetchScalarGridSpec(
            num_scalar_prefetch=0,
            grid=(M // tile_rows,),
            in_specs=[
                pl.BlockSpec((tile_rows, Cout_pad), lambda i: (i, 0)),
                pl.BlockSpec((1, Cout_pad), lambda i: (0, 0)),
                pl.BlockSpec((1, Cout_pad), lambda i: (0, 0)),
            ],
            out_specs=pl.BlockSpec((tile_rows, Cout_pad), lambda i: (i, 0)),
        ),
        compiler_params=pltpu.CompilerParams(
            dimension_semantics=("parallel",),
            vmem_limit_bytes=32 * 1024 * 1024,
        ),
    )(y2d, scale, shift)

    out = out2d[:, :Cout].reshape(N, D2, H2, W2, Cout)
    # TODO(synk): final NDHWC->NCDHW transpose kept in plain JAX for PyTorch
    # layout parity; skip it if the consumer accepts channels-last.
    return jnp.transpose(out, (0, 4, 1, 2, 3))


if __name__ == "__main__":
    key = jax.random.PRNGKey(0)
    k_x, k_w, k_b = jax.random.split(key, 3)

    N, Cin, Cout = 2, 4, 8
    D = H = W = 4  # upsampled to 8x8x8

    x = jax.random.normal(k_x, (N, Cin, D, H, W), dtype=jnp.float32)

    # Shapes match Conv3d(Cin, Cout, 3, padding=1) + BatchNorm3d(Cout) defaults.
    weight = 0.1 * jax.random.normal(k_w, (Cout, Cin, 3, 3, 3), dtype=jnp.float32)
    bias = 0.1 * jax.random.normal(k_b, (Cout,), dtype=jnp.float32)
    gamma = jnp.ones((Cout,), dtype=jnp.float32)   # BN weight default
    beta = jnp.zeros((Cout,), dtype=jnp.float32)   # BN bias default

    fwd = jax.jit(up_conv_forward)
    y = fwd(x, weight, bias, gamma, beta)
    y = jax.block_until_ready(y)

    assert y.shape == (N, Cout, 2 * D, 2 * H, 2 * W), y.shape
    assert bool(jnp.all(jnp.isfinite(y)))
    assert bool(jnp.all(y >= 0.0))  # ReLU output

    print("KERNEL_OK")
</pallas_src>

<mosaic_0001>
module attributes {stable_mosaic.version = 11 : i64} {
  func.func @conv_stats_kernel(%arg0: i32, %arg1: i32, %arg2: memref<1x1x10x10x4xbf16, #tpu.memory_space<vmem>>, %arg3: memref<1x1x10x10x4xbf16, #tpu.memory_space<vmem>>, %arg4: memref<1x1x10x10x4xbf16, #tpu.memory_space<vmem>>, %arg5: memref<27x4x128xbf16, #tpu.memory_space<vmem>>, %arg6: memref<1x1x64x128xf32, #tpu.memory_space<vmem>>, %arg7: memref<1x1x1x128xf32, #tpu.memory_space<vmem>>, %arg8: memref<1x1x1x128xf32, #tpu.memory_space<vmem>>) attributes {dimension_semantics = [#tpu.dimension_semantics<parallel>, #tpu.dimension_semantics<parallel>], iteration_bounds = array<i64: 2, 8>, scalar_prefetch = 0 : i64, scratch_operands = 0 : i64, tpu.core_type = #tpu.core_type<tc>, window_params = [{transform_indices = @transform_0, window_bounds = array<i64: 1, 1, 10, 10, 4>}, {transform_indices = @transform_1, window_bounds = array<i64: 1, 1, 10, 10, 4>}, {transform_indices = @transform_2, window_bounds = array<i64: 1, 1, 10, 10, 4>}, {pipeline_mode = #tpu.pipeline_mode<synchronous>, transform_indices = @transform_3, window_bounds = array<i64: 27, 4, 128>}, {transform_indices = @transform_4, window_bounds = array<i64: 1, 1, 64, 128>}, {transform_indices = @transform_5, window_bounds = array<i64: 1, 1, 1, 128>}, {transform_indices = @transform_6, window_bounds = array<i64: 1, 1, 1, 128>}]} {
    %cst = arith.constant 0.000000e+00 : f32
    %0 = vector.broadcast %cst : f32 to vector<64x128xf32>
    %c0 = arith.constant 0 : index
    %c0_0 = arith.constant 0 : index
    %c0_1 = arith.constant 0 : index
    %c0_2 = arith.constant 0 : index
    %c0_3 = arith.constant 0 : index
    %1 = vector.load %arg2[%c0, %c0_0, %c0_1, %c0_2, %c0_3] : memref<1x1x10x10x4xbf16, #tpu.memory_space<vmem>>, vector<1x1x8x8x4xbf16>
    %2 = vector.shape_cast %1 : vector<1x1x8x8x4xbf16> to vector<8x8x4xbf16>
    %3 = vector.shape_cast %2 : vector<8x8x4xbf16> to vector<64x4xbf16>
    %c0_4 = arith.constant 0 : index
    %c0_5 = arith.constant 0 : index
    %c0_6 = arith.constant 0 : index
    %4 = vector.load %arg5[%c0_4, %c0_5, %c0_6] : memref<27x4x128xbf16, #tpu.memory_space<vmem>>, vector<1x4x128xbf16>
    %5 = vector.shape_cast %4 : vector<1x4x128xbf16> to vector<4x128xbf16>
    %cst_7 = arith.constant dense<0.000000e+00> : vector<64x128xf32>
    %6 = tpu.matmul %3, %5, %cst_7 {dimension_numbers = #tpu.dot_dimension_numbers<[1], [0], [0], [1], [0, 0, 1, 1], [], []>} : vector<64x4xbf16>, vector<4x128xbf16>, vector<64x128xf32> -> vector<64x128xf32>
    %7 = arith.addf %0, %6 : vector<64x128xf32>
    %c0_8 = arith.constant 0 : index
    %c0_9 = arith.constant 0 : index
    %c0_10 = arith.constant 0 : index
    %c1 = arith.constant 1 : index
    %c0_11 = arith.constant 0 : index
    %8 = vector.load %arg2[%c0_8, %c0_9, %c0_10, %c1, %c0_11] : memref<1x1x10x10x4xbf16, #tpu.memory_space<vmem>>, vector<1x1x8x8x4xbf16>
    %9 = vector.shape_cast %8 : vector<1x1x8x8x4xbf16> to vector<8x8x4xbf16>
    %10 = vector.shape_cast %9 : vector<8x8x4xbf16> to vector<64x4xbf16>
    %c1_12 = arith.constant 1 : index
    %c0_13 = arith.constant 0 : index
    %c0_14 = arith.constant 0 : index
    %11 = vector.load %arg5[%c1_12, %c0_13, %c0_14] : memref<27x4x128xbf16, #tpu.memory_space<vmem>>, vector<1x4x128xbf16>
    %12 = vector.shape_cast %11 : vector<1x4x128xbf16> to vector<4x128xbf16>
    %cst_15 = arith.constant dense<0.000000e+00> : vector<64x128xf32>
    %13 = tpu.matmul %10, %12, %cst_15 {dimension_numbers = #tpu.dot_dimension_numbers<[1], [0], [0], [1], [0, 0, 1, 1], [], []>} : vector<64x4xbf16>, vector<4x128xbf16>, vector<64x128xf32> -> vector<64x128xf32>
    %14 = arith.addf %7, %13 : vector<64x128xf32>
    %c0_16 = arith.constant 0 : index
    %c0_17 = arith.constant 0 : index
    %c0_18 = arith.constant 0 : index
    %c2 = arith.constant 2 : index
    %c0_19 = arith.constant 0 : index
    %15 = vector.load %arg2[%c0_16, %c0_17, %c0_18, %c2, %c0_19] : memref<1x1x10x10x4xbf16, #tpu.memory_space<vmem>>, vector<1x1x8x8x4xbf16>
    %16 = vector.shape_cast %15 : vector<1x1x8x8x4xbf16> to vector<8x8x4xbf16>
    %17 = vector.shape_cast %16 : vector<8x8x4xbf16> to vector<64x4xbf16>
    %c2_20 = arith.constant 2 : index
    %c0_21 = arith.constant 0 : index
    %c0_22 = arith.constant 0 : index
    %18 = vector.load %arg5[%c2_20, %c0_21, %c0_22] : memref<27x4x128xbf16, #tpu.memory_space<vmem>>, vector<1x4x128xbf16>
    %19 = vector.shape_cast %18 : vector<1x4x128xbf16> to vector<4x128xbf16>
    %cst_23 = arith.constant dense<0.000000e+00> : vector<64x128xf32>
    %20 = tpu.matmul %17, %19, %cst_23 {dimension_numbers = #tpu.dot_dimension_numbers<[1], [0], [0], [1], [0, 0, 1, 1], [], []>} : vector<64x4xbf16>, vector<4x128xbf16>, vector<64x128xf32> -> vector<64x128xf32>
    %21 = arith.addf %14, %20 : vector<64x128xf32>
    %c0_24 = arith.constant 0 : index
    %c0_25 = arith.constant 0 : index
    %c1_26 = arith.constant 1 : index
    %c0_27 = arith.constant 0 : index
    %c0_28 = arith.constant 0 : index
    %22 = vector.load %arg2[%c0_24, %c0_25, %c1_26, %c0_27, %c0_28] : memref<1x1x10x10x4xbf16, #tpu.memory_space<vmem>>, vector<1x1x8x8x4xbf16>
    %23 = vector.shape_cast %22 : vector<1x1x8x8x4xbf16> to vector<8x8x4xbf16>
    %24 = vector.shape_cast %23 : vector<8x8x4xbf16> to vector<64x4xbf16>
    %c3 = arith.constant 3 : index
    %c0_29 = arith.constant 0 : index
    %c0_30 = arith.constant 0 : index
    %25 = vector.load %arg5[%c3, %c0_29, %c0_30] : memref<27x4x128xbf16, #tpu.memory_space<vmem>>, vector<1x4x128xbf16>
    %26 = vector.shape_cast %25 : vector<1x4x128xbf16> to vector<4x128xbf16>
    %cst_31 = arith.constant dense<0.000000e+00> : vector<64x128xf32>
    %27 = tpu.matmul %24, %26, %cst_31 {dimension_numbers = #tpu.dot_dimension_numbers<[1], [0], [0], [1], [0, 0, 1, 1], [], []>} : vector<64x4xbf16>, vector<4x128xbf16>, vector<64x128xf32> -> vector<64x128xf32>
    %28 = arith.addf %21, %27 : vector<64x128xf32>
    %c0_32 = arith.constant 0 : index
    %c0_33 = arith.constant 0 : index
    %c1_34 = arith.constant 1 : index
    %c1_35 = arith.constant 1 : index
    %c0_36 = arith.constant 0 : index
    %29 = vector.load %arg2[%c0_32, %c0_33, %c1_34, %c1_35, %c0_36] : memref<1x1x10x10x4xbf16, #tpu.memory_space<vmem>>, vector<1x1x8x8x4xbf16>
    %30 = vector.shape_cast %29 : vector<1x1x8x8x4xbf16> to vector<8x8x4xbf16>
    %31 = vector.shape_cast %30 : vector<8x8x4xbf16> to vector<64x4xbf16>
    %c4 = arith.constant 4 : index
    %c0_37 = arith.constant 0 : index
    %c0_38 = arith.constant 0 : index
    %32 = vector.load %arg5[%c4, %c0_37, %c0_38] : memref<27x4x128xbf16, #tpu.memory_space<vmem>>, vector<1x4x128xbf16>
    %33 = vector.shape_cast %32 : vector<1x4x128xbf16> to vector<4x128xbf16>
    %cst_39 = arith.constant dense<0.000000e+00> : vector<64x128xf32>
    %34 = tpu.matmul %31, %33, %cst_39 {dimension_numbers = #tpu.dot_dimension_numbers<[1], [0], [0], [1], [0, 0, 1, 1], [], []>} : vector<64x4xbf16>, vector<4x128xbf16>, vector<64x128xf32> -> vector<64x128xf32>
    %35 = arith.addf %28, %34 : vector<64x128xf32>
    %c0_40 = arith.constant 0 : index
    %c0_41 = arith.constant 0 : index
    %c1_42 = arith.constant 1 : index
    %c2_43 = arith.constant 2 : index
    %c0_44 = arith.constant 0 : index
    %36 = vector.load %arg2[%c0_40, %c0_41, %c1_42, %c2_43, %c0_44] : memref<1x1x10x10x4xbf16, #tpu.memory_space<vmem>>, vector<1x1x8x8x4xbf16>
    %37 = vector.shape_cast %36 : vector<1x1x8x8x4xbf16> to vector<8x8x4xbf16>
    %38 = vector.shape_cast %37 : vector<8x8x4xbf16> to vector<64x4xbf16>
    %c5 = arith.constant 5 : index
    %c0_45 = arith.constant 0 : index
    %c0_46 = arith.constant 0 : index
    %39 = vector.load %arg5[%c5, %c0_45, %c0_46] : memref<27x4x128xbf16, #tpu.memory_space<vmem>>, vector<1x4x128xbf16>
    %40 = vector.shape_cast %39 : vector<1x4x128xbf16> to vector<4x128xbf16>
    %cst_47 = arith.constant dense<0.000000e+00> : vector<64x128xf32>
    %41 = tpu.matmul %38, %40, %cst_47 {dimension_numbers = #tpu.dot_dimension_numbers<[1], [0], [0], [1], [0, 0, 1, 1], [], []>} : vector<64x4xbf16>, vector<4x128xbf16>, vector<64x128xf32> -> vector<64x128xf32>
    %42 = arith.addf %35, %41 : vector<64x128xf32>
    %c0_48 = arith.constant 0 : index
    %c0_49 = arith.constant 0 : index
    %c2_50 = arith.constant 2 : index
    %c0_51 = arith.constant 0 : index
    %c0_52 = arith.constant 0 : index
    %43 = vector.load %arg2[%c0_48, %c0_49, %c2_50, %c0_51, %c0_52] : memref<1x1x10x10x4xbf16, #tpu.memory_space<vmem>>, vector<1x1x8x8x4xbf16>
    %44 = vector.shape_cast %43 : vector<1x1x8x8x4xbf16> to vector<8x8x4xbf16>
    %45 = vector.shape_cast %44 : vector<8x8x4xbf16> to vector<64x4xbf16>
    %c6 = arith.constant 6 : index
    %c0_53 = arith.constant 0 : index
    %c0_54 = arith.constant 0 : index
    %46 = vector.load %arg5[%c6, %c0_53, %c0_54] : memref<27x4x128xbf16, #tpu.memory_space<vmem>>, vector<1x4x128xbf16>
    %47 = vector.shape_cast %46 : vector<1x4x128xbf16> to vector<4x128xbf16>
    %cst_55 = arith.constant dense<0.000000e+00> : vector<64x128xf32>
    %48 = tpu.matmul %45, %47, %cst_55 {dimension_numbers = #tpu.dot_dimension_numbers<[1], [0], [0], [1], [0, 0, 1, 1], [], []>} : vector<64x4xbf16>, vector<4x128xbf16>, vector<64x128xf32> -> vector<64x128xf32>
    %49 = arith.addf %42, %48 : vector<64x128xf32>
    %c0_56 = arith.constant 0 : index
    %c0_57 = arith.constant 0 : index
    %c2_58 = arith.constant 2 : index
    %c1_59 = arith.constant 1 : index
    %c0_60 = arith.constant 0 : index
    %50 = vector.load %arg2[%c0_56, %c0_57, %c2_58, %c1_59, %c0_60] : memref<1x1x10x10x4xbf16, #tpu.memory_space<vmem>>, vector<1x1x8x8x4xbf16>
    %51 = vector.shape_cast %50 : vector<1x1x8x8x4xbf16> to vector<8x8x4xbf16>
    %52 = vector.shape_cast %51 : vector<8x8x4xbf16> to vector<64x4xbf16>
    %c7 = arith.constant 7 : index
    %c0_61 = arith.constant 0 : index
    %c0_62 = arith.constant 0 : index
    %53 = vector.load %arg5[%c7, %c0_61, %c0_62] : memref<27x4x128xbf16, #tpu.memory_space<vmem>>, vector<1x4x128xbf16>
    %54 = vector.shape_cast %53 : vector<1x4x128xbf16> to vector<4x128xbf16>
    %cst_63 = arith.constant dense<0.000000e+00> : vector<64x128xf32>
    %55 = tpu.matmul %52, %54, %cst_63 {dimension_numbers = #tpu.dot_dimension_numbers<[1], [0], [0], [1], [0, 0, 1, 1], [], []>} : vector<64x4xbf16>, vector<4x128xbf16>, vector<64x128xf32> -> vector<64x128xf32>
    %56 = arith.addf %49, %55 : vector<64x128xf32>
    %c0_64 = arith.constant 0 : index
    %c0_65 = arith.constant 0 : index
    %c2_66 = arith.constant 2 : index
    %c2_67 = arith.constant 2 : index
    %c0_68 = arith.constant 0 : index
    %57 = vector.load %arg2[%c0_64, %c0_65, %c2_66, %c2_67, %c0_68] : memref<1x1x10x10x4xbf16, #tpu.memory_space<vmem>>, vector<1x1x8x8x4xbf16>
    %58 = vector.shape_cast %57 : vector<1x1x8x8x4xbf16> to vector<8x8x4xbf16>
    %59 = vector.shape_cast %58 : vector<8x8x4xbf16> to vector<64x4xbf16>
    %c8 = arith.constant 8 : index
    %c0_69 = arith.constant 0 : index
    %c0_70 = arith.constant 0 : index
    %60 = vector.load %arg5[%c8, %c0_69, %c0_70] : memref<27x4x128xbf16, #tpu.memory_space<vmem>>, vector<1x4x128xbf16>
    %61 = vector.shape_cast %60 : vector<1x4x128xbf16> to vector<4x128xbf16>
    %cst_71 = arith.constant dense<0.000000e+00> : vector<64x128xf32>
    %62 = tpu.matmul %59, %61, %cst_71 {dimension_numbers = #tpu.dot_dimension_numbers<[1], [0], [0], [1], [0, 0, 1, 1], [], []>} : vector<64x4xbf16>, vector<4x128xbf16>, vector<64x128xf32> -> vector<64x128xf32>
    %63 = arith.addf %56, %62 : vector<64x128xf32>
    %c0_72 = arith.constant 0 : index
    %c0_73 = arith.constant 0 : index
    %c0_74 = arith.constant 0 : index
    %c0_75 = arith.constant 0 : index
    %c0_76 = arith.constant 0 : index
    %64 = vector.load %arg3[%c0_72, %c0_73, %c0_74, %c0_75, %c0_76] : memref<1x1x10x10x4xbf16, #tpu.memory_space<vmem>>, vector<1x1x8x8x4xbf16>
    %65 = vector.shape_cast %64 : vector<1x1x8x8x4xbf16> to vector<8x8x4xbf16>
    %66 = vector.shape_cast %65 : vector<8x8x4xbf16> to vector<64x4xbf16>
    %c9 = arith.constant 9 : index
    %c0_77 = arith.constant 0 : index
    %c0_78 = arith.constant 0 : index
    %67 = vector.load %arg5[%c9, %c0_77, %c0_78] : memref<27x4x128xbf16, #tpu.memory_space<vmem>>, vector<1x4x128xbf16>
    %68 = vector.shape_cast %67 : vector<1x4x128xbf16> to vector<4x128xbf16>
    %cst_79 = arith.constant dense<0.000000e+00> : vector<64x128xf32>
    %69 = tpu.matmul %66, %68, %cst_79 {dimension_numbers = #tpu.dot_dimension_numbers<[1], [0], [0], [1], [0, 0, 1, 1], [], []>} : vector<64x4xbf16>, vector<4x128xbf16>, vector<64x128xf32> -> vector<64x128xf32>
    %70 = arith.addf %63, %69 : vector<64x128xf32>
    %c0_80 = arith.constant 0 : index
    %c0_81 = arith.constant 0 : index
    %c0_82 = arith.constant 0 : index
    %c1_83 = arith.constant 1 : index
    %c0_84 = arith.constant 0 : index
    %71 = vector.load %arg3[%c0_80, %c0_81, %c0_82, %c1_83, %c0_84] : memref<1x1x10x10x4xbf16, #tpu.memory_space<vmem>>, vector<1x1x8x8x4xbf16>
    %72 = vector.shape_cast %71 : vector<1x1x8x8x4xbf16> to vector<8x8x4xbf16>
    %73 = vector.shape_cast %72 : vector<8x8x4xbf16> to vector<64x4xbf16>
    %c10 = arith.constant 10 : index
    %c0_85 = arith.constant 0 : index
    %c0_86 = arith.constant 0 : index
    %74 = vector.load %arg5[%c10, %c0_85, %c0_86] : memref<27x4x128xbf16, #tpu.memory_space<vmem>>, vector<1x4x128xbf16>
    %75 = vector.shape_cast %74 : vector<1x4x128xbf16> to vector<4x128xbf16>
    %cst_87 = arith.constant dense<0.000000e+00> : vector<64x128xf32>
    %76 = tpu.matmul %73, %75, %cst_87 {dimension_numbers = #tpu.dot_dimension_numbers<[1], [0], [0], [1], [0, 0, 1, 1], [], []>} : vector<64x4xbf16>, vector<4x128xbf16>, vector<64x128xf32> -> vector<64x128xf32>
    %77 = arith.addf %70, %76 : vector<64x128xf32>
    %c0_88 = arith.constant 0 : index
    %c0_89 = arith.constant 0 : index
    %c0_90 = arith.constant 0 : index
    %c2_91 = arith.constant 2 : index
    %c0_92 = arith.constant 0 : index
    %78 = vector.load %arg3[%c0_88, %c0_89, %c0_90, %c2_91, %c0_92] : memref<1x1x10x10x4xbf16, #tpu.memory_space<vmem>>, vector<1x1x8x8x4xbf16>
    %79 = vector.shape_cast %78 : vector<1x1x8x8x4xbf16> to vector<8x8x4xbf16>
    %80 = vector.shape_cast %79 : vector<8x8x4xbf16> to vector<64x4xbf16>
    %c11 = arith.constant 11 : index
    %c0_93 = arith.constant 0 : index
    %c0_94 = arith.constant 0 : index
    %81 = vector.load %arg5[%c11, %c0_93, %c0_94] : memref<27x4x128xbf16, #tpu.memory_space<vmem>>, vector<1x4x128xbf16>
    %82 = vector.shape_cast %81 : vector<1x4x128xbf16> to vector<4x128xbf16>
    %cst_95 = arith.constant dense<0.000000e+00> : vector<64x128xf32>
    %83 = tpu.matmul %80, %82, %cst_95 {dimension_numbers = #tpu.dot_dimension_numbers<[1], [0], [0], [1], [0, 0, 1, 1], [], []>} : vector<64x4xbf16>, vector<4x128xbf16>, vector<64x128xf32> -> vector<64x128xf32>
    %84 = arith.addf %77, %83 : vector<64x128xf32>
    %c0_96 = arith.constant 0 : index
    %c0_97 = arith.constant 0 : index
    %c1_98 = arith.constant 1 : index
    %c0_99 = arith.constant 0 : index
    %c0_100 = arith.constant 0 : index
    %85 = vector.load %arg3[%c0_96, %c0_97, %c1_98, %c0_99, %c0_100] : memref<1x1x10x10x4xbf16, #tpu.memory_space<vmem>>, vector<1x1x8x8x4xbf16>
    %86 = vector.shape_cast %85 : vector<1x1x8x8x4xbf16> to vector<8x8x4xbf16>
    %87 = vector.shape_cast %86 : vector<8x8x4xbf16> to vector<64x4xbf16>
    %c12 = arith.constant 12 : index
    %c0_101 = arith.constant 0 : index
    %c0_102 = arith.constant 0 : index
    %88 = vector.load %arg5[%c12, %c0_101, %c0_102] : memref<27x4x128xbf16, #tpu.memory_space<vmem>>, vector<1x4x128xbf16>
    %89 = vector.shape_cast %88 : vector<1x4x128xbf16> to vector<4x128xbf16>
    %cst_103 = arith.constant dense<0.000000e+00> : vector<64x128xf32>
    %90 = tpu.matmul %87, %89, %cst_103 {dimension_numbers = #tpu.dot_dimension_numbers<[1], [0], [0], [1], [0, 0, 1, 1], [], []>} : vector<64x4xbf16>, vector<4x128xbf16>, vector<64x128xf32> -> vector<64x128xf32>
    %91 = arith.addf %84, %90 : vector<64x128xf32>
    %c0_104 = arith.constant 0 : index
    %c0_105 = arith.constant 0 : index
    %c1_106 = arith.constant 1 : index
    %c1_107 = arith.constant 1 : index
    %c0_108 = arith.constant 0 : index
    %92 = vector.load %arg3[%c0_104, %c0_105, %c1_106, %c1_107, %c0_108] : memref<1x1x10x10x4xbf16, #tpu.memory_space<vmem>>, vector<1x1x8x8x4xbf16>
    %93 = vector.shape_cast %92 : vector<1x1x8x8x4xbf16> to vector<8x8x4xbf16>
    %94 = vector.shape_cast %93 : vector<8x8x4xbf16> to vector<64x4xbf16>
    %c13 = arith.constant 13 : index
    %c0_109 = arith.constant 0 : index
    %c0_110 = arith.constant 0 : index
    %95 = vector.load %arg5[%c13, %c0_109, %c0_110] : memref<27x4x128xbf16, #tpu.memory_space<vmem>>, vector<1x4x128xbf16>
    %96 = vector.shape_cast %95 : vector<1x4x128xbf16> to vector<4x128xbf16>
    %cst_111 = arith.constant dense<0.000000e+00> : vector<64x128xf32>
    %97 = tpu.matmul %94, %96, %cst_111 {dimension_numbers = #tpu.dot_dimension_numbers<[1], [0], [0], [1], [0, 0, 1, 1], [], []>} : vector<64x4xbf16>, vector<4x128xbf16>, vector<64x128xf32> -> vector<64x128xf32>
    %98 = arith.addf %91, %97 : vector<64x128xf32>
    %c0_112 = arith.constant 0 : index
    %c0_113 = arith.constant 0 : index
    %c1_114 = arith.constant 1 : index
    %c2_115 = arith.constant 2 : index
    %c0_116 = arith.constant 0 : index
    %99 = vector.load %arg3[%c0_112, %c0_113, %c1_114, %c2_115, %c0_116] : memref<1x1x10x10x4xbf16, #tpu.memory_space<vmem>>, vector<1x1x8x8x4xbf16>
    %100 = vector.shape_cast %99 : vector<1x1x8x8x4xbf16> to vector<8x8x4xbf16>
    %101 = vector.shape_cast %100 : vector<8x8x4xbf16> to vector<64x4xbf16>
    %c14 = arith.constant 14 : index
    %c0_117 = arith.constant 0 : index
    %c0_118 = arith.constant 0 : index
    %102 = vector.load %arg5[%c14, %c0_117, %c0_118] : memref<27x4x128xbf16, #tpu.memory_space<vmem>>, vector<1x4x128xbf16>
    %103 = vector.shape_cast %102 : vector<1x4x128xbf16> to vector<4x128xbf16>
    %cst_119 = arith.constant dense<0.000000e+00> : vector<64x128xf32>
    %104 = tpu.matmul %101, %103, %cst_119 {dimension_numbers = #tpu.dot_dimension_numbers<[1], [0], [0], [1], [0, 0, 1, 1], [], []>} : vector<64x4xbf16>, vector<4x128xbf16>, vector<64x128xf32> -> vector<64x128xf32>
    %105 = arith.addf %98, %104 : vector<64x128xf32>
    %c0_120 = arith.constant 0 : index
    %c0_121 = arith.constant 0 : index
    %c2_122 = arith.constant 2 : index
    %c0_123 = arith.constant 0 : index
    %c0_124 = arith.constant 0 : index
    %106 = vector.load %arg3[%c0_120, %c0_121, %c2_122, %c0_123, %c0_124] : memref<1x1x10x10x4xbf16, #tpu.memory_space<vmem>>, vector<1x1x8x8x4xbf16>
    %107 = vector.shape_cast %106 : vector<1x1x8x8x4xbf16> to vector<8x8x4xbf16>
    %108 = vector.shape_cast %107 : vector<8x8x4xbf16> to vector<64x4xbf16>
    %c15 = arith.constant 15 : index
    %c0_125 = arith.constant 0 : index
    %c0_126 = arith.constant 0 : index
    %109 = vector.load %arg5[%c15, %c0_125, %c0_126] : memref<27x4x128xbf16, #tpu.memory_space<vmem>>, vector<1x4x128xbf16>
    %110 = vector.shape_cast %109 : vector<1x4x128xbf16> to vector<4x128xbf16>
    %cst_127 = arith.constant dense<0.000000e+00> : vector<64x128xf32>
    %111 = tpu.matmul %108, %110, %cst_127 {dimension_numbers = #tpu.dot_dimension_numbers<[1], [0], [0], [1], [0, 0, 1, 1], [], []>} : vector<64x4xbf16>, vector<4x128xbf16>, vector<64x128xf32> -> vector<64x128xf32>
    %112 = arith.addf %105, %111 : vector<64x128xf32>
    %c0_128 = arith.constant 0 : index
    %c0_129 = arith.constant 0 : index
    %c2_130 = arith.constant 2 : index
    %c1_131 = arith.constant 1 : index
    %c0_132 = arith.constant 0 : index
    %113 = vector.load %arg3[%c0_128, %c0_129, %c2_130, %c1_131, %c0_132] : memref<1x1x10x10x4xbf16, #tpu.memory_space<vmem>>, vector<1x1x8x8x4xbf16>
    %114 = vector.shape_cast %113 : vector<1x1x8x8x4xbf16> to vector<8x8x4xbf16>
    %115 = vector.shape_cast %114 : vector<8x8x4xbf16> to vector<64x4xbf16>
    %c16 = arith.constant 16 : index
    %c0_133 = arith.constant 0 : index
    %c0_134 = arith.constant 0 : index
    %116 = vector.load %arg5[%c16, %c0_133, %c0_134] : memref<27x4x128xbf16, #tpu.memory_space<vmem>>, vector<1x4x128xbf16>
    %117 = vector.shape_cast %116 : vector<1x4x128xbf16> to vector<4x128xbf16>
    %cst_135 = arith.constant dense<0.000000e+00> : vector<64x128xf32>
    %118 = tpu.matmul %115, %117, %cst_135 {dimension_numbers = #tpu.dot_dimension_numbers<[1], [0], [0], [1], [0, 0, 1, 1], [], []>} : vector<64x4xbf16>, vector<4x128xbf16>, vector<64x128xf32> -> vector<64x128xf32>
    %119 = arith.addf %112, %118 : vector<64x128xf32>
    %c0_136 = arith.constant 0 : index
    %c0_137 = arith.constant 0 : index
    %c2_138 = arith.constant 2 : index
    %c2_139 = arith.constant 2 : index
    %c0_140 = arith.constant 0 : index
    %120 = vector.load %arg3[%c0_136, %c0_137, %c2_138, %c2_139, %c0_140] : memref<1x1x10x10x4xbf16, #tpu.memory_space<vmem>>, vector<1x1x8x8x4xbf16>
    %121 = vector.shape_cast %120 : vector<1x1x8x8x4xbf16> to vector<8x8x4xbf16>
    %122 = vector.shape_cast %121 : vector<8x8x4xbf16> to vector<64x4xbf16>
    %c17 = arith.constant 17 : index
    %c0_141 = arith.constant 0 : index
    %c0_142 = arith.constant 0 : index
    %123 = vector.load %arg5[%c17, %c0_141, %c0_142] : memref<27x4x128xbf16, #tpu.memory_space<vmem>>, vector<1x4x128xbf16>
    %124 = vector.shape_cast %123 : vector<1x4x128xbf16> to vector<4x128xbf16>
    %cst_143 = arith.constant dense<0.000000e+00> : vector<64x128xf32>
    %125 = tpu.matmul %122, %124, %cst_143 {dimension_numbers = #tpu.dot_dimension_numbers<[1], [0], [0], [1], [0, 0, 1, 1], [], []>} : vector<64x4xbf16>, vector<4x128xbf16>, vector<64x128xf32> -> vector<64x128xf32>
    %126 = arith.addf %119, %125 : vector<64x128xf32>
    %c0_144 = arith.constant 0 : index
    %c0_145 = arith.constant 0 : index
    %c0_146 = arith.constant 0 : index
    %c0_147 = arith.constant 0 : index
    %c0_148 = arith.constant 0 : index
    %127 = vector.load %arg4[%c0_144, %c0_145, %c0_146, %c0_147, %c0_148] : memref<1x1x10x10x4xbf16, #tpu.memory_space<vmem>>, vector<1x1x8x8x4xbf16>
    %128 = vector.shape_cast %127 : vector<1x1x8x8x4xbf16> to vector<8x8x4xbf16>
    %129 = vector.shape_cast %128 : vector<8x8x4xbf16> to vector<64x4xbf16>
    %c18 = arith.constant 18 : index
    %c0_149 = arith.constant 0 : index
    %c0_150 = arith.constant 0 : index
    %130 = vector.load %arg5[%c18, %c0_149, %c0_150] : memref<27x4x128xbf16, #tpu.memory_space<vmem>>, vector<1x4x128xbf16>
    %131 = vector.shape_cast %130 : vector<1x4x128xbf16> to vector<4x128xbf16>
    %cst_151 = arith.constant dense<0.000000e+00> : vector<64x128xf32>
    %132 = tpu.matmul %129, %131, %cst_151 {dimension_numbers = #tpu.dot_dimension_numbers<[1], [0], [0], [1], [0, 0, 1, 1], [], []>} : vector<64x4xbf16>, vector<4x128xbf16>, vector<64x128xf32> -> vector<64x128xf32>
    %133 = arith.addf %126, %132 : vector<64x128xf32>
    %c0_152 = arith.constant 0 : index
    %c0_153 = arith.constant 0 : index
    %c0_154 = arith.constant 0 : index
    %c1_155 = arith.constant 1 : index
    %c0_156 = arith.constant 0 : index
    %134 = vector.load %arg4[%c0_152, %c0_153, %c0_154, %c1_155, %c0_156] : memref<1x1x10x10x4xbf16, #tpu.memory_space<vmem>>, vector<1x1x8x8x4xbf16>
    %135 = vector.shape_cast %134 : vector<1x1x8x8x4xbf16> to vector<8x8x4xbf16>
    %136 = vector.shape_cast %135 : vector<8x8x4xbf16> to vector<64x4xbf16>
    %c19 = arith.constant 19 : index
    %c0_157 = arith.constant 0 : index
    %c0_158 = arith.constant 0 : index
    %137 = vector.load %arg5[%c19, %c0_157, %c0_158] : memref<27x4x128xbf16, #tpu.memory_space<vmem>>, vector<1x4x128xbf16>
    %138 = vector.shape_cast %137 : vector<1x4x128xbf16> to vector<4x128xbf16>
    %cst_159 = arith.constant dense<0.000000e+00> : vector<64x128xf32>
    %139 = tpu.matmul %136, %138, %cst_159 {dimension_numbers = #tpu.dot_dimension_numbers<[1], [0], [0], [1], [0, 0, 1, 1], [], []>} : vector<64x4xbf16>, vector<4x128xbf16>, vector<64x128xf32> -> vector<64x128xf32>
    %140 = arith.addf %133, %139 : vector<64x128xf32>
    %c0_160 = arith.constant 0 : index
    %c0_161 = arith.constant 0 : index
    %c0_162 = arith.constant 0 : index
    %c2_163 = arith.constant 2 : index
    %c0_164 = arith.constant 0 : index
    %141 = vector.load %arg4[%c0_160, %c0_161, %c0_162, %c2_163, %c0_164] : memref<1x1x10x10x4xbf16, #tpu.memory_space<vmem>>, vector<1x1x8x8x4xbf16>
    %142 = vector.shape_cast %141 : vector<1x1x8x8x4xbf16> to vector<8x8x4xbf16>
    %143 = vector.shape_cast %142 : vector<8x8x4xbf16> to vector<64x4xbf16>
    %c20 = arith.constant 20 : index
    %c0_165 = arith.constant 0 : index
    %c0_166 = arith.constant 0 : index
    %144 = vector.load %arg5[%c20, %c0_165, %c0_166] : memref<27x4x128xbf16, #tpu.memory_space<vmem>>, vector<1x4x128xbf16>
    %145 = vector.shape_cast %144 : vector<1x4x128xbf16> to vector<4x128xbf16>
    %cst_167 = arith.constant dense<0.000000e+00> : vector<64x128xf32>
    %146 = tpu.matmul %143, %145, %cst_167 {dimension_numbers = #tpu.dot_dimension_numbers<[1], [0], [0], [1], [0, 0, 1, 1], [], []>} : vector<64x4xbf16>, vector<4x128xbf16>, vector<64x128xf32> -> vector<64x128xf32>
    %147 = arith.addf %140, %146 : vector<64x128xf32>
    %c0_168 = arith.constant 0 : index
    %c0_169 = arith.constant 0 : index
    %c1_170 = arith.constant 1 : index
    %c0_171 = arith.constant 0 : index
    %c0_172 = arith.constant 0 : index
    %148 = vector.load %arg4[%c0_168, %c0_169, %c1_170, %c0_171, %c0_172] : memref<1x1x10x10x4xbf16, #tpu.memory_space<vmem>>, vector<1x1x8x8x4xbf16>
    %149 = vector.shape_cast %148 : vector<1x1x8x8x4xbf16> to vector<8x8x4xbf16>
    %150 = vector.shape_cast %149 : vector<8x8x4xbf16> to vector<64x4xbf16>
    %c21 = arith.constant 21 : index
    %c0_173 = arith.constant 0 : index
    %c0_174 = arith.constant 0 : index
    %151 = vector.load %arg5[%c21, %c0_173, %c0_174] : memref<27x4x128xbf16, #tpu.memory_space<vmem>>, vector<1x4x128xbf16>
    %152 = vector.shape_cast %151 : vector<1x4x128xbf16> to vector<4x128xbf16>
    %cst_175 = arith.constant dense<0.000000e+00> : vector<64x128xf32>
    %153 = tpu.matmul %150, %152, %cst_175 {dimension_numbers = #tpu.dot_dimension_numbers<[1], [0], [0], [1], [0, 0, 1, 1], [], []>} : vector<64x4xbf16>, vector<4x128xbf16>, vector<64x128xf32> -> vector<64x128xf32>
    %154 = arith.addf %147, %153 : vector<64x128xf32>
    %c0_176 = arith.constant 0 : index
    %c0_177 = arith.constant 0 : index
    %c1_178 = arith.constant 1 : index
    %c1_179 = arith.constant 1 : index
    %c0_180 = arith.constant 0 : index
    %155 = vector.load %arg4[%c0_176, %c0_177, %c1_178, %c1_179, %c0_180] : memref<1x1x10x10x4xbf16, #tpu.memory_space<vmem>>, vector<1x1x8x8x4xbf16>
    %156 = vector.shape_cast %155 : vector<1x1x8x8x4xbf16> to vector<8x8x4xbf16>
    %157 = vector.shape_cast %156 : vector<8x8x4xbf16> to vector<64x4xbf16>
    %c22 = arith.constant 22 : index
    %c0_181 = arith.constant 0 : index
    %c0_182 = arith.constant 0 : index
    %158 = vector.load %arg5[%c22, %c0_181, %c0_182] : memref<27x4x128xbf16, #tpu.memory_space<vmem>>, vector<1x4x128xbf16>
    %159 = vector.shape_cast %158 : vector<1x4x128xbf16> to vector<4x128xbf16>
    %cst_183 = arith.constant dense<0.000000e+00> : vector<64x128xf32>
    %160 = tpu.matmul %157, %159, %cst_183 {dimension_numbers = #tpu.dot_dimension_numbers<[1], [0], [0], [1], [0, 0, 1, 1], [], []>} : vector<64x4xbf16>, vector<4x128xbf16>, vector<64x128xf32> -> vector<64x128xf32>
    %161 = arith.addf %154, %160 : vector<64x128xf32>
    %c0_184 = arith.constant 0 : index
    %c0_185 = arith.constant 0 : index
    %c1_186 = arith.constant 1 : index
    %c2_187 = arith.constant 2 : index
    %c0_188 = arith.constant 0 : index
    %162 = vector.load %arg4[%c0_184, %c0_185, %c1_186, %c2_187, %c0_188] : memref<1x1x10x10x4xbf16, #tpu.memory_space<vmem>>, vector<1x1x8x8x4xbf16>
    %163 = vector.shape_cast %162 : vector<1x1x8x8x4xbf16> to vector<8x8x4xbf16>
    %164 = vector.shape_cast %163 : vector<8x8x4xbf16> to vector<64x4xbf16>
    %c23 = arith.constant 23 : index
    %c0_189 = arith.constant 0 : index
    %c0_190 = arith.constant 0 : index
    %165 = vector.load %arg5[%c23, %c0_189, %c0_190] : memref<27x4x128xbf16, #tpu.memory_space<vmem>>, vector<1x4x128xbf16>
    %166 = vector.shape_cast %165 : vector<1x4x128xbf16> to vector<4x128xbf16>
    %cst_191 = arith.constant dense<0.000000e+00> : vector<64x128xf32>
    %167 = tpu.matmul %164, %166, %cst_191 {dimension_numbers = #tpu.dot_dimension_numbers<[1], [0], [0], [1], [0, 0, 1, 1], [], []>} : vector<64x4xbf16>, vector<4x128xbf16>, vector<64x128xf32> -> vector<64x128xf32>
    %168 = arith.addf %161, %167 : vector<64x128xf32>
    %c0_192 = arith.constant 0 : index
    %c0_193 = arith.constant 0 : index
    %c2_194 = arith.constant 2 : index
    %c0_195 = arith.constant 0 : index
    %c0_196 = arith.constant 0 : index
    %169 = vector.load %arg4[%c0_192, %c0_193, %c2_194, %c0_195, %c0_196] : memref<1x1x10x10x4xbf16, #tpu.memory_space<vmem>>, vector<1x1x8x8x4xbf16>
    %170 = vector.shape_cast %169 : vector<1x1x8x8x4xbf16> to vector<8x8x4xbf16>
    %171 = vector.shape_cast %170 : vector<8x8x4xbf16> to vector<64x4xbf16>
    %c24 = arith.constant 24 : index
    %c0_197 = arith.constant 0 : index
    %c0_198 = arith.constant 0 : index
    %172 = vector.load %arg5[%c24, %c0_197, %c0_198] : memref<27x4x128xbf16, #tpu.memory_space<vmem>>, vector<1x4x128xbf16>
    %173 = vector.shape_cast %172 : vector<1x4x128xbf16> to vector<4x128xbf16>
    %cst_199 = arith.constant dense<0.000000e+00> : vector<64x128xf32>
    %174 = tpu.matmul %171, %173, %cst_199 {dimension_numbers = #tpu.dot_dimension_numbers<[1], [0], [0], [1], [0, 0, 1, 1], [], []>} : vector<64x4xbf16>, vector<4x128xbf16>, vector<64x128xf32> -> vector<64x128xf32>
    %175 = arith.addf %168, %174 : vector<64x128xf32>
    %c0_200 = arith.constant 0 : index
    %c0_201 = arith.constant 0 : index
    %c2_202 = arith.constant 2 : index
    %c1_203 = arith.constant 1 : index
    %c0_204 = arith.constant 0 : index
    %176 = vector.load %arg4[%c0_200, %c0_201, %c2_202, %c1_203, %c0_204] : memref<1x1x10x10x4xbf16, #tpu.memory_space<vmem>>, vector<1x1x8x8x4xbf16>
    %177 = vector.shape_cast %176 : vector<1x1x8x8x4xbf16> to vector<8x8x4xbf16>
    %178 = vector.shape_cast %177 : vector<8x8x4xbf16> to vector<64x4xbf16>
    %c25 = arith.constant 25 : index
    %c0_205 = arith.constant 0 : index
    %c0_206 = arith.constant 0 : index
    %179 = vector.load %arg5[%c25, %c0_205, %c0_206] : memref<27x4x128xbf16, #tpu.memory_space<vmem>>, vector<1x4x128xbf16>
    %180 = vector.shape_cast %179 : vector<1x4x128xbf16> to vector<4x128xbf16>
    %cst_207 = arith.constant dense<0.000000e+00> : vector<64x128xf32>
    %181 = tpu.matmul %178, %180, %cst_207 {dimension_numbers = #tpu.dot_dimension_numbers<[1], [0], [0], [1], [0, 0, 1, 1], [], []>} : vector<64x4xbf16>, vector<4x128xbf16>, vector<64x128xf32> -> vector<64x128xf32>
    %182 = arith.addf %175, %181 : vector<64x128xf32>
    %c0_208 = arith.constant 0 : index
    %c0_209 = arith.constant 0 : index
    %c2_210 = arith.constant 2 : index
    %c2_211 = arith.constant 2 : index
    %c0_212 = arith.constant 0 : index
    %183 = vector.load %arg4[%c0_208, %c0_209, %c2_210, %c2_211, %c0_212] : memref<1x1x10x10x4xbf16, #tpu.memory_space<vmem>>, vector<1x1x8x8x4xbf16>
    %184 = vector.shape_cast %183 : vector<1x1x8x8x4xbf16> to vector<8x8x4xbf16>
    %185 = vector.shape_cast %184 : vector<8x8x4xbf16> to vector<64x4xbf16>
    %c26 = arith.constant 26 : index
    %c0_213 = arith.constant 0 : index
    %c0_214 = arith.constant 0 : index
    %186 = vector.load %arg5[%c26, %c0_213, %c0_214] : memref<27x4x128xbf16, #tpu.memory_space<vmem>>, vector<1x4x128xbf16>
    %187 = vector.shape_cast %186 : vector<1x4x128xbf16> to vector<4x128xbf16>
    %cst_215 = arith.constant dense<0.000000e+00> : vector<64x128xf32>
    %188 = tpu.matmul %185, %187, %cst_215 {dimension_numbers = #tpu.dot_dimension_numbers<[1], [0], [0], [1], [0, 0, 1, 1], [], []>} : vector<64x4xbf16>, vector<4x128xbf16>, vector<64x128xf32> -> vector<64x128xf32>
    %189 = arith.addf %182, %188 : vector<64x128xf32>
    %c0_216 = arith.constant 0 : index
    %c0_217 = arith.constant 0 : index
    %c0_218 = arith.constant 0 : index
    %c0_219 = arith.constant 0 : index
    %190 = vector.load %arg6[%c0_216, %c0_217, %c0_218, %c0_219] : memref<1x1x64x128xf32, #tpu.memory_space<vmem>>, vector<1x1x64x128xf32>
    %191 = vector.shape_cast %190 : vector<1x1x64x128xf32> to vector<64x128xf32>
    %192 = vector.shape_cast %189 : vector<64x128xf32> to vector<1x1x64x128xf32>
    tpu.vector_store %arg6[%c0_216, %c0_217, %c0_218, %c0_219], %192 {strides = array<i32>} : memref<1x1x64x128xf32, #tpu.memory_space<vmem>>, vector<1x1x64x128xf32>,
    %cst_220 = arith.constant dense<0.000000e+00> : vector<128xf32>
    %193 = vector.multi_reduction <add>, %189, %cst_220 [0] : vector<64x128xf32> to vector<128xf32>
    %194 = vector.shape_cast %193 : vector<128xf32> to vector<1x128xf32>
    %c0_221 = arith.constant 0 : index
    %c0_222 = arith.constant 0 : index
    %c0_223 = arith.constant 0 : index
    %c0_224 = arith.constant 0 : index
    %195 = vector.load %arg7[%c0_221, %c0_222, %c0_223, %c0_224] : memref<1x1x1x128xf32, #tpu.memory_space<vmem>>, vector<1x1x1x128xf32>
    %196 = vector.shape_cast %195 : vector<1x1x1x128xf32> to vector<1x128xf32>
    %197 = vector.shape_cast %194 : vector<1x128xf32> to vector<1x1x1x128xf32>
    tpu.vector_store %arg7[%c0_221, %c0_222, %c0_223, %c0_224], %197 {strides = array<i32>} : memref<1x1x1x128xf32, #tpu.memory_space<vmem>>, vector<1x1x1x128xf32>,
    %198 = arith.mulf %189, %189 : vector<64x128xf32>
    %cst_225 = arith.constant dense<0.000000e+00> : vector<128xf32>
    %199 = vector.multi_reduction <add>, %198, %cst_225 [0] : vector<64x128xf32> to vector<128xf32>
    %200 = vector.shape_cast %199 : vector<128xf32> to vector<1x128xf32>
    %c0_226 = arith.constant 0 : index
    %c0_227 = arith.constant 0 : index
    %c0_228 = arith.constant 0 : index
    %c0_229 = arith.constant 0 : index
    %201 = vector.load %arg8[%c0_226, %c0_227, %c0_228, %c0_229] : memref<1x1x1x128xf32, #tpu.memory_space<vmem>>, vector<1x1x1x128xf32>
    %202 = vector.shape_cast %201 : vector<1x1x1x128xf32> to vector<1x128xf32>
    %203 = vector.shape_cast %200 : vector<1x128xf32> to vector<1x1x1x128xf32>
    tpu.vector_store %arg8[%c0_226, %c0_227, %c0_228, %c0_229], %203 {strides = array<i32>} : memref<1x1x1x128xf32, #tpu.memory_space<vmem>>, vector<1x1x1x128xf32>,
    return
  }
  func.func @transform_0(%arg0: i32, %arg1: i32) -> (i32, i32, i32, i32, i32) {
    %c0_i32 = arith.constant 0 : i32
    %0 = arith.addi %arg1, %c0_i32 : i32
    %c0_i32_0 = arith.constant 0 : i32
    %c0_i32_1 = arith.constant 0 : i32
    %c0_i32_2 = arith.constant 0 : i32
    %c0_i32_3 = arith.constant 0 : i32
    return %arg0, %0, %c0_i32_0, %c0_i32_1, %c0_i32_2 : i32, i32, i32, i32, i32
  }
  func.func @transform_1(%arg0: i32, %arg1: i32) -> (i32, i32, i32, i32, i32) {
    %c1_i32 = arith.constant 1 : i32
    %0 = arith.addi %arg1, %c1_i32 : i32
    %c0_i32 = arith.constant 0 : i32
    %c0_i32_0 = arith.constant 0 : i32
    %c0_i32_1 = arith.constant 0 : i32
    %c0_i32_2 = arith.constant 0 : i32
    return %arg0, %0, %c0_i32, %c0_i32_0, %c0_i32_1 : i32, i32, i32, i32, i32
  }
  func.func @transform_2(%arg0: i32, %arg1: i32) -> (i32, i32, i32, i32, i32) {
    %c2_i32 = arith.constant 2 : i32
    %0 = arith.addi %arg1, %c2_i32 : i32
    %c0_i32 = arith.constant 0 : i32
    %c0_i32_0 = arith.constant 0 : i32
    %c0_i32_1 = arith.constant 0 : i32
    %c0_i32_2 = arith.constant 0 : i32
    return %arg0, %0, %c0_i32, %c0_i32_0, %c0_i32_1 : i32, i32, i32, i32, i32
  }
  func.func @transform_3(%arg0: i32, %arg1: i32) -> (i32, i32, i32) {
    %c0_i32 = arith.constant 0 : i32
    %c0_i32_0 = arith.constant 0 : i32
    %c0_i32_1 = arith.constant 0 : i32
    %c0_i32_2 = arith.constant 0 : i32
    return %c0_i32, %c0_i32_0, %c0_i32_1 : i32, i32, i32
  }
  func.func @transform_4(%arg0: i32, %arg1: i32) -> (i32, i32, i32, i32) {
    %c0_i32 = arith.constant 0 : i32
    %c0_i32_0 = arith.constant 0 : i32
    %c0_i32_1 = arith.constant 0 : i32
    return %arg0, %arg1, %c0_i32, %c0_i32_0 : i32, i32, i32, i32
  }
  func.func @transform_5(%arg0: i32, %arg1: i32) -> (i32, i32, i32, i32) {
    %c0_i32 = arith.constant 0 : i32
    %c0_i32_0 = arith.constant 0 : i32
    %c0_i32_1 = arith.constant 0 : i32
    return %arg0, %arg1, %c0_i32, %c0_i32_0 : i32, i32, i32, i32
  }
  func.func @transform_6(%arg0: i32, %arg1: i32) -> (i32, i32, i32, i32) {
    %c0_i32 = arith.constant 0 : i32
    %c0_i32_0 = arith.constant 0 : i32
    %c0_i32_1 = arith.constant 0 : i32
    return %arg0, %arg1, %c0_i32, %c0_i32_0 : i32, i32, i32, i32
  }
}

module attributes {stable_mosaic.version = 11 : i64} {
  func.func @bn_relu_kernel(%arg0: i32, %arg1: memref<1024x128xf32, #tpu.memory_space<vmem>>, %arg2: memref<1x128xf32, #tpu.memory_space<vmem>>, %arg3: memref<1x128xf32, #tpu.memory_space<vmem>>, %arg4: memref<1024x128xf32, #tpu.memory_space<vmem>>) attributes {dimension_semantics = [#tpu.dimension_semantics<parallel>], iteration_bounds = array<i64: 1>, scalar_prefetch = 0 : i64, scratch_operands = 0 : i64, tpu.core_type = #tpu.core_type<tc>, window_params = [{transform_indices = @transform_0, window_bounds = array<i64: 1024, 128>}, {pipeline_mode = #tpu.pipeline_mode<synchronous>, transform_indices = @transform_1, window_bounds = array<i64: 1, 128>}, {pipeline_mode = #tpu.pipeline_mode<synchronous>, transform_indices = @transform_2, window_bounds = array<i64: 1, 128>}, {transform_indices = @transform_3, window_bounds = array<i64: 1024, 128>}]} {
    %c0 = arith.constant 0 : index
    %c0_0 = arith.constant 0 : index
    %0 = vector.load %arg1[%c0, %c0_0] : memref<1024x128xf32, #tpu.memory_space<vmem>>, vector<1024x128xf32>
    %c0_1 = arith.constant 0 : index
    %c0_2 = arith.constant 0 : index
    %1 = vector.load %arg2[%c0_1, %c0_2] : memref<1x128xf32, #tpu.memory_space<vmem>>, vector<1x128xf32>
    %2 = vector.broadcast %1 : vector<1x128xf32> to vector<1024x128xf32>
    %3 = arith.mulf %0, %2 : vector<1024x128xf32>
    %c0_3 = arith.constant 0 : index
    %c0_4 = arith.constant 0 : index
    %4 = vector.load %arg3[%c0_3, %c0_4] : memref<1x128xf32, #tpu.memory_space<vmem>>, vector<1x128xf32>
    %5 = vector.broadcast %4 : vector<1x128xf32> to vector<1024x128xf32>
    %6 = arith.addf %3, %5 : vector<1024x128xf32>
    %cst = arith.constant 0.000000e+00 : f32
    %7 = vector.broadcast %cst : f32 to vector<1024x128xf32>
    %8 = arith.maximumf %6, %7 : vector<1024x128xf32>
    %c0_5 = arith.constant 0 : index
    %c0_6 = arith.constant 0 : index
    %9 = vector.load %arg4[%c0_5, %c0_6] : memref<1024x128xf32, #tpu.memory_space<vmem>>, vector<1024x128xf32>
    tpu.vector_store %arg4[%c0_5, %c0_6], %8 {strides = array<i32>} : memref<1024x128xf32, #tpu.memory_space<vmem>>, vector<1024x128xf32>,
    return
  }
  func.func @transform_0(%arg0: i32) -> (i32, i32) {
    %c0_i32 = arith.constant 0 : i32
    %c0_i32_0 = arith.constant 0 : i32
    return %arg0, %c0_i32 : i32, i32
  }
  func.func @transform_1(%arg0: i32) -> (i32, i32) {
    %c0_i32 = arith.constant 0 : i32
    %c0_i32_0 = arith.constant 0 : i32
    %c0_i32_1 = arith.constant 0 : i32
    return %c0_i32, %c0_i32_0 : i32, i32
  }
  func.func @transform_2(%arg0: i32) -> (i32, i32) {
    %c0_i32 = arith.constant 0 : i32
    %c0_i32_0 = arith.constant 0 : i32
    %c0_i32_1 = arith.constant 0 : i32
    return %c0_i32, %c0_i32_0 : i32, i32
  }
  func.func @transform_3(%arg0: i32) -> (i32, i32) {
    %c0_i32 = arith.constant 0 : i32
    %c0_i32_0 = arith.constant 0 : i32
    return %arg0, %c0_i32 : i32, i32
  }
}

</mosaic_0001>

<bundles_post_ra>
// kernel: up_conv_forward.3
= control target key start
LH: loop header
LB: loop body
LE: loop exit
PB: predicated region body
PF: predicated region fallthrough
CT: control target
= control target key end

     0   :  { %s1740_s0 = inlined_call_operand.vmem [shape: f32[1024,128], index: 0, kind: input, shape index: {}]   ;;  %s1741_s1 = inlined_call_operand.vmem [shape: f32[1,128], index: 1, kind: input, shape index: {}]   ;;  %s1742_s2 = inlined_call_operand.vmem [shape: f32[1,128], index: 2, kind: input, shape index: {}]   ;;  %s1743_s3 = inlined_call_operand.vmem [shape: f32[1024,128], index: 3, kind: output, shape index: {}]  }
   0x1   :  { %v14_v0 = vld [vmem:[%s1740_s0] sm:$0xff]  ;;  %v15_v4 = vld [vmem:[%s1740_s0 + $0x8] sm:$0xff]  ;;  %v16_v5 = vld [vmem:[%s1740_s0 + $0x10] sm:$0xff] }
   0x2   :  { %v702_v1 = vld [vmem:[%s1741_s1] ss:$0 sm:$0xff]  ;;  %v17_v6 = vld [vmem:[%s1740_s0 + $0x18] sm:$0xff]  ;;  %v19_v11 = vld [vmem:[%s1740_s0 + $0x28] sm:$0xff] }
   0x3   :  { %v707_v2 = vld [vmem:[%s1742_s2] ss:$0 sm:$0xff]  ;;  %v149_v3 = vmul.f32 %v702_v1, %v14_v0  ;;  %v150_v7 = vmul.f32 %v702_v1, %v15_v4  ;;  %v151_v8 = vmul.f32 %v702_v1, %v16_v5  ;;  %v152_v9 = vmul.f32 %v702_v1, %v17_v6  ;;  %v20_v12 = vld [vmem:[%s1740_s0 + $0x30] sm:$0xff]  ;;  %v21_v17 = vld [vmem:[%s1740_s0 + $0x38] sm:$0xff] }
   0x4   :  { %v18_v10 = vld [vmem:[%s1740_s0 + $0x20] sm:$0xff]  ;;  %v154_v15 = vmul.f32 %v702_v1, %v19_v11  ;;  %v155_v16 = vmul.f32 %v702_v1, %v20_v12  ;;  %v156_v21 = vmul.f32 %v702_v1, %v21_v17  ;;  %v23_v27 = vld [vmem:[%s1740_s0 + $0x48] sm:$0xff]  ;;  %v24_v28 = vld [vmem:[%s1740_s0 + $0x50] sm:$0xff] }
   0x5   :  { %v284_v13 = vadd.f32 %v707_v2, %v149_v3  ;;  %v153_v14 = vmul.f32 %v702_v1, %v18_v10  ;;  %v285_v18 = vadd.f32 %v707_v2, %v150_v7  ;;  %v286_v19 = vadd.f32 %v707_v2, %v151_v8  ;;  %v22_v22 = vld [vmem:[%s1740_s0 + $0x40] sm:$0xff]  ;;  %v25_v29 = vld [vmem:[%s1740_s0 + $0x58] sm:$0xff]  ;;  %v27_v35 = vld [vmem:[%s1740_s0 + $0x68] sm:$0xff] }
   0x6   :  { %v287_v20 = vadd.f32 %v707_v2, %v152_v9  ;;  %v289_v25 = vadd.f32 %v707_v2, %v154_v15  ;;  %v290_v26 = vadd.f32 %v707_v2, %v155_v16  ;;  %v291_v33 = vadd.f32 %v707_v2, %v156_v21  ;;  %v26_v34 = vld [vmem:[%s1740_s0 + $0x60] sm:$0xff]  ;;  %v28_v36 = vld [vmem:[%s1740_s0 + $0x70] sm:$0xff]  ;;  %v29_v41 = vld [vmem:[%s1740_s0 + $0x78] sm:$0xff] }
   0x7   :  { %v412_v23 = vmax.f32 %v284_v13, 0.0  ;;  %v288_v24 = vadd.f32 %v707_v2, %v153_v14  ;;  %v413_v30 = vmax.f32 %v285_v18, 0.0  ;;  %v414_v31 = vmax.f32 %v286_v19, 0.0  ;;  %v30_v54 = vld [vmem:[%s1740_s0 + $0x80] sm:$0xff]  ;;  %v31_v59 = vld [vmem:[%s1740_s0 + $0x88] sm:$0xff]  ;;  %v32_v60 = vld [vmem:[%s1740_s0 + $0x90] sm:$0xff] }
   0x8   :  { %v415_v32 = vmax.f32 %v287_v20, 0.0  ;;  %v417_v38 = vmax.f32 %v289_v25, 0.0  ;;  %v418_v39 = vmax.f32 %v290_v26, 0.0  ;;  %v157_v40 = vmul.f32 %v702_v1, %v22_v22  ;;  %v33_v61 = vld [vmem:[%s1740_s0 + $0x98] sm:$0xff]  ;;  %v34_v4 = vld [vmem:[%s1740_s0 + $0xa0] sm:$0xff]  ;;  %v35_v5 = vld [vmem:[%s1740_s0 + $0xa8] sm:$0xff] }
   0x9   :  { %540 = vst [vmem:[%s1743_s3] sm:$0xff] %v412_v23  ;;  %v416_v37 = vmax.f32 %v288_v24, 0.0  ;;  %541 = vst [vmem:[%s1743_s3 + $0x8] sm:$0xff] %v413_v30  ;;  %v419_v42 = vmax.f32 %v291_v33, 0.0  ;;  %v158_v43 = vmul.f32 %v702_v1, %v23_v27  ;;  %v159_v44 = vmul.f32 %v702_v1, %v24_v28  ;;  %v36_v6 = vld [vmem:[%s1740_s0 + $0xb0] sm:$0xff]  ;;  %v37_v11 = vld [vmem:[%s1740_s0 + $0xb8] sm:$0xff] }
   0xa   :  { %542 = vst [vmem:[%s1743_s3 + $0x10] sm:$0xff] %v414_v31  ;;  %543 = vst [vmem:[%s1743_s3 + $0x18] sm:$0xff] %v415_v32  ;;  %v160_v45 = vmul.f32 %v702_v1, %v25_v29  ;;  %v292_v46 = vadd.f32 %v707_v2, %v157_v40  ;;  %v161_v47 = vmul.f32 %v702_v1, %v26_v34  ;;  %v38_v24 = vld [vmem:[%s1740_s0 + $0xc0] sm:$0xff]  ;;  %v39_v29 = vld [vmem:[%s1740_s0 + $0xc8] sm:$0xff] }
   0xb   :  { %544 = vst [vmem:[%s1743_s3 + $0x20] sm:$0xff] %v416_v37  ;;  %545 = vst [vmem:[%s1743_s3 + $0x28] sm:$0xff] %v417_v38  ;;  %v162_v48 = vmul.f32 %v702_v1, %v27_v35  ;;  %v163_v49 = vmul.f32 %v702_v1, %v28_v36  ;;  %v293_v50 = vadd.f32 %v707_v2, %v158_v43  ;;  %v40_v30 = vld [vmem:[%s1740_s0 + $0xd0] sm:$0xff]  ;;  %v41_v31 = vld [vmem:[%s1740_s0 + $0xd8] sm:$0xff] }
   0xc   :  { %546 = vst [vmem:[%s1743_s3 + $0x30] sm:$0xff] %v418_v39  ;;  %547 = vst [vmem:[%s1743_s3 + $0x38] sm:$0xff] %v419_v42  ;;  %v294_v51 = vadd.f32 %v707_v2, %v159_v44  ;;  %v295_v52 = vadd.f32 %v707_v2, %v160_v45  ;;  %v164_v53 = vmul.f32 %v702_v1, %v29_v41  ;;  %v420_v55 = vmax.f32 %v292_v46, 0.0  ;;  %v42_v36 = vld [vmem:[%s1740_s0 + $0xe0] sm:$0xff]  ;;  %v43_v37 = vld [vmem:[%s1740_s0 + $0xe8] sm:$0xff] }
   0xd   :  { %v296_v56 = vadd.f32 %v707_v2, %v161_v47  ;;  %v297_v57 = vadd.f32 %v707_v2, %v162_v48  ;;  %v298_v58 = vadd.f32 %v707_v2, %v163_v49  ;;  %v421_v62 = vmax.f32 %v293_v50, 0.0  ;;  %v44_v38 = vld [vmem:[%s1740_s0 + $0xf0] sm:$0xff]  ;;  %v45_v43 = vld [vmem:[%s1740_s0 + $0xf8] sm:$0xff] }
   0xe   :  { %v422_v63 = vmax.f32 %v294_v51, 0.0  ;;  %v423_v0 = vmax.f32 %v295_v52, 0.0  ;;  %v299_v3 = vadd.f32 %v707_v2, %v164_v53  ;;  %548 = vst [vmem:[%s1743_s3 + $0x40] sm:$0xff] %v420_v55  ;;  %v165_v10 = vmul.f32 %v702_v1, %v30_v54 }
   0xf   :  { %v424_v7 = vmax.f32 %v296_v56, 0.0  ;;  %v425_v8 = vmax.f32 %v297_v57, 0.0  ;;  %v426_v9 = vmax.f32 %v298_v58, 0.0  ;;  %549 = vst [vmem:[%s1743_s3 + $0x48] sm:$0xff] %v421_v62  ;;  %v166_v13 = vmul.f32 %v702_v1, %v31_v59  ;;  %v46_v56 = vld [vmem:[%s1740_s0 + $0x100] sm:$0xff]  ;;  %v48_v62 = vld [vmem:[%s1740_s0 + $0x110] sm:$0xff] }
  0x10   :  { %550 = vst [vmem:[%s1743_s3 + $0x50] sm:$0xff] %v422_v63  ;;  %551 = vst [vmem:[%s1743_s3 + $0x58] sm:$0xff] %v423_v0  ;;  %v427_v12 = vmax.f32 %v299_v3, 0.0  ;;  %v167_v14 = vmul.f32 %v702_v1, %v32_v60  ;;  %v168_v15 = vmul.f32 %v702_v1, %v33_v61  ;;  %v300_v16 = vadd.f32 %v707_v2, %v165_v10  ;;  %v47_v61 = vld [vmem:[%s1740_s0 + $0x108] sm:$0xff]  ;;  %v49_v63 = vld [vmem:[%s1740_s0 + $0x118] sm:$0xff] }
  0x11   :  { %552 = vst [vmem:[%s1743_s3 + $0x60] sm:$0xff] %v424_v7  ;;  %553 = vst [vmem:[%s1743_s3 + $0x68] sm:$0xff] %v425_v8  ;;  %v169_v17 = vmul.f32 %v702_v1, %v34_v4  ;;  %v170_v18 = vmul.f32 %v702_v1, %v35_v5  ;;  %v171_v19 = vmul.f32 %v702_v1, %v36_v6  ;;  %v50_v6 = vld [vmem:[%s1740_s0 + $0x120] sm:$0xff]  ;;  %v51_v7 = vld [vmem:[%s1740_s0 + $0x128] sm:$0xff] }
  0x12   :  { %554 = vst [vmem:[%s1743_s3 + $0x70] sm:$0xff] %v426_v9  ;;  %555 = vst [vmem:[%s1743_s3 + $0x78] sm:$0xff] %v427_v12  ;;  %v301_v20 = vadd.f32 %v707_v2, %v166_v13  ;;  %v302_v21 = vadd.f32 %v707_v2, %v167_v14  ;;  %v303_v22 = vadd.f32 %v707_v2, %v168_v15  ;;  %v428_v25 = vmax.f32 %v300_v16, 0.0  ;;  %v52_v8 = vld [vmem:[%s1740_s0 + $0x130] sm:$0xff]  ;;  %v53_v13 = vld [vmem:[%s1740_s0 + $0x138] sm:$0xff] }
  0x13   :  { %v172_v23 = vmul.f32 %v702_v1, %v37_v11  ;;  %v304_v26 = vadd.f32 %v707_v2, %v169_v17  ;;  %v305_v27 = vadd.f32 %v707_v2, %v170_v18  ;;  %v306_v28 = vadd.f32 %v707_v2, %v171_v19 }
  0x14   :  { %v429_v32 = vmax.f32 %v301_v20, 0.0  ;;  %v430_v33 = vmax.f32 %v302_v21, 0.0  ;;  %v431_v34 = vmax.f32 %v303_v22, 0.0  ;;  %556 = vst [vmem:[%s1743_s3 + $0x80] sm:$0xff] %v428_v25  ;;  %v173_v42 = vmul.f32 %v702_v1, %v38_v24 }
  0x15   :  { %v307_v35 = vadd.f32 %v707_v2, %v172_v23  ;;  %v432_v39 = vmax.f32 %v304_v26, 0.0  ;;  %v433_v40 = vmax.f32 %v305_v27, 0.0  ;;  %v434_v41 = vmax.f32 %v306_v28, 0.0  ;;  %v54_v26 = vld [vmem:[%s1740_s0 + $0x140] sm:$0xff] }
  0x16   :  { %557 = vst [vmem:[%s1743_s3 + $0x88] sm:$0xff] %v429_v32  ;;  %558 = vst [vmem:[%s1743_s3 + $0x90] sm:$0xff] %v430_v33  ;;  %v174_v45 = vmul.f32 %v702_v1, %v39_v29  ;;  %v175_v46 = vmul.f32 %v702_v1, %v40_v30  ;;  %v176_v47 = vmul.f32 %v702_v1, %v41_v31  ;;  %v55_v31 = vld [vmem:[%s1740_s0 + $0x148] sm:$0xff]  ;;  %v56_v32 = vld [vmem:[%s1740_s0 + $0x150] sm:$0xff] }
  0x17   :  { %559 = vst [vmem:[%s1743_s3 + $0x98] sm:$0xff] %v431_v34  ;;  %v435_v44 = vmax.f32 %v307_v35, 0.0  ;;  %560 = vst [vmem:[%s1743_s3 + $0xa0] sm:$0xff] %v432_v39  ;;  %v308_v48 = vadd.f32 %v707_v2, %v173_v42  ;;  %v177_v49 = vmul.f32 %v702_v1, %v42_v36  ;;  %v178_v50 = vmul.f32 %v702_v1, %v43_v37  ;;  %v57_v33 = vld [vmem:[%s1740_s0 + $0x158] sm:$0xff]  ;;  %v59_v39 = vld [vmem:[%s1740_s0 + $0x168] sm:$0xff] }
  0x18   :  { %561 = vst [vmem:[%s1743_s3 + $0xa8] sm:$0xff] %v433_v40  ;;  %562 = vst [vmem:[%s1743_s3 + $0xb0] sm:$0xff] %v434_v41  ;;  %v179_v51 = vmul.f32 %v702_v1, %v44_v38  ;;  %v309_v52 = vadd.f32 %v707_v2, %v174_v45  ;;  %v310_v53 = vadd.f32 %v707_v2, %v175_v46  ;;  %v58_v38 = vld [vmem:[%s1740_s0 + $0x160] sm:$0xff]  ;;  %v60_v40 = vld [vmem:[%s1740_s0 + $0x170] sm:$0xff] }
  0x19   :  { %563 = vst [vmem:[%s1743_s3 + $0xb8] sm:$0xff] %v435_v44  ;;  %v311_v54 = vadd.f32 %v707_v2, %v176_v47  ;;  %v180_v55 = vmul.f32 %v702_v1, %v45_v43  ;;  %v436_v57 = vmax.f32 %v308_v48, 0.0  ;;  %v312_v58 = vadd.f32 %v707_v2, %v177_v49  ;;  %v61_v45 = vld [vmem:[%s1740_s0 + $0x178] sm:$0xff] }
  0x1a   :  { %v313_v59 = vadd.f32 %v707_v2, %v178_v50  ;;  %v314_v60 = vadd.f32 %v707_v2, %v179_v51  ;;  %v437_v0 = vmax.f32 %v309_v52, 0.0  ;;  %v438_v3 = vmax.f32 %v310_v53, 0.0 }
  0x1b   :  { %v439_v4 = vmax.f32 %v311_v54, 0.0  ;;  %v315_v5 = vadd.f32 %v707_v2, %v180_v55  ;;  %564 = vst [vmem:[%s1743_s3 + $0xc0] sm:$0xff] %v436_v57  ;;  %v440_v9 = vmax.f32 %v312_v58, 0.0  ;;  %v181_v12 = vmul.f32 %v702_v1, %v46_v56  ;;  %v62_v58 = vld [vmem:[%s1740_s0 + $0x180] sm:$0xff] }
  0x1c   :  { %v441_v10 = vmax.f32 %v313_v59, 0.0  ;;  %v442_v11 = vmax.f32 %v314_v60, 0.0  ;;  %565 = vst [vmem:[%s1743_s3 + $0xc8] sm:$0xff] %v437_v0  ;;  %566 = vst [vmem:[%s1743_s3 + $0xd0] sm:$0xff] %v438_v3  ;;  %v182_v15 = vmul.f32 %v702_v1, %v47_v61  ;;  %v183_v16 = vmul.f32 %v702_v1, %v48_v62  ;;  %v64_v0 = vld [vmem:[%s1740_s0 + $0x190] sm:$0xff]  ;;  %v65_v3 = vld [vmem:[%s1740_s0 + $0x198] sm:$0xff] }
  0x1d   :  { %567 = vst [vmem:[%s1743_s3 + $0xd8] sm:$0xff] %v439_v4  ;;  %v443_v14 = vmax.f32 %v315_v5, 0.0  ;;  %v184_v17 = vmul.f32 %v702_v1, %v49_v63  ;;  %568 = vst [vmem:[%s1743_s3 + $0xe0] sm:$0xff] %v440_v9  ;;  %v316_v18 = vadd.f32 %v707_v2, %v181_v12  ;;  %v185_v19 = vmul.f32 %v702_v1, %v50_v6  ;;  %v63_v63 = vld [vmem:[%s1740_s0 + $0x188] sm:$0xff] }
  0x1e   :  { %569 = vst [vmem:[%s1743_s3 + $0xe8] sm:$0xff] %v441_v10  ;;  %570 = vst [vmem:[%s1743_s3 + $0xf0] sm:$0xff] %v442_v11  ;;  %v186_v20 = vmul.f32 %v702_v1, %v51_v7  ;;  %v187_v21 = vmul.f32 %v702_v1, %v52_v8  ;;  %v317_v22 = vadd.f32 %v707_v2, %v182_v15  ;;  %v66_v8 = vld [vmem:[%s1740_s0 + $0x1a0] sm:$0xff]  ;;  %v67_v9 = vld [vmem:[%s1740_s0 + $0x1a8] sm:$0xff] }
  0x1f   :  { %571 = vst [vmem:[%s1743_s3 + $0xf8] sm:$0xff] %v443_v14  ;;  %v318_v23 = vadd.f32 %v707_v2, %v183_v16  ;;  %v319_v24 = vadd.f32 %v707_v2, %v184_v17  ;;  %v188_v25 = vmul.f32 %v702_v1, %v53_v13  ;;  %v444_v27 = vmax.f32 %v316_v18, 0.0  ;;  %v68_v10 = vld [vmem:[%s1740_s0 + $0x1b0] sm:$0xff]  ;;  %v69_v15 = vld [vmem:[%s1740_s0 + $0x1b8] sm:$0xff] }
  0x20   :  { %v320_v28 = vadd.f32 %v707_v2, %v185_v19  ;;  %v321_v29 = vadd.f32 %v707_v2, %v186_v20  ;;  %v322_v30 = vadd.f32 %v707_v2, %v187_v21  ;;  %v445_v34 = vmax.f32 %v317_v22, 0.0 }
  0x21   :  { %v446_v35 = vmax.f32 %v318_v23, 0.0  ;;  %v447_v36 = vmax.f32 %v319_v24, 0.0  ;;  %v323_v37 = vadd.f32 %v707_v2, %v188_v25  ;;  %572 = vst [vmem:[%s1743_s3 + $0x100] sm:$0xff] %v444_v27  ;;  %v189_v44 = vmul.f32 %v702_v1, %v54_v26 }
  0x22   :  { %v448_v41 = vmax.f32 %v320_v28, 0.0  ;;  %v449_v42 = vmax.f32 %v321_v29, 0.0  ;;  %v450_v43 = vmax.f32 %v322_v30, 0.0  ;;  %573 = vst [vmem:[%s1743_s3 + $0x108] sm:$0xff] %v445_v34  ;;  %v190_v47 = vmul.f32 %v702_v1, %v55_v31  ;;  %v70_v28 = vld [vmem:[%s1740_s0 + $0x1c0] sm:$0xff]  ;;  %v72_v34 = vld [vmem:[%s1740_s0 + $0x1d0] sm:$0xff] }
  0x23   :  { %574 = vst [vmem:[%s1743_s3 + $0x110] sm:$0xff] %v446_v35  ;;  %575 = vst [vmem:[%s1743_s3 + $0x118] sm:$0xff] %v447_v36  ;;  %v451_v46 = vmax.f32 %v323_v37, 0.0  ;;  %v191_v48 = vmul.f32 %v702_v1, %v56_v32  ;;  %v192_v49 = vmul.f32 %v702_v1, %v57_v33  ;;  %v324_v50 = vadd.f32 %v707_v2, %v189_v44  ;;  %v71_v33 = vld [vmem:[%s1740_s0 + $0x1c8] sm:$0xff]  ;;  %v73_v35 = vld [vmem:[%s1740_s0 + $0x1d8] sm:$0xff] }
  0x24   :  { %576 = vst [vmem:[%s1743_s3 + $0x120] sm:$0xff] %v448_v41  ;;  %577 = vst [vmem:[%s1743_s3 + $0x128] sm:$0xff] %v449_v42  ;;  %v193_v51 = vmul.f32 %v702_v1, %v58_v38  ;;  %v194_v52 = vmul.f32 %v702_v1, %v59_v39  ;;  %v195_v53 = vmul.f32 %v702_v1, %v60_v40  ;;  %v74_v40 = vld [vmem:[%s1740_s0 + $0x1e0] sm:$0xff]  ;;  %v75_v41 = vld [vmem:[%s1740_s0 + $0x1e8] sm:$0xff] }
  0x25   :  { %578 = vst [vmem:[%s1743_s3 + $0x130] sm:$0xff] %v450_v43  ;;  %579 = vst [vmem:[%s1743_s3 + $0x138] sm:$0xff] %v451_v46  ;;  %v325_v54 = vadd.f32 %v707_v2, %v190_v47  ;;  %v326_v55 = vadd.f32 %v707_v2, %v191_v48  ;;  %v327_v56 = vadd.f32 %v707_v2, %v192_v49  ;;  %v452_v59 = vmax.f32 %v324_v50, 0.0  ;;  %v76_v42 = vld [vmem:[%s1740_s0 + $0x1f0] sm:$0xff]  ;;  %v77_v47 = vld [vmem:[%s1740_s0 + $0x1f8] sm:$0xff] }
  0x26   :  { %v196_v57 = vmul.f32 %v702_v1, %v61_v45  ;;  %v328_v60 = vadd.f32 %v707_v2, %v193_v51  ;;  %v329_v61 = vadd.f32 %v707_v2, %v194_v52  ;;  %v330_v62 = vadd.f32 %v707_v2, %v195_v53 }
  0x27   :  { %v453_v4 = vmax.f32 %v325_v54, 0.0  ;;  %v454_v5 = vmax.f32 %v326_v55, 0.0  ;;  %v455_v6 = vmax.f32 %v327_v56, 0.0  ;;  %580 = vst [vmem:[%s1743_s3 + $0x140] sm:$0xff] %v452_v59  ;;  %v197_v14 = vmul.f32 %v702_v1, %v62_v58 }
  0x28   :  { %v331_v7 = vadd.f32 %v707_v2, %v196_v57  ;;  %v456_v11 = vmax.f32 %v328_v60, 0.0  ;;  %v457_v12 = vmax.f32 %v329_v61, 0.0  ;;  %v458_v13 = vmax.f32 %v330_v62, 0.0  ;;  %v78_v60 = vld [vmem:[%s1740_s0 + $0x200] sm:$0xff] }
  0x29   :  { %581 = vst [vmem:[%s1743_s3 + $0x148] sm:$0xff] %v453_v4  ;;  %582 = vst [vmem:[%s1743_s3 + $0x150] sm:$0xff] %v454_v5  ;;  %v198_v17 = vmul.f32 %v702_v1, %v63_v63  ;;  %v199_v18 = vmul.f32 %v702_v1, %v64_v0  ;;  %v200_v19 = vmul.f32 %v702_v1, %v65_v3  ;;  %v79_v3 = vld [vmem:[%s1740_s0 + $0x208] sm:$0xff]  ;;  %v80_v4 = vld [vmem:[%s1740_s0 + $0x210] sm:$0xff] }
  0x2a   :  { %583 = vst [vmem:[%s1743_s3 + $0x158] sm:$0xff] %v455_v6  ;;  %v459_v16 = vmax.f32 %v331_v7, 0.0  ;;  %584 = vst [vmem:[%s1743_s3 + $0x160] sm:$0xff] %v456_v11  ;;  %v332_v20 = vadd.f32 %v707_v2, %v197_v14  ;;  %v201_v21 = vmul.f32 %v702_v1, %v66_v8  ;;  %v202_v22 = vmul.f32 %v702_v1, %v67_v9  ;;  %v81_v5 = vld [vmem:[%s1740_s0 + $0x218] sm:$0xff]  ;;  %v83_v11 = vld [vmem:[%s1740_s0 + $0x228] sm:$0xff] }
  0x2b   :  { %585 = vst [vmem:[%s1743_s3 + $0x168] sm:$0xff] %v457_v12  ;;  %586 = vst [vmem:[%s1743_s3 + $0x170] sm:$0xff] %v458_v13  ;;  %v203_v23 = vmul.f32 %v702_v1, %v68_v10  ;;  %v333_v24 = vadd.f32 %v707_v2, %v198_v17  ;;  %v334_v25 = vadd.f32 %v707_v2, %v199_v18  ;;  %v82_v10 = vld [vmem:[%s1740_s0 + $0x220] sm:$0xff]  ;;  %v84_v12 = vld [vmem:[%s1740_s0 + $0x230] sm:$0xff] }
  0x2c   :  { %587 = vst [vmem:[%s1743_s3 + $0x178] sm:$0xff] %v459_v16  ;;  %v335_v26 = vadd.f32 %v707_v2, %v200_v19  ;;  %v204_v27 = vmul.f32 %v702_v1, %v69_v15  ;;  %v460_v29 = vmax.f32 %v332_v20, 0.0  ;;  %v336_v30 = vadd.f32 %v707_v2, %v201_v21  ;;  %v85_v17 = vld [vmem:[%s1740_s0 + $0x238] sm:$0xff] }
  0x2d   :  { %v337_v31 = vadd.f32 %v707_v2, %v202_v22  ;;  %v338_v32 = vadd.f32 %v707_v2, %v203_v23  ;;  %v461_v36 = vmax.f32 %v333_v24, 0.0  ;;  %v462_v37 = vmax.f32 %v334_v25, 0.0 }
  0x2e   :  { %v463_v38 = vmax.f32 %v335_v26, 0.0  ;;  %v339_v39 = vadd.f32 %v707_v2, %v204_v27  ;;  %588 = vst [vmem:[%s1743_s3 + $0x180] sm:$0xff] %v460_v29  ;;  %v464_v43 = vmax.f32 %v336_v30, 0.0  ;;  %v205_v46 = vmul.f32 %v702_v1, %v70_v28  ;;  %v86_v30 = vld [vmem:[%s1740_s0 + $0x240] sm:$0xff] }
  0x2f   :  { %v465_v44 = vmax.f32 %v337_v31, 0.0  ;;  %v466_v45 = vmax.f32 %v338_v32, 0.0  ;;  %589 = vst [vmem:[%s1743_s3 + $0x188] sm:$0xff] %v461_v36  ;;  %590 = vst [vmem:[%s1743_s3 + $0x190] sm:$0xff] %v462_v37  ;;  %v206_v49 = vmul.f32 %v702_v1, %v71_v33  ;;  %v207_v50 = vmul.f32 %v702_v1, %v72_v34  ;;  %v88_v36 = vld [vmem:[%s1740_s0 + $0x250] sm:$0xff]  ;;  %v89_v37 = vld [vmem:[%s1740_s0 + $0x258] sm:$0xff] }
  0x30   :  { %591 = vst [vmem:[%s1743_s3 + $0x198] sm:$0xff] %v463_v38  ;;  %v467_v48 = vmax.f32 %v339_v39, 0.0  ;;  %v208_v51 = vmul.f32 %v702_v1, %v73_v35  ;;  %592 = vst [vmem:[%s1743_s3 + $0x1a0] sm:$0xff] %v464_v43  ;;  %v340_v52 = vadd.f32 %v707_v2, %v205_v46  ;;  %v209_v53 = vmul.f32 %v702_v1, %v74_v40  ;;  %v87_v35 = vld [vmem:[%s1740_s0 + $0x248] sm:$0xff] }
  0x31   :  { %593 = vst [vmem:[%s1743_s3 + $0x1a8] sm:$0xff] %v465_v44  ;;  %594 = vst [vmem:[%s1743_s3 + $0x1b0] sm:$0xff] %v466_v45  ;;  %v210_v54 = vmul.f32 %v702_v1, %v75_v41  ;;  %v211_v55 = vmul.f32 %v702_v1, %v76_v42  ;;  %v341_v56 = vadd.f32 %v707_v2, %v206_v49  ;;  %v90_v42 = vld [vmem:[%s1740_s0 + $0x260] sm:$0xff]  ;;  %v91_v43 = vld [vmem:[%s1740_s0 + $0x268] sm:$0xff] }
  0x32   :  { %595 = vst [vmem:[%s1743_s3 + $0x1b8] sm:$0xff] %v467_v48  ;;  %v342_v57 = vadd.f32 %v707_v2, %v207_v50  ;;  %v343_v58 = vadd.f32 %v707_v2, %v208_v51  ;;  %v212_v59 = vmul.f32 %v702_v1, %v77_v47  ;;  %v468_v61 = vmax.f32 %v340_v52, 0.0  ;;  %v92_v44 = vld [vmem:[%s1740_s0 + $0x270] sm:$0xff]  ;;  %v93_v49 = vld [vmem:[%s1740_s0 + $0x278] sm:$0xff] }
  0x33   :  { %v344_v62 = vadd.f32 %v707_v2, %v209_v53  ;;  %v345_v63 = vadd.f32 %v707_v2, %v210_v54  ;;  %v346_v0 = vadd.f32 %v707_v2, %v211_v55  ;;  %v469_v6 = vmax.f32 %v341_v56, 0.0 }
  0x34   :  { %v470_v7 = vmax.f32 %v342_v57, 0.0  ;;  %v471_v8 = vmax.f32 %v343_v58, 0.0  ;;  %v347_v9 = vadd.f32 %v707_v2, %v212_v59  ;;  %596 = vst [vmem:[%s1743_s3 + $0x1c0] sm:$0xff] %v468_v61  ;;  %v213_v16 = vmul.f32 %v702_v1, %v78_v60 }
  0x35   :  { %v472_v13 = vmax.f32 %v344_v62, 0.0  ;;  %v473_v14 = vmax.f32 %v345_v63, 0.0  ;;  %v474_v15 = vmax.f32 %v346_v0, 0.0  ;;  %597 = vst [vmem:[%s1743_s3 + $0x1c8] sm:$0xff] %v469_v6  ;;  %v214_v19 = vmul.f32 %v702_v1, %v79_v3  ;;  %v94_v62 = vld [vmem:[%s1740_s0 + $0x280] sm:$0xff]  ;;  %v96_v6 = vld [vmem:[%s1740_s0 + $0x290] sm:$0xff] }
  0x36   :  { %598 = vst [vmem:[%s1743_s3 + $0x1d0] sm:$0xff] %v470_v7  ;;  %599 = vst [vmem:[%s1743_s3 + $0x1d8] sm:$0xff] %v471_v8  ;;  %v475_v18 = vmax.f32 %v347_v9, 0.0  ;;  %v215_v20 = vmul.f32 %v702_v1, %v80_v4  ;;  %v216_v21 = vmul.f32 %v702_v1, %v81_v5  ;;  %v348_v22 = vadd.f32 %v707_v2, %v213_v16  ;;  %v95_v5 = vld [vmem:[%s1740_s0 + $0x288] sm:$0xff]  ;;  %v97_v7 = vld [vmem:[%s1740_s0 + $0x298] sm:$0xff] }
  0x37   :  { %600 = vst [vmem:[%s1743_s3 + $0x1e0] sm:$0xff] %v472_v13  ;;  %601 = vst [vmem:[%s1743_s3 + $0x1e8] sm:$0xff] %v473_v14  ;;  %v217_v23 = vmul.f32 %v702_v1, %v82_v10  ;;  %v218_v24 = vmul.f32 %v702_v1, %v83_v11  ;;  %v219_v25 = vmul.f32 %v702_v1, %v84_v12  ;;  %v98_v12 = vld [vmem:[%s1740_s0 + $0x2a0] sm:$0xff]  ;;  %v99_v13 = vld [vmem:[%s1740_s0 + $0x2a8] sm:$0xff] }
  0x38   :  { %602 = vst [vmem:[%s1743_s3 + $0x1f0] sm:$0xff] %v474_v15  ;;  %603 = vst [vmem:[%s1743_s3 + $0x1f8] sm:$0xff] %v475_v18  ;;  %v349_v26 = vadd.f32 %v707_v2, %v214_v19  ;;  %v350_v27 = vadd.f32 %v707_v2, %v215_v20  ;;  %v351_v28 = vadd.f32 %v707_v2, %v216_v21  ;;  %v476_v31 = vmax.f32 %v348_v22, 0.0  ;;  %v100_v14 = vld [vmem:[%s1740_s0 + $0x2b0] sm:$0xff]  ;;  %v101_v19 = vld [vmem:[%s1740_s0 + $0x2b8] sm:$0xff] }
  0x39   :  { %v220_v29 = vmul.f32 %v702_v1, %v85_v17  ;;  %v352_v32 = vadd.f32 %v707_v2, %v217_v23  ;;  %v353_v33 = vadd.f32 %v707_v2, %v218_v24  ;;  %v354_v34 = vadd.f32 %v707_v2, %v219_v25 }
  0x3a   :  { %v477_v38 = vmax.f32 %v349_v26, 0.0  ;;  %v478_v39 = vmax.f32 %v350_v27, 0.0  ;;  %v479_v40 = vmax.f32 %v351_v28, 0.0  ;;  %604 = vst [vmem:[%s1743_s3 + $0x200] sm:$0xff] %v476_v31  ;;  %v221_v48 = vmul.f32 %v702_v1, %v86_v30 }
  0x3b   :  { %v355_v41 = vadd.f32 %v707_v2, %v220_v29  ;;  %v480_v45 = vmax.f32 %v352_v32, 0.0  ;;  %v481_v46 = vmax.f32 %v353_v33, 0.0  ;;  %v482_v47 = vmax.f32 %v354_v34, 0.0  ;;  %v102_v32 = vld [vmem:[%s1740_s0 + $0x2c0] sm:$0xff] }
  0x3c   :  { %605 = vst [vmem:[%s1743_s3 + $0x208] sm:$0xff] %v477_v38  ;;  %606 = vst [vmem:[%s1743_s3 + $0x210] sm:$0xff] %v478_v39  ;;  %v222_v51 = vmul.f32 %v702_v1, %v87_v35  ;;  %v223_v52 = vmul.f32 %v702_v1, %v88_v36  ;;  %v224_v53 = vmul.f32 %v702_v1, %v89_v37  ;;  %v103_v37 = vld [vmem:[%s1740_s0 + $0x2c8] sm:$0xff]  ;;  %v104_v38 = vld [vmem:[%s1740_s0 + $0x2d0] sm:$0xff] }
  0x3d   :  { %607 = vst [vmem:[%s1743_s3 + $0x218] sm:$0xff] %v479_v40  ;;  %v483_v50 = vmax.f32 %v355_v41, 0.0  ;;  %608 = vst [vmem:[%s1743_s3 + $0x220] sm:$0xff] %v480_v45  ;;  %v356_v54 = vadd.f32 %v707_v2, %v221_v48  ;;  %v225_v55 = vmul.f32 %v702_v1, %v90_v42  ;;  %v226_v56 = vmul.f32 %v702_v1, %v91_v43  ;;  %v105_v39 = vld [vmem:[%s1740_s0 + $0x2d8] sm:$0xff]  ;;  %v107_v45 = vld [vmem:[%s1740_s0 + $0x2e8] sm:$0xff] }
  0x3e   :  { %609 = vst [vmem:[%s1743_s3 + $0x228] sm:$0xff] %v481_v46  ;;  %610 = vst [vmem:[%s1743_s3 + $0x230] sm:$0xff] %v482_v47  ;;  %v227_v57 = vmul.f32 %v702_v1, %v92_v44  ;;  %v357_v58 = vadd.f32 %v707_v2, %v222_v51  ;;  %v358_v59 = vadd.f32 %v707_v2, %v223_v52  ;;  %v106_v44 = vld [vmem:[%s1740_s0 + $0x2e0] sm:$0xff]  ;;  %v108_v46 = vld [vmem:[%s1740_s0 + $0x2f0] sm:$0xff] }
  0x3f   :  { %611 = vst [vmem:[%s1743_s3 + $0x238] sm:$0xff] %v483_v50  ;;  %v359_v60 = vadd.f32 %v707_v2, %v224_v53  ;;  %v228_v61 = vmul.f32 %v702_v1, %v93_v49  ;;  %v484_v63 = vmax.f32 %v356_v54, 0.0  ;;  %v360_v0 = vadd.f32 %v707_v2, %v225_v55  ;;  %v109_v51 = vld [vmem:[%s1740_s0 + $0x2f8] sm:$0xff] }
  0x40   :  { %v361_v3 = vadd.f32 %v707_v2, %v226_v56  ;;  %v362_v4 = vadd.f32 %v707_v2, %v227_v57  ;;  %v485_v8 = vmax.f32 %v357_v58, 0.0  ;;  %v486_v9 = vmax.f32 %v358_v59, 0.0 }
  0x41   :  { %v487_v10 = vmax.f32 %v359_v60, 0.0  ;;  %v363_v11 = vadd.f32 %v707_v2, %v228_v61  ;;  %612 = vst [vmem:[%s1743_s3 + $0x240] sm:$0xff] %v484_v63  ;;  %v488_v15 = vmax.f32 %v360_v0, 0.0  ;;  %v229_v18 = vmul.f32 %v702_v1, %v94_v62  ;;  %v110_v0 = vld [vmem:[%s1740_s0 + $0x300] sm:$0xff] }
  0x42   :  { %v489_v16 = vmax.f32 %v361_v3, 0.0  ;;  %v490_v17 = vmax.f32 %v362_v4, 0.0  ;;  %613 = vst [vmem:[%s1743_s3 + $0x248] sm:$0xff] %v485_v8  ;;  %614 = vst [vmem:[%s1743_s3 + $0x250] sm:$0xff] %v486_v9  ;;  %v230_v21 = vmul.f32 %v702_v1, %v95_v5  ;;  %v231_v22 = vmul.f32 %v702_v1, %v96_v6  ;;  %v112_v8 = vld [vmem:[%s1740_s0 + $0x310] sm:$0xff]  ;;  %v113_v9 = vld [vmem:[%s1740_s0 + $0x318] sm:$0xff] }
  0x43   :  { %615 = vst [vmem:[%s1743_s3 + $0x258] sm:$0xff] %v487_v10  ;;  %v491_v20 = vmax.f32 %v363_v11, 0.0  ;;  %v232_v23 = vmul.f32 %v702_v1, %v97_v7  ;;  %616 = vst [vmem:[%s1743_s3 + $0x260] sm:$0xff] %v488_v15  ;;  %v364_v24 = vadd.f32 %v707_v2, %v229_v18  ;;  %v233_v25 = vmul.f32 %v702_v1, %v98_v12  ;;  %v111_v7 = vld [vmem:[%s1740_s0 + $0x308] sm:$0xff] }
  0x44   :  { %617 = vst [vmem:[%s1743_s3 + $0x268] sm:$0xff] %v489_v16  ;;  %618 = vst [vmem:[%s1743_s3 + $0x270] sm:$0xff] %v490_v17  ;;  %v234_v26 = vmul.f32 %v702_v1, %v99_v13  ;;  %v235_v27 = vmul.f32 %v702_v1, %v100_v14  ;;  %v365_v28 = vadd.f32 %v707_v2, %v230_v21  ;;  %v114_v14 = vld [vmem:[%s1740_s0 + $0x320] sm:$0xff]  ;;  %v115_v15 = vld [vmem:[%s1740_s0 + $0x328] sm:$0xff] }
  0x45   :  { %619 = vst [vmem:[%s1743_s3 + $0x278] sm:$0xff] %v491_v20  ;;  %v366_v29 = vadd.f32 %v707_v2, %v231_v22  ;;  %v367_v30 = vadd.f32 %v707_v2, %v232_v23  ;;  %v236_v31 = vmul.f32 %v702_v1, %v101_v19  ;;  %v492_v33 = vmax.f32 %v364_v24, 0.0  ;;  %v116_v16 = vld [vmem:[%s1740_s0 + $0x330] sm:$0xff]  ;;  %v117_v21 = vld [vmem:[%s1740_s0 + $0x338] sm:$0xff] }
  0x46   :  { %v368_v34 = vadd.f32 %v707_v2, %v233_v25  ;;  %v369_v35 = vadd.f32 %v707_v2, %v234_v26  ;;  %v370_v36 = vadd.f32 %v707_v2, %v235_v27  ;;  %v493_v40 = vmax.f32 %v365_v28, 0.0 }
  0x47   :  { %v494_v41 = vmax.f32 %v366_v29, 0.0  ;;  %v495_v42 = vmax.f32 %v367_v30, 0.0  ;;  %v371_v43 = vadd.f32 %v707_v2, %v236_v31  ;;  %620 = vst [vmem:[%s1743_s3 + $0x280] sm:$0xff] %v492_v33  ;;  %v237_v50 = vmul.f32 %v702_v1, %v102_v32 }
  0x48   :  { %v496_v47 = vmax.f32 %v368_v34, 0.0  ;;  %v497_v48 = vmax.f32 %v369_v35, 0.0  ;;  %v498_v49 = vmax.f32 %v370_v36, 0.0  ;;  %621 = vst [vmem:[%s1743_s3 + $0x288] sm:$0xff] %v493_v40  ;;  %v238_v53 = vmul.f32 %v702_v1, %v103_v37  ;;  %v118_v34 = vld [vmem:[%s1740_s0 + $0x340] sm:$0xff]  ;;  %v120_v40 = vld [vmem:[%s1740_s0 + $0x350] sm:$0xff] }
  0x49   :  { %622 = vst [vmem:[%s1743_s3 + $0x290] sm:$0xff] %v494_v41  ;;  %623 = vst [vmem:[%s1743_s3 + $0x298] sm:$0xff] %v495_v42  ;;  %v499_v52 = vmax.f32 %v371_v43, 0.0  ;;  %v239_v54 = vmul.f32 %v702_v1, %v104_v38  ;;  %v240_v55 = vmul.f32 %v702_v1, %v105_v39  ;;  %v372_v56 = vadd.f32 %v707_v2, %v237_v50  ;;  %v119_v39 = vld [vmem:[%s1740_s0 + $0x348] sm:$0xff] }
  0x4a   :  { %624 = vst [vmem:[%s1743_s3 + $0x2a0] sm:$0xff] %v496_v47  ;;  %625 = vst [vmem:[%s1743_s3 + $0x2a8] sm:$0xff] %v497_v48  ;;  %v241_v57 = vmul.f32 %v702_v1, %v106_v44  ;;  %v242_v58 = vmul.f32 %v702_v1, %v107_v45  ;;  %v243_v59 = vmul.f32 %v702_v1, %v108_v46  ;;  %v1528_v44 = vld [vmem:[%s1742_s2] ss:$0 sm:$0xff]  ;;  %v123_v46 = vld [vmem:[%s1740_s0 + $0x368] sm:$0xff] }
  0x4b   :  { %626 = vst [vmem:[%s1743_s3 + $0x2b0] sm:$0xff] %v498_v49  ;;  %627 = vst [vmem:[%s1743_s3 + $0x2b8] sm:$0xff] %v499_v52  ;;  %v373_v60 = vadd.f32 %v707_v2, %v238_v53  ;;  %v374_v61 = vadd.f32 %v707_v2, %v239_v54  ;;  %v375_v62 = vadd.f32 %v707_v2, %v240_v55  ;;  %v500_v3 = vmax.f32 %v372_v56, 0.0  ;;  %v122_v45 = vld [vmem:[%s1740_s0 + $0x360] sm:$0xff]  ;;  %v124_v47 = vld [vmem:[%s1740_s0 + $0x370] sm:$0xff] }
  0x4c   :  { %v244_v63 = vmul.f32 %v702_v1, %v109_v51  ;;  %v376_v4 = vadd.f32 %v707_v2, %v241_v57  ;;  %v377_v5 = vadd.f32 %v707_v2, %v242_v58  ;;  %v378_v6 = vadd.f32 %v707_v2, %v243_v59  ;;  %v1546_v51 = vld [vmem:[%s1741_s1] ss:$0 sm:$0xff]  ;;  %v125_v53 = vld [vmem:[%s1740_s0 + $0x378] sm:$0xff] }
  0x4d   :  { %v501_v10 = vmax.f32 %v373_v60, 0.0  ;;  %v502_v11 = vmax.f32 %v374_v61, 0.0  ;;  %v503_v12 = vmax.f32 %v375_v62, 0.0  ;;  %628 = vst [vmem:[%s1743_s3 + $0x2c0] sm:$0xff] %v500_v3  ;;  %v245_v20 = vmul.f32 %v702_v1, %v110_v0 }
  0x4e   :  { %v379_v13 = vadd.f32 %v707_v2, %v244_v63  ;;  %v504_v17 = vmax.f32 %v376_v4, 0.0  ;;  %v505_v18 = vmax.f32 %v377_v5, 0.0  ;;  %v506_v19 = vmax.f32 %v378_v6, 0.0  ;;  %v126_v4 = vld [vmem:[%s1740_s0 + $0x380] sm:$0xff] }
  0x4f   :  { %629 = vst [vmem:[%s1743_s3 + $0x2c8] sm:$0xff] %v501_v10  ;;  %630 = vst [vmem:[%s1743_s3 + $0x2d0] sm:$0xff] %v502_v11  ;;  %v246_v23 = vmul.f32 %v702_v1, %v111_v7  ;;  %v247_v24 = vmul.f32 %v702_v1, %v112_v8  ;;  %v248_v25 = vmul.f32 %v702_v1, %v113_v9  ;;  %v127_v9 = vld [vmem:[%s1740_s0 + $0x388] sm:$0xff]  ;;  %v128_v10 = vld [vmem:[%s1740_s0 + $0x390] sm:$0xff] }
  0x50   :  { %631 = vst [vmem:[%s1743_s3 + $0x2d8] sm:$0xff] %v503_v12  ;;  %v507_v22 = vmax.f32 %v379_v13, 0.0  ;;  %632 = vst [vmem:[%s1743_s3 + $0x2e0] sm:$0xff] %v504_v17  ;;  %v380_v26 = vadd.f32 %v707_v2, %v245_v20  ;;  %v249_v27 = vmul.f32 %v702_v1, %v114_v14  ;;  %v250_v28 = vmul.f32 %v702_v1, %v115_v15  ;;  %v129_v11 = vld [vmem:[%s1740_s0 + $0x398] sm:$0xff]  ;;  %v131_v17 = vld [vmem:[%s1740_s0 + $0x3a8] sm:$0xff] }
  0x51   :  { %633 = vst [vmem:[%s1743_s3 + $0x2e8] sm:$0xff] %v505_v18  ;;  %634 = vst [vmem:[%s1743_s3 + $0x2f0] sm:$0xff] %v506_v19  ;;  %v251_v29 = vmul.f32 %v702_v1, %v116_v16  ;;  %v381_v30 = vadd.f32 %v707_v2, %v246_v23  ;;  %v382_v31 = vadd.f32 %v707_v2, %v247_v24  ;;  %v130_v16 = vld [vmem:[%s1740_s0 + $0x3a0] sm:$0xff]  ;;  %v132_v18 = vld [vmem:[%s1740_s0 + $0x3b0] sm:$0xff] }
  0x52   :  { %635 = vst [vmem:[%s1743_s3 + $0x2f8] sm:$0xff] %v507_v22  ;;  %v383_v32 = vadd.f32 %v707_v2, %v248_v25  ;;  %v252_v33 = vmul.f32 %v702_v1, %v117_v21  ;;  %v508_v35 = vmax.f32 %v380_v26, 0.0  ;;  %v384_v36 = vadd.f32 %v707_v2, %v249_v27  ;;  %v121_v1 = vld [vmem:[%s1740_s0 + $0x358] sm:$0xff] }
  0x53   :  { %v385_v37 = vadd.f32 %v707_v2, %v250_v28  ;;  %v386_v38 = vadd.f32 %v707_v2, %v251_v29  ;;  %v509_v41 = vmax.f32 %v381_v30, 0.0  ;;  %v510_v42 = vmax.f32 %v382_v31, 0.0  ;;  %v133_v23 = vld [vmem:[%s1740_s0 + $0x3b8] sm:$0xff] }
  0x54   :  { %v511_v43 = vmax.f32 %v383_v32, 0.0  ;;  %v387_v2 = vadd.f32 %v1528_v44, %v252_v33  ;;  %636 = vst [vmem:[%s1743_s3 + $0x300] sm:$0xff] %v508_v35  ;;  %v512_v48 = vmax.f32 %v384_v36, 0.0  ;;  %v253_v52 = vmul.f32 %v1546_v51, %v118_v34  ;;  %v134_v36 = vld [vmem:[%s1740_s0 + $0x3c0] sm:$0xff] }
  0x55   :  { %v513_v49 = vmax.f32 %v385_v37, 0.0  ;;  %v514_v50 = vmax.f32 %v386_v38, 0.0  ;;  %637 = vst [vmem:[%s1743_s3 + $0x308] sm:$0xff] %v509_v41  ;;  %638 = vst [vmem:[%s1743_s3 + $0x310] sm:$0xff] %v510_v42  ;;  %v254_v55 = vmul.f32 %v1546_v51, %v119_v39  ;;  %v255_v56 = vmul.f32 %v1546_v51, %v120_v40  ;;  %v136_v41 = vld [vmem:[%s1740_s0 + $0x3d0] sm:$0xff]  ;;  %v137_v42 = vld [vmem:[%s1740_s0 + $0x3d8] sm:$0xff] }
  0x56   :  { %639 = vst [vmem:[%s1743_s3 + $0x318] sm:$0xff] %v511_v43  ;;  %v515_v54 = vmax.f32 %v387_v2, 0.0  ;;  %v256_v57 = vmul.f32 %v1546_v51, %v121_v1  ;;  %640 = vst [vmem:[%s1743_s3 + $0x320] sm:$0xff] %v512_v48  ;;  %v388_v58 = vadd.f32 %v1528_v44, %v253_v52  ;;  %v257_v59 = vmul.f32 %v1546_v51, %v122_v45  ;;  %v135_v1 = vld [vmem:[%s1740_s0 + $0x3c8] sm:$0xff] }
  0x57   :  { %641 = vst [vmem:[%s1743_s3 + $0x328] sm:$0xff] %v513_v49  ;;  %642 = vst [vmem:[%s1743_s3 + $0x330] sm:$0xff] %v514_v50  ;;  %v258_v60 = vmul.f32 %v1546_v51, %v123_v46  ;;  %v259_v61 = vmul.f32 %v1546_v51, %v124_v47  ;;  %v389_v62 = vadd.f32 %v1528_v44, %v254_v55  ;;  %v138_v47 = vld [vmem:[%s1740_s0 + $0x3e0] sm:$0xff]  ;;  %v139_v48 = vld [vmem:[%s1740_s0 + $0x3e8] sm:$0xff] }
  0x58   :  { %643 = vst [vmem:[%s1743_s3 + $0x338] sm:$0xff] %v515_v54  ;;  %v390_v63 = vadd.f32 %v1528_v44, %v255_v56  ;;  %v391_v0 = vadd.f32 %v1528_v44, %v256_v57  ;;  %v260_v3 = vmul.f32 %v1546_v51, %v125_v53  ;;  %v516_v5 = vmax.f32 %v388_v58, 0.0  ;;  %v140_v49 = vld [vmem:[%s1740_s0 + $0x3f0] sm:$0xff]  ;;  %v141_v55 = vld [vmem:[%s1740_s0 + $0x3f8] sm:$0xff] }
  0x59   :  { %v392_v6 = vadd.f32 %v1528_v44, %v257_v59  ;;  %v393_v7 = vadd.f32 %v1528_v44, %v258_v60  ;;  %v394_v8 = vadd.f32 %v1528_v44, %v259_v61  ;;  %v517_v12 = vmax.f32 %v389_v62, 0.0 }
  0x5a   :  { %v518_v13 = vmax.f32 %v390_v63, 0.0  ;;  %v519_v14 = vmax.f32 %v391_v0, 0.0  ;;  %v395_v15 = vadd.f32 %v1528_v44, %v260_v3  ;;  %644 = vst [vmem:[%s1743_s3 + $0x340] sm:$0xff] %v516_v5  ;;  %v261_v22 = vmul.f32 %v1546_v51, %v126_v4 }
  0x5b   :  { %v520_v19 = vmax.f32 %v392_v6, 0.0  ;;  %v521_v20 = vmax.f32 %v393_v7, 0.0  ;;  %v522_v21 = vmax.f32 %v394_v8, 0.0  ;;  %645 = vst [vmem:[%s1743_s3 + $0x348] sm:$0xff] %v517_v12  ;;  %v262_v25 = vmul.f32 %v1546_v51, %v127_v9 }
  0x5c   :  { %646 = vst [vmem:[%s1743_s3 + $0x350] sm:$0xff] %v518_v13  ;;  %647 = vst [vmem:[%s1743_s3 + $0x358] sm:$0xff] %v519_v14  ;;  %v523_v24 = vmax.f32 %v395_v15, 0.0  ;;  %v263_v26 = vmul.f32 %v1546_v51, %v128_v10  ;;  %v264_v27 = vmul.f32 %v1546_v51, %v129_v11  ;;  %v396_v28 = vadd.f32 %v1528_v44, %v261_v22 }
  0x5d   :  { %648 = vst [vmem:[%s1743_s3 + $0x360] sm:$0xff] %v520_v19  ;;  %649 = vst [vmem:[%s1743_s3 + $0x368] sm:$0xff] %v521_v20  ;;  %v265_v29 = vmul.f32 %v1546_v51, %v130_v16  ;;  %v266_v30 = vmul.f32 %v1546_v51, %v131_v17  ;;  %v267_v31 = vmul.f32 %v1546_v51, %v132_v18 }
  0x5e   :  { %650 = vst [vmem:[%s1743_s3 + $0x370] sm:$0xff] %v522_v21  ;;  %651 = vst [vmem:[%s1743_s3 + $0x378] sm:$0xff] %v523_v24  ;;  %v397_v32 = vadd.f32 %v1528_v44, %v262_v25  ;;  %v398_v33 = vadd.f32 %v1528_v44, %v263_v26  ;;  %v399_v34 = vadd.f32 %v1528_v44, %v264_v27  ;;  %v524_v37 = vmax.f32 %v396_v28, 0.0 }
  0x5f   :  { %v268_v35 = vmul.f32 %v1546_v51, %v133_v23  ;;  %v400_v38 = vadd.f32 %v1528_v44, %v265_v29  ;;  %v401_v39 = vadd.f32 %v1528_v44, %v266_v30  ;;  %v402_v40 = vadd.f32 %v1528_v44, %v267_v31 }
  0x60   :  { %v525_v43 = vmax.f32 %v397_v32, 0.0  ;;  %v526_v2 = vmax.f32 %v398_v33, 0.0  ;;  %v527_v45 = vmax.f32 %v399_v34, 0.0  ;;  %652 = vst [vmem:[%s1743_s3 + $0x380] sm:$0xff] %v524_v37  ;;  %v269_v54 = vmul.f32 %v1546_v51, %v134_v36 }
  0x61   :  { %v403_v46 = vadd.f32 %v1528_v44, %v268_v35  ;;  %v528_v50 = vmax.f32 %v400_v38, 0.0  ;;  %v529_v52 = vmax.f32 %v401_v39, 0.0  ;;  %v530_v53 = vmax.f32 %v402_v40, 0.0 }
  0x62   :  { %653 = vst [vmem:[%s1743_s3 + $0x388] sm:$0xff] %v525_v43  ;;  %654 = vst [vmem:[%s1743_s3 + $0x390] sm:$0xff] %v526_v2  ;;  %v270_v57 = vmul.f32 %v1546_v51, %v135_v1  ;;  %v271_v58 = vmul.f32 %v1546_v51, %v136_v41  ;;  %v272_v59 = vmul.f32 %v1546_v51, %v137_v42 }
  0x63   :  { %655 = vst [vmem:[%s1743_s3 + $0x398] sm:$0xff] %v527_v45  ;;  %v531_v56 = vmax.f32 %v403_v46, 0.0  ;;  %656 = vst [vmem:[%s1743_s3 + $0x3a0] sm:$0xff] %v528_v50  ;;  %v404_v60 = vadd.f32 %v1528_v44, %v269_v54  ;;  %v273_v61 = vmul.f32 %v1546_v51, %v138_v47  ;;  %v274_v62 = vmul.f32 %v1546_v51, %v139_v48 }
  0x64   :  { %657 = vst [vmem:[%s1743_s3 + $0x3a8] sm:$0xff] %v529_v52  ;;  %658 = vst [vmem:[%s1743_s3 + $0x3b0] sm:$0xff] %v530_v53  ;;  %v275_v63 = vmul.f32 %v1546_v51, %v140_v49  ;;  %v405_v0 = vadd.f32 %v1528_v44, %v270_v57  ;;  %v406_v3 = vadd.f32 %v1528_v44, %v271_v58 }
  0x65   :  { %659 = vst [vmem:[%s1743_s3 + $0x3b8] sm:$0xff] %v531_v56  ;;  %v407_v4 = vadd.f32 %v1528_v44, %v272_v59  ;;  %v276_v5 = vmul.f32 %v1546_v51, %v141_v55  ;;  %v532_v6 = vmax.f32 %v404_v60, 0.0  ;;  %v408_v7 = vadd.f32 %v1528_v44, %v273_v61 }
  0x66   :  { %v409_v8 = vadd.f32 %v1528_v44, %v274_v62  ;;  %v410_v9 = vadd.f32 %v1528_v44, %v275_v63  ;;  %v533_v10 = vmax.f32 %v405_v0, 0.0  ;;  %v534_v11 = vmax.f32 %v406_v3, 0.0 }
  0x67   :  { %v535_v12 = vmax.f32 %v407_v4, 0.0  ;;  %v411_v13 = vadd.f32 %v1528_v44, %v276_v5  ;;  %660 = vst [vmem:[%s1743_s3 + $0x3c0] sm:$0xff] %v532_v6  ;;  %v536_v14 = vmax.f32 %v408_v7, 0.0 }
  0x68   :  { %v537_v15 = vmax.f32 %v409_v8, 0.0  ;;  %v538_v16 = vmax.f32 %v410_v9, 0.0  ;;  %661 = vst [vmem:[%s1743_s3 + $0x3c8] sm:$0xff] %v533_v10  ;;  %662 = vst [vmem:[%s1743_s3 + $0x3d0] sm:$0xff] %v534_v11 }
  0x69   :  { %663 = vst [vmem:[%s1743_s3 + $0x3d8] sm:$0xff] %v535_v12  ;;  %v539_v44 = vmax.f32 %v411_v13, 0.0  ;;  %664 = vst [vmem:[%s1743_s3 + $0x3e0] sm:$0xff] %v536_v14 }
  0x6a   :  { %665 = vst [vmem:[%s1743_s3 + $0x3e8] sm:$0xff] %v537_v15  ;;  %666 = vst [vmem:[%s1743_s3 + $0x3f0] sm:$0xff] %v538_v16 }
  0x6b   :  { %667 = vst [vmem:[%s1743_s3 + $0x3f8] sm:$0xff] %v539_v44 }

// kernel: up_conv_forward.2
= control target key start
LH: loop header
LB: loop body
LE: loop exit
PB: predicated region body
PF: predicated region fallthrough
CT: control target
= control target key end

     0   :  { %s6325_s21 = smov 0   ;;  %s6327_s22 = smov 0   ;;  %s7842_s0 = inlined_call_operand.vmem [shape: bf16[2,10,10,10,4], index: 0, kind: input, shape index: {}, may-alias: {0,1,2}]   ;;  %s7843_s1 = inlined_call_operand.vmem [shape: bf16[2,10,10,10,4], index: 1, kind: input, shape index: {}, may-alias: {0,1,2}]   ;;  %s7844_s2 = inlined_call_operand.vmem [shape: bf16[2,10,10,10,4], index: 2, kind: input, shape index: {}, may-alias: {0,1,2}]   ;;  %s7845_s3 = inlined_call_operand.vmem [shape: bf16[27,4,128], index: 3, kind: input, shape index: {}]   ;;  %s7846_s4 = inlined_call_operand.vmem [shape: f32[2,8,64,128], index: 4, kind: output, shape index: {0}]   ;;  %s7847_s5 = inlined_call_operand.vmem [shape: f32[2,8,1,128], index: 5, kind: output, shape index: {1}]   ;;  %s7848_s6 = inlined_call_operand.vmem [shape: f32[2,8,1,128], index: 6, kind: output, shape index: {2}]  }
   0x1   :  { %s6329_s23 = smov 0   ;;  %s6331_s24 = smov 0  }
   0x2   :  { %s6333_s25 = smov 0  }
   0x3 LB: > { %s26_s26 = sadd.s32 1, %s6280_s23  ;;  %s29_s27 = sadd.s32 1, %s6284_s24  ;;  %s6288_s25 = sphi %s6333_s25, %s17_s25   ;;  %s6284_s24 = sphi %s6331_s24, %s7866_s24   ;;  %s6280_s23 = sphi %s6329_s23, %s7865_s23   ;;  %s6276_s22 = sphi %s6327_s22, %s7864_s22   ;;  %s6272_s21 = sphi %s6325_s21, %s7863_s21  }
   0x4   : > { %p27_p0 = scmp.ge.s32.totalorder %s26_s26, 8  ;;  %p5218_p1 = scmp.ge.s32.totalorder %s6288_s25, 1 }
   0x5   : > { %p281_p2 = scmp.lt.s32.totalorder %s6288_s25, 17 }
   0x6   : > { %s7868_s26 = smov (%p27_p0, %s26_s26), 0  ;;  %s7870_s27 = smov (!%p27_p0, %s29_s27), %s6284_s24 }
   0x7   : > { %p282_p3 = pnand %p5218_p1, %p281_p2  ;;  %p31_p4 = scmp.ge.s32.totalorder %s7870_s27, 2 }
   0x9   : > { %s7872_s27 = smov (%p31_p4, %s7870_s27), 0  ;;  %285 = sbr.rel (%p282_p3) target bundleno = 496 (0x1f0), region = 36 }
   0xe   : > { %v5227_v0 = vld [vmem:[%s7845_s3 + $0x2] sm:$0x3]  ;;  %vm567_vm0 = vcmask 1041408   ;;  %p353_p5 = scmp.lt.s32.totalorder %s6276_s22, 1  ;;  %p355_p6 = scmp.lt.s32.totalorder %s6272_s21, 9  ;;  %vm554_vm3 = vcmask 31744  }
   0xf   : > { %6143 = vmatprep.subr.msk.bf16.mxu1 %vm567_vm0, %v5227_v0  ;;  %6142 = vmatprep.subr.msk.bf16.mxu0 %vm567_vm0, %v5227_v0  ;;  %v569_v1 = vsel %vm567_vm0, %v5227_v0, 0  ;;  %v416_v2 = vld [vmem:[%s7845_s3] sm:$0x3]  ;;  %v5252_v3 = vld [vmem:[%s7845_s3 + $0x4] sm:$0x3]  ;;  %vm760_vm5 = vcmask 1042432  }
  0x10   : > { %6141 = vmatpush3.bf16.msra.mxu1 %v569_v1  ;;  %5871 = vmatpush3.bf16.msra.mxu0 %v569_v1  ;;  %s7874_s22 = smov (!%p353_p5, %s6276_s22), 1  ;;  %v6381_v4 = vld [vmem:[%s7845_s3 + $0x6] sm:$0x3]  ;;  %vm425_vm1 = vsmask.f32 3328  ;;  %v6405_v9 = vsel %vm567_vm0, %v416_v2, 0 }
  0x11   : > { %s356_s8 = scalar_select %p355_p6, %s6272_s21, 9  ;;  %6144 = vmatprep.subr.msk.bf16.mxu1 %vm567_vm0, %v416_v2  ;;  %6145 = vmatprep.subr.msk.bf16.mxu0 %vm567_vm0, %v5252_v3  ;;  %v6386_v5 = vld [vmem:[%s7845_s3 + $0x8] sm:$0x3]  ;;  %v6391_v6 = vld [vmem:[%s7845_s3 + $0xa] sm:$0x3]  ;;  %v6408_v10 = vsel %vm567_vm0, %v5252_v3, 0 }
  0x12   : > { %s6375_s11 = smul.u32 200, %s7874_s22  ;;  %vm426_vm2 = vsmask.f32 7440  ;;  %v6396_v7 = vld [vmem:[%s7845_s3 + $0xc] sm:$0x3]  ;;  %v6422_v13 = vsel %vm567_vm0, %v6381_v4, 0 }
  0x13   : > { %s6170_s14 = smul.u32 20, %s356_s8  ;;  %v6401_v8 = vld [vmem:[%s7845_s3 + $0xe] sm:$0x3]  ;;  %v6413_v11 = vld [vmem:[%s7845_s3 + $0x10] sm:$0x3]  ;;  %v6426_v14 = vsel %vm567_vm0, %v6386_v5, 0  ;;  %vm6502_vm4 = vmor %vm425_vm1, %vm426_vm2 }
  0x14   : > { %v6418_v12 = vld [vmem:[%s7845_s3 + $0x12] sm:$0x3]  ;;  %v6430_v15 = vsel %vm567_vm0, %v6391_v6, 0  ;;  %v6435_v16 = vld [vmem:[%s7845_s3 + $0x14] sm:$0x3]  ;;  %v6444_v17 = vsel %vm567_vm0, %v6396_v7, 0 }
  0x15   : > { %s359_s30 = sadd.s32 %s6375_s11, %s6170_s14  ;;  %v6448_v18 = vsel %vm567_vm0, %v6401_v8, 0  ;;  %v6452_v19 = vsel %vm567_vm0, %v6413_v11, 0  ;;  %v6456_v20 = vsel %vm567_vm0, %v6418_v12, 0  ;;  %v6475_v28 = vsel %vm567_vm0, %v6435_v16, 0  ;;  %s362_s18 = sadd.s32 1, %s6272_s21 }
  0x16   : > { %s5219_s12 = sshll.u32 %s359_s30, 2  ;;  %vm761_vm6 = vcmask 1046532   ;;  %p6698_p7 = scmp.lt.s32.totalorder %s362_s18, 9 }
  0x17   : > { %s6440_s17 = scalar_lea.vmem %s7842_s0, %s5219_s12  ;;  %vm6568_vm7 = vmor %vm760_vm5, %vm761_vm6  ;;  %p386_p9 = scmp.lt.s32.totalorder %s6272_s21, 7 }
  0x18   : > { %v6459_v21 = vld [vmem:[%s6440_s17] sm:$0xf]  ;;  %v6462_v22 = vld [vmem:[%s6440_s17 + $0x8] sm:$0xf]  ;;  %v6465_v23 = vld [vmem:[%s6440_s17 + $0x4] sm:$0x1] }
  0x19   : > { %v6468_v24 = vld [vmem:[%s6440_s17 + $0xc] sm:$0x1]  ;;  %v429_v25 = vshrl.u32 %v6459_v21, 16  ;;  %v432_v26 = vshll.u32 %v6459_v21, 16  ;;  %v438_v27 = vshll.u32 %v6465_v23, 16  ;;  %v443_v29 = vshrl.u32 %v6462_v22, 16 }
  0x1a   : > { %v446_v30 = vshll.u32 %v6462_v22, 16  ;;  %v452_v31 = vshll.u32 %v6468_v24, 16  ;;  %v6481_v32 = vld [vmem:[%s6440_s17 + $0x20] sm:$0xf]  ;;  %v765_v37 = vrot.slane %v6465_v23, 5  ;;  %v769_v40 = vrot.slane %v6468_v24, 5 }
  0x1b   : > { %v431_v34 = vrot.slane %v429_v25, 4  ;;  %v434_v35 = vrot.slane %v432_v26, 5  ;;  %v440_v36 = vrot.slane %v438_v27, 5  ;;  %v445_v38 = vrot.slane %v443_v29, 4  ;;  %v6488_v41 = vld [vmem:[%s6440_s17 + $0x28] sm:$0xf] }
  0x1c   : > { %v448_v39 = vrot.slane %v446_v30, 5  ;;  %v485_v42 = vshrl.u32 %v6481_v32, 16  ;;  %v454_v44 = vrot.slane %v452_v31, 5  ;;  %v6492_v45 = vld [vmem:[%s6440_s17 + $0x24] sm:$0x1]  ;;  %v488_v47 = vshll.u32 %v6481_v32, 16 }
  0x1d   : > { %v435_v43 = vor.u32 %v434_v35, %v431_v34  ;;  %v6495_v46 = vld [vmem:[%s6440_s17 + $0x2c] sm:$0x1]  ;;  %v494_v52 = vshll.u32 %v6492_v45, 16  ;;  %v499_v53 = vshrl.u32 %v6488_v41, 16  ;;  %v502_v56 = vshll.u32 %v6488_v41, 16  ;;  %s7876_s18 = smov (!%p6698_p7, %s362_s18), 9 }
  0x1e   : > { %v449_v50 = vor.u32 %v448_v39, %v445_v38  ;;  %v487_v51 = vrot.slane %v485_v42, 4  ;;  %v490_v55 = vrot.slane %v488_v47, 5  ;;  %v508_v57 = vshll.u32 %v6495_v46, 16  ;;  %v6511_v58 = vld [vmem:[%s6440_s17 + $0x10] sm:$0xf]  ;;  %s6172_s20 = smul.u32 20, %s7876_s18 }
  0x1f   : > { %v436_v54 = vrot.slane %v435_v43, 4  ;;  %v496_v60 = vrot.slane %v494_v52, 5  ;;  %v501_v61 = vrot.slane %v499_v53, 4  ;;  %v504_v1 = vrot.slane %v502_v56, 5  ;;  %v6517_v3 = vld [vmem:[%s6440_s17 + $0x18] sm:$0xf] }
  0x20   : > { %v450_v59 = vrot.slane %v449_v50, 4  ;;  %v491_v0 = vor.u32 %v490_v55, %v487_v51  ;;  %v510_v2 = vrot.slane %v508_v57, 5  ;;  %v6520_v25 = vld [vmem:[%s6440_s17 + $0x14] sm:$0x1]  ;;  %v6526_v29 = vld [vmem:[%s6440_s17 + $0x1c] sm:$0x1]  ;;  %s6819_s28 = sadd.s32 %s6172_s20, %s6375_s11 }
  0x21   : > { %v441_v63 = vsel %vm6502_vm4, %v436_v54, %v440_v36  ;;  %v457_v30 = vshrl.u32 %v6511_v58, 16  ;;  %v460_v31 = vshll.u32 %v6511_v58, 16  ;;  %v505_v36 = vor.u32 %v504_v1, %v501_v61  ;;  %v6534_v47 = vld [vmem:[%s6440_s17 + $0x30] sm:$0xf]  ;;  %v6541_v54 = vld [vmem:[%s6440_s17 + $0x38] sm:$0xf] }
  0x22   : > { %v455_v26 = vsel %vm6502_vm4, %v450_v59, %v454_v44  ;;  %v492_v35 = vrot.slane %v491_v0, 4  ;;  %v466_v38 = vshll.u32 %v6520_v25, 16  ;;  %v471_v43 = vshrl.u32 %v6517_v3, 16  ;;  %v6545_v61 = vld [vmem:[%s6440_s17 + $0x34] sm:$0x1]  ;;  %s5220_s29 = sshll.u32 %s6819_s28, 2 }
  0x23   : > { %v5228_v34 = vcombine.low %v441_v63, %v455_v26  ;;  %v459_v39 = vrot.slane %v457_v30, 4  ;;  %v462_v42 = vrot.slane %v460_v31, 5  ;;  %v474_v44 = vshll.u32 %v6517_v3, 16  ;;  %v6551_v1 = vld [vmem:[%s6440_s17 + $0x3c] sm:$0x1]  ;;  %s6861_s8 = scalar_lea.vmem %s7843_s1, %s5220_s29  ;;  %s373_s29 = sadd.s32 2, %s6272_s21 }
  0x24   : > { %v497_v50 = vsel %vm6502_vm4, %v492_v35, %v496_v60  ;;  %v506_v51 = vrot.slane %v505_v36, 4  ;;  %v468_v52 = vrot.slane %v466_v38, 5  ;;  %v480_v53 = vshll.u32 %v6526_v29, 16  ;;  %v736_v35 = vld [vmem:[%s6440_s17] sm:$0xe]  ;;  %p7162_p8 = scmp.lt.s32.totalorder %s373_s29, 9 }
  0x25   : > { %5872 = vmatprep.mubr.msk.bf16.mxu0 %vm554_vm3, %v5228_v34  ;;  %v463_v55 = vor.u32 %v462_v42, %v459_v39  ;;  %v473_v56 = vrot.slane %v471_v43, 4  ;;  %v476_v57 = vrot.slane %v474_v44, 5  ;;  %v773_v59 = vrot.slane %v6520_v25, 5  ;;  %v737_v36 = vld [vmem:[%s6440_s17 + $0x8] sm:$0xe]  ;;  %s7880_s21 = smov (!%p386_p9, %s6272_s21), 7 }
  0x26   : > { %v511_v63 = vsel %vm6502_vm4, %v506_v51, %v510_v2  ;;  %v482_v60 = vrot.slane %v480_v53, 5  ;;  %v777_v0 = vrot.slane %v6526_v29, 5  ;;  %v513_v26 = vshrl.u32 %v6534_v47, 16  ;;  %v738_v42 = vld [vmem:[%s6440_s17 + $0x10] sm:$0xe]  ;;  %s7878_s29 = smov (!%p7162_p8, %s373_s29), 9 }
  0x27   : > { %v5230_v30 = vcombine.low %v497_v50, %v511_v63  ;;  %v464_v31 = vrot.slane %v463_v55, 4  ;;  %v477_v34 = vor.u32 %v476_v57, %v473_v56  ;;  %v516_v25 = vshll.u32 %v6534_v47, 16  ;;  %v739_v43 = vld [vmem:[%s6440_s17 + $0x18] sm:$0xe]  ;;  %v740_v56 = vld [vmem:[%s6440_s17 + $0x20] sm:$0xe] }
  0x28   : > { %v515_v38 = vrot.slane %v513_v26, 4  ;;  %v522_v39 = vshll.u32 %v6545_v61, 16  ;;  %v527_v2 = vshrl.u32 %v6541_v54, 16  ;;  %v530_v29 = vshll.u32 %v6541_v54, 16  ;;  %s6173_s13 = smul.u32 20, %s7878_s29  ;;  %s5223_s18 = sshll.u32 %s7874_s22, 6 }
  0x29   : > { %5876 = vmatprep.mubr.msk.bf16.mxu1 %vm554_vm3, %v5230_v30  ;;  %v469_v44 = vsel %vm6502_vm4, %v464_v31, %v468_v52  ;;  %v478_v50 = vrot.slane %v477_v34, 4  ;;  %v518_v51 = vrot.slane %v516_v25, 5  ;;  %v536_v53 = vshll.u32 %v6551_v1, 16  ;;  %v741_v30 = vld [vmem:[%s6440_s17 + $0x28] sm:$0xe]  ;;  %s5225_s30 = sshll.u32 %s7874_s22, 3 }
  0x2a   : > { %v524_v57 = vrot.slane %v522_v39, 5  ;;  %v529_v63 = vrot.slane %v527_v2, 4  ;;  %v532_v26 = vrot.slane %v530_v29, 5  ;;  %v5244_v48 = vrot.slane %v736_v35, 9  ;;  %s7228_s14 = sadd.s32 %s6173_s13, %s6375_s11  ;;  %s398_s7 = sadd.s32 %s5225_s30, %s7880_s21 }
  0x2b   : > { %v483_v52 = vsel %vm6502_vm4, %v478_v50, %v482_v60  ;;  %v519_v31 = vor.u32 %v518_v51, %v515_v38  ;;  %v538_v34 = vrot.slane %v536_v53, 5  ;;  %v5245_v25 = vrot.slane %v737_v36, 9  ;;  %v742_v36 = vld [vmem:[%s6440_s17 + $0x30] sm:$0xe]  ;;  %s5221_s11 = sshll.u32 %s7228_s14, 2  ;;  %s399_s12 = scalar_lea.vmem %s7847_s5, %s398_s7 }
  0x2c   : > { %v5229_v33 = vcombine.low %v469_v44, %v483_v52  ;;  %v533_v27 = vor.u32 %v532_v26, %v529_v63  ;;  %v766_v62 = vsel %vm6568_vm7, %v5244_v48, %v765_v37  ;;  %v5237_v39 = vcombine.low %v6511_v58, %v6517_v3  ;;  %v743_v48 = vld [vmem:[%s6440_s17 + $0x38] sm:$0xe]  ;;  %v5280_v51 = vld [vmem:[%s6440_s17 + $0x10] sm:$0xf] }
  0x2d   : > { %v520_v2 = vrot.slane %v519_v31, 4  ;;  %v770_v60 = vsel %vm6568_vm7, %v5245_v25, %v769_v40  ;;  %v5246_v35 = vrot.slane %v738_v42, 9  ;;  %v5247_v38 = vrot.slane %v739_v43, 9  ;;  %v6609_v43 = vld [vmem:[%s6440_s17 + $0xc] sm:$0x1] }
  0x2e   : > { %5873 = vmatmul.mubr.msk.bf16.vlgmr.msra.gmra.mxu0 %vm554_vm3, %v5229_v33  ;;  %v534_v29 = vrot.slane %v533_v27, 4  ;;  %v5253_v23 = vcombine.low %v766_v62, %v770_v60  ;;  %v5248_v44 = vrot.slane %v740_v56, 9  ;;  %v5249_v37 = vrot.slane %v741_v30, 9  ;;  %v5278_v62 = vld [vmem:[%s6440_s17 + $0x8] sm:$0xf] }
  0x2f   : > { %v525_v50 = vsel %vm6502_vm4, %v520_v2, %v524_v57  ;;  %5891 = vmatpush3.bf16.msra.mxu0 %v6408_v10  ;;  %v774_v24 = vsel %vm6568_vm7, %v5246_v35, %v773_v59  ;;  %v778_v40 = vsel %vm6568_vm7, %v5247_v38, %v777_v0  ;;  %v5239_v33 = vcombine.low %v6534_v47, %v6541_v54  ;;  %v6618_v30 = vld [vmem:[%s6440_s17 + $0x14] sm:$0x1]  ;;  %v6623_v25 = vld [vmem:[%s6440_s17 + $0x1c] sm:$0x1]  ;;  %v6219_v54 = vld [vmem:[%s6440_s17 + $0x18] ss:$8 sps:$4 sm:$0xff]  }
  0x30   : > { %v539_v27 = vsel %vm6502_vm4, %v534_v29, %v538_v34  ;;  %5892 = vmatprep.mubr.msk.bf16.mxu0 %vm554_vm3, %v5253_v23  ;;  %v5254_v42 = vcombine.low %v774_v24, %v778_v40  ;;  %6147 = vmatprep.subr.msk.bf16.mxu0 %vm567_vm0, %v6386_v5  ;;  %v7853_v10 = vrot.slane %v6492_v45, 5  ;;  %v5250_v0 = vrot.slane %v742_v36, 9  ;;  %v5282_v5 = vld [vmem:[%s6440_s17 + $0x18] sm:$0xf]  ;;  %v5284_v23 = vld [vmem:[%s6440_s17 + $0x20] sm:$0xf] }
  0x31   : > { %v5231_v53 = vcombine.low %v525_v50, %v539_v27  ;;  %v7854_v56 = vrot.slane %v6495_v46, 5  ;;  %v789_v63 = vrot.slane %v6545_v61, 5  ;;  %v5251_v26 = vrot.slane %v743_v48, 9 }
  0x32   : > { %v782_v59 = vsel %vm6568_vm7, %v5248_v44, %v7853_v10  ;;  %v793_v52 = vrot.slane %v6551_v1, 5  ;;  %v1033_v31 = vshrl.u32 %v5278_v62, 16  ;;  %v1036_v34 = vshll.u32 %v5278_v62, 16  ;;  %v5286_v62 = vld [vmem:[%s6440_s17 + $0x28] sm:$0xf] }
  0x33   : > { %v786_v57 = vsel %vm6568_vm7, %v5249_v37, %v7854_v56  ;;  %5877 = vmatmul.mubr.msk.bf16.vlgmr.msra.gmra.mxu1 %vm554_vm3, %v5231_v53  ;;  %v6628_v46 = vsel %vm6568_vm7, %v5250_v0, %v789_v63  ;;  %v1042_v61 = vshll.u32 %v6609_v43, 16  ;;  %v1047_v2 = vshrl.u32 %v5280_v51, 16  ;;  %v6652_v0 = vld [vmem:[%s6440_s17 + $0x2c] sm:$0x1] }
  0x34   : > { %v5255_v45 = vcombine.low %v782_v59, %v786_v57  ;;  %v1050_v60 = vshll.u32 %v5280_v51, 16  ;;  %5881 = vmatpush3.bf16.msra.mxu1 %v6405_v9  ;;  %v7855_v1 = vcombine.low %v6459_v21, %v6462_v22  ;;  %v794_v35 = vsel %vm6568_vm7, %v5251_v26, %v793_v52  ;;  %v6644_v22 = vld [vmem:[%s6440_s17 + $0x24] sm:$0x1] }
  0x35   : > { %v1035_v38 = vrot.slane %v1033_v31, 4  ;;  %v1038_v36 = vrot.slane %v1036_v34, 5  ;;  %v1056_v29 = vshll.u32 %v6618_v30, 16  ;;  %6146 = vmatprep.subr.msk.bf16.mxu1 %vm567_vm0, %v6381_v4  ;;  %v5256_v44 = vcombine.low %v6628_v46, %v794_v35 }
  0x36   : > { %5882 = vmatprep.mubr.msk.bf16.mxu1 %vm554_vm3, %v7855_v1  ;;  %v1044_v9 = vrot.slane %v1042_v61, 5  ;;  %v1049_v37 = vrot.slane %v1047_v2, 4  ;;  %v1052_v21 = vrot.slane %v1050_v60, 5  ;;  %5893 = vmatmul.mubr.msk.bf16.vlgmr.msra.gmra.mxu0 %vm554_vm3, %v5254_v42  ;;  %v1061_v24 = vshrl.u32 %v5282_v5, 16  ;;  %v6667_v61 = vld [vmem:[%s6440_s17 + $0x34] sm:$0x1] }
  0x37   : > { %v1039_v48 = vor.u32 %v1038_v36, %v1035_v38  ;;  %v1058_v50 = vrot.slane %v1056_v29, 5  ;;  %v1064_v40 = vshll.u32 %v5282_v5, 16  ;;  %5911 = vmatpush3.bf16.msra.mxu0 %v6426_v14  ;;  %5896 = vmatprep.mubr.msk.bf16.mxu0 %vm554_vm3, %v5255_v45  ;;  %v1070_v27 = vshll.u32 %v6623_v25, 16  ;;  %v5288_v14 = vld [vmem:[%s6440_s17 + $0x30] sm:$0xf] }
  0x38   : > { %v1053_v4 = vor.u32 %v1052_v21, %v1049_v37  ;;  %v1075_v10 = vshrl.u32 %v5284_v23, 16  ;;  %v1078_v59 = vshll.u32 %v5284_v23, 16  ;;  %v1063_v53 = vrot.slane %v1061_v24, 4  ;;  %6149 = vmatprep.subr.msk.bf16.mxu0 %vm567_vm0, %v6396_v7  ;;  %v5290_v1 = vld [vmem:[%s6440_s17 + $0x38] sm:$0xf] }
  0x39   : > { %v1040_v51 = vrot.slane %v1039_v48, 4  ;;  %v1066_v42 = vrot.slane %v1064_v40, 5  ;;  %v1084_v56 = vshll.u32 %v6644_v22, 16  ;;  %v1072_v63 = vrot.slane %v1070_v27, 5  ;;  %v6677_v36 = vld [vmem:[%s6440_s17 + $0x3c] sm:$0x1] }
  0x3a   : > { %v1054_v57 = vrot.slane %v1053_v4, 4  ;;  %v1077_v26 = vrot.slane %v1075_v10, 4  ;;  %v1080_v5 = vrot.slane %v1078_v59, 5  ;;  %v1089_v34 = vshrl.u32 %v5286_v62, 16  ;;  %v5292_v37 = vld [vmem:[%s6440_s17 + $0x40] sm:$0xf] }
  0x3b   : > { %v1045_v45 = vsel %vm6502_vm4, %v1040_v51, %v1044_v9  ;;  %v1067_v52 = vor.u32 %v1066_v42, %v1063_v53  ;;  %v1086_v31 = vrot.slane %v1084_v56, 5  ;;  %5883 = vmatmul.mubr.msk.bf16.vlgmr.msra.gmra.mxu1 %vm554_vm3, %v5237_v39  ;;  %v1092_v2 = vshll.u32 %v5286_v62, 16  ;;  %v5303_v4 = vld [vmem:[%s6440_s17 + $0x8] sm:$0xe] }
  0x3c   : > { %v1059_v7 = vsel %vm6502_vm4, %v1054_v57, %v1058_v50  ;;  %v1081_v46 = vor.u32 %v1080_v5, %v1077_v26  ;;  %v1098_v60 = vshll.u32 %v6652_v0, 16  ;;  %5901 = vmatpush3.bf16.msra.mxu1 %v6422_v13  ;;  %v7856_v58 = vcombine.low %v6481_v32, %v6488_v41  ;;  %v6218_v32 = vld [vmem:[%s6440_s17 + $0x8] ss:$8 sps:$4 sm:$0xff]   ;;  %v6689_v50 = vld [vmem:[%s6440_s17 + $0x44] sm:$0x1] }
  0x3d   : > { %v5295_v3 = vcombine.low %v1045_v45, %v1059_v7  ;;  %v1068_v39 = vrot.slane %v1067_v52, 4  ;;  %v1091_v35 = vrot.slane %v1089_v34, 4  ;;  %v1103_v38 = vshrl.u32 %v5288_v14, 16  ;;  %6148 = vmatprep.subr.msk.bf16.mxu1 %vm567_vm0, %v6391_v6  ;;  %v5304_v57 = vld [vmem:[%s6440_s17 + $0x10] sm:$0xe] }
  0x3e   : > { %5886 = vmatprep.mubr.msk.bf16.mxu1 %vm554_vm3, %v7856_v58  ;;  %v1082_v29 = vrot.slane %v1081_v46, 4  ;;  %v1094_v23 = vrot.slane %v1092_v2, 5  ;;  %v1100_v9 = vrot.slane %v1098_v60, 5  ;;  %v1106_v13 = vshll.u32 %v5288_v14, 16  ;;  %5897 = vmatmul.mubr.msk.bf16.gmra.mxu0 %vm554_vm3, %v5256_v44  ;;  %v5305_v52 = vld [vmem:[%s6440_s17 + $0x18] sm:$0xe] }
  0x3f   : > { %v1073_v41 = vsel %vm6502_vm4, %v1068_v39, %v1072_v63  ;;  %v1105_v21 = vrot.slane %v1103_v38, 4  ;;  %v1112_v48 = vshll.u32 %v6667_v61, 16  ;;  %v1117_v6 = vshrl.u32 %v5290_v1, 16  ;;  %5912 = vmatprep.mubr.msk.bf16.mxu0 %vm554_vm3, %v5295_v3  ;;  %v5306_v2 = vld [vmem:[%s6440_s17 + $0x20] sm:$0xe] }
  0x40   : > { %v1087_v24 = vsel %vm6502_vm4, %v1082_v29, %v1086_v31  ;;  %v1095_v40 = vor.u32 %v1094_v23, %v1091_v35  ;;  %v1108_v62 = vrot.slane %v1106_v13, 5  ;;  %v1120_v44 = vshll.u32 %v5290_v1, 16  ;;  %v5308_v13 = vld [vmem:[%s6440_s17 + $0x30] sm:$0xe] }
  0x41   : > { %v5296_v27 = vcombine.low %v1073_v41, %v1087_v24  ;;  %v1114_v10 = vrot.slane %v1112_v48, 5  ;;  %v1119_v59 = vrot.slane %v1117_v6, 4  ;;  %v1126_v51 = vshll.u32 %v6677_v36, 16  ;;  %v6220_v41 = vld [vmem:[%s6440_s17 + $0x28] ss:$8 sps:$4 sm:$0xff]  }
  0x42   : > { %v1096_v53 = vrot.slane %v1095_v40, 4  ;;  %v1109_v42 = vor.u32 %v1108_v62, %v1105_v21  ;;  %v1122_v56 = vrot.slane %v1120_v44, 5  ;;  %v1131_v14 = vshrl.u32 %v5292_v37, 16  ;;  %v5309_v48 = vld [vmem:[%s6440_s17 + $0x38] sm:$0xe] }
  0x43   : > { %v1128_v63 = vrot.slane %v1126_v51, 5  ;;  %v1134_v26 = vshll.u32 %v5292_v37, 16  ;;  %v1140_v5 = vshll.u32 %v6689_v50, 16  ;;  %v5311_v45 = vrot.slane %v5303_v4, 9  ;;  %5887 = vmatmul.mubr.msk.bf16.gmra.mxu1 %vm554_vm3, %v5239_v33  ;;  %v5310_v62 = vld [vmem:[%s6440_s17 + $0x40] sm:$0xe] }
  0x44   : > { %v1101_v31 = vsel %vm6502_vm4, %v1096_v53, %v1100_v9  ;;  %v1110_v34 = vrot.slane %v1109_v42, 4  ;;  %v1123_v7 = vor.u32 %v1122_v56, %v1119_v59  ;;  %v1133_v46 = vrot.slane %v1131_v14, 4  ;;  %5902 = vmatprep.mubr.msk.bf16.mxu1 %vm554_vm3, %v6218_v32  ;;  %v5307_v9 = vld [vmem:[%s6440_s17 + $0x28] sm:$0xe]  ;;  %v5345_v53 = vld [vmem:[%s6440_s17 + $0x10] sm:$0xf] }
  0x45   : > { %v1136_v60 = vrot.slane %v1134_v26, 5  ;;  %v1142_v1 = vrot.slane %v1140_v5, 5  ;;  %v1272_v58 = vrot.slane %v6609_v43, 5  ;;  %v5312_v47 = vrot.slane %v5304_v57, 9  ;;  %v5346_v14 = vld [vmem:[%s6440_s17 + $0x14] sm:$0x1] }
  0x46   : > { %v1115_v33 = vsel %vm6502_vm4, %v1110_v34, %v1114_v10  ;;  %v1124_v3 = vrot.slane %v1123_v7, 4  ;;  %v1276_v39 = vrot.slane %v6618_v30, 5  ;;  %v5313_v35 = vrot.slane %v5305_v52, 9  ;;  %5913 = vmatmul.mubr.msk.bf16.vlgmr.msra.gmra.mxu0 %vm554_vm3, %v5296_v27  ;;  %v6222_v10 = vld [vmem:[%s6440_s17 + $0x10] ss:$8 sps:$4 sm:$0xff]  }
  0x47   : > { %v5297_v38 = vcombine.low %v1101_v31, %v1115_v33  ;;  %v1137_v29 = vor.u32 %v1136_v60, %v1133_v46  ;;  %v6727_v43 = vsel %vm6568_vm7, %v5311_v45, %v1272_v58  ;;  %v1280_v23 = vrot.slane %v6623_v25, 5  ;;  %5931 = vmatpush3.bf16.msra.mxu0 %v6444_v17  ;;  %v5347_v57 = vld [vmem:[%s6440_s17 + $0x18] sm:$0xf]  ;;  %v6223_v33 = vld [vmem:[%s6440_s17 + $0x20] ss:$8 sps:$4 sm:$0xff]  }
  0x48   : > { %v6735_v30 = vsel %vm6568_vm7, %v5312_v47, %v1276_v39  ;;  %v5314_v37 = vrot.slane %v5306_v2, 9  ;;  %v1284_v32 = vrot.slane %v6644_v22, 5  ;;  %v1129_v21 = vsel %vm6502_vm4, %v1124_v3, %v1128_v63  ;;  %6151 = vmatprep.subr.msk.bf16.mxu0 %vm567_vm0, %v6413_v11  ;;  %v5371_v46 = vld [vmem:[%s6440_s17 + $0x18] sm:$0xe] }
  0x49   : > { %5916 = vmatprep.mubr.msk.bf16.mxu0 %vm554_vm3, %v5297_v38  ;;  %v1138_v25 = vrot.slane %v1137_v29, 4  ;;  %v5315_v17 = vrot.slane %v5307_v9, 9  ;;  %v5320_v6 = vcombine.low %v6727_v43, %v6735_v30  ;;  %v1288_v22 = vrot.slane %v6652_v0, 5  ;;  %v6221_v2 = vld [vmem:[%s6440_s17 + $0x38] ss:$8 sps:$4 sm:$0xff]  }
  0x4a   : > { %v5316_v24 = vrot.slane %v5308_v13, 9  ;;  %v1292_v40 = vrot.slane %v6667_v61, 5  ;;  %v6754_v4 = vsel %vm6568_vm7, %v5313_v35, %v1280_v23  ;;  %v5317_v11 = vrot.slane %v5309_v48, 9  ;;  %v5350_v29 = vld [vmem:[%s6440_s17 + $0x24] sm:$0x1] }
  0x4b   : > { %v1143_v44 = vsel %vm6502_vm4, %v1138_v25, %v1142_v1  ;;  %v1296_v27 = vrot.slane %v6677_v36, 5  ;;  %5903 = vmatmul.mubr.msk.bf16.vlgmr.msra.gmra.mxu1 %vm554_vm3, %v6219_v54  ;;  %v6762_v61 = vsel %vm6568_vm7, %v5314_v37, %v1284_v32  ;;  %v6766_v59 = vsel %vm6568_vm7, %v5315_v17, %v1288_v22  ;;  %v5349_v54 = vld [vmem:[%s6440_s17 + $0x20] sm:$0xf]  ;;  %v5351_v32 = vld [vmem:[%s6440_s17 + $0x28] sm:$0xf] }
  0x4c   : > { %v5298_v0 = vcombine.low %v1129_v21, %v1143_v44  ;;  %v5318_v51 = vrot.slane %v5310_v62, 9  ;;  %5921 = vmatpush3.bf16.msra.mxu1 %v6430_v15  ;;  %5906 = vmatprep.mubr.msk.bf16.mxu1 %vm554_vm3, %v6220_v41  ;;  %v6773_v36 = vsel %vm6568_vm7, %v5316_v24, %v1292_v40  ;;  %v1300_v56 = vrot.slane %v6689_v50, 5  ;;  %v5348_v15 = vld [vmem:[%s6440_s17 + $0x1c] sm:$0x1]  ;;  %v6224_v41 = vld [vmem:[%s6440_s17 + $0x30] ss:$8 sps:$4 sm:$0xff]  }
  0x4d   : > { %v6777_v42 = vsel %vm6568_vm7, %v5317_v11, %v1296_v27  ;;  %v1540_v63 = vshrl.u32 %v5345_v53, 16  ;;  %6150 = vmatprep.subr.msk.bf16.mxu1 %vm567_vm0, %v6401_v8  ;;  %v1543_v26 = vshll.u32 %v5345_v53, 16  ;;  %v1549_v5 = vshll.u32 %v5346_v14, 16  ;;  %v5370_v8 = vld [vmem:[%s6440_s17 + $0x10] sm:$0xe] }
  0x4e   : > { %v1554_v45 = vshrl.u32 %v5347_v57, 16  ;;  %v1557_v52 = vshll.u32 %v5347_v57, 16  ;;  %5917 = vmatmul.mubr.msk.bf16.gmra.mxu0 %vm554_vm3, %v5298_v0  ;;  %v5321_v50 = vcombine.low %v6754_v4, %v6762_v61  ;;  %v6790_v31 = vsel %vm6568_vm7, %v5318_v51, %v1300_v56  ;;  %v5352_v17 = vld [vmem:[%s6440_s17 + $0x2c] sm:$0x1]  ;;  %v5372_v11 = vld [vmem:[%s6440_s17 + $0x20] sm:$0xe] }
  0x4f   : > { %v1542_v34 = vrot.slane %v1540_v63, 4  ;;  %v1563_v7 = vshll.u32 %v5348_v15, 16  ;;  %5932 = vmatprep.mubr.msk.bf16.mxu0 %vm554_vm3, %v6222_v10  ;;  %v5322_v60 = vcombine.low %v6766_v59, %v6773_v36  ;;  %v5323_v1 = vcombine.low %v6777_v42, %v6790_v31  ;;  %v5373_v53 = vld [vmem:[%s6440_s17 + $0x28] sm:$0xe]  ;;  %v5353_v43 = vld [vmem:[%s6440_s17 + $0x30] sm:$0xf] }
  0x50   : > { %v1545_v58 = vrot.slane %v1543_v26, 5  ;;  %v1556_v47 = vrot.slane %v1554_v45, 4  ;;  %v1551_v3 = vrot.slane %v1549_v5, 5  ;;  %v1559_v39 = vrot.slane %v1557_v52, 5  ;;  %v5354_v5 = vld [vmem:[%s6440_s17 + $0x34] sm:$0x1] }
  0x51   : > { %v5378_v35 = vrot.slane %v5370_v8, 9  ;;  %v1779_v38 = vrot.slane %v5346_v14, 5  ;;  %v1565_v9 = vrot.slane %v1563_v7, 5  ;;  %v5379_v13 = vrot.slane %v5371_v46, 9  ;;  %v5355_v8 = vld [vmem:[%s6440_s17 + $0x38] sm:$0xf] }
  0x52   : > { %v1546_v23 = vor.u32 %v1545_v58, %v1542_v34  ;;  %v1783_v37 = vrot.slane %v5348_v15, 5  ;;  %v1560_v21 = vor.u32 %v1559_v39, %v1556_v47  ;;  %v1568_v48 = vshrl.u32 %v5349_v54, 16  ;;  %v6225_v46 = vld [vmem:[%s6440_s17 + $0x40] ss:$8 sps:$4 sm:$0xff]  }
  0x53   : > { %v6807_v25 = vsel %vm6568_vm7, %v5378_v35, %v1779_v38  ;;  %v1571_v22 = vshll.u32 %v5349_v54, 16  ;;  %5907 = vmatmul.mubr.msk.bf16.gmra.mxu1 %vm554_vm3, %v6221_v2  ;;  %v1577_v62 = vshll.u32 %v5350_v29, 16  ;;  %v1582_v44 = vshrl.u32 %v5351_v32, 16  ;;  %v5374_v38 = vld [vmem:[%s6440_s17 + $0x30] sm:$0xe] }
  0x54   : > { %v1547_v24 = vrot.slane %v1546_v23, 4  ;;  %v6813_v40 = vsel %vm6568_vm7, %v5379_v13, %v1783_v37  ;;  %5922 = vmatprep.mubr.msk.bf16.mxu1 %vm554_vm3, %v5320_v6  ;;  %v1561_v27 = vrot.slane %v1560_v21, 4  ;;  %v1570_v10 = vrot.slane %v1568_v48, 4  ;;  %v5375_v13 = vld [vmem:[%s6440_s17 + $0x38] sm:$0xe] }
  0x55   : > { %v5387_v0 = vcombine.low %v6807_v25, %v6813_v40  ;;  %v1573_v51 = vrot.slane %v1571_v22, 5  ;;  %v1579_v14 = vrot.slane %v1577_v62, 5  ;;  %v1584_v57 = vrot.slane %v1582_v44, 4  ;;  %v5357_v37 = vld [vmem:[%s6440_s17 + $0x40] sm:$0xf] }
  0x56   : > { %v1552_v56 = vsel %vm6502_vm4, %v1547_v24, %v1551_v3  ;;  %v1585_v63 = vshll.u32 %v5351_v32, 16  ;;  %5933 = vmatmul.mubr.msk.bf16.vlgmr.msra.gmra.mxu0 %vm554_vm3, %v6223_v33  ;;  %v1566_v30 = vsel %vm6502_vm4, %v1561_v27, %v1565_v9  ;;  %v1591_v15 = vshll.u32 %v5352_v17, 16  ;;  %v5356_v3 = vld [vmem:[%s6440_s17 + $0x3c] sm:$0x1]  ;;  %v5358_v48 = vld [vmem:[%s6440_s17 + $0x44] sm:$0x1] }
  0x57   : > { %v1574_v6 = vor.u32 %v1573_v51, %v1570_v10  ;;  %v5380_v26 = vrot.slane %v5372_v11, 9  ;;  %5951 = vmatpush3.bf16.msra.mxu0 %v6452_v19  ;;  %5936 = vmatprep.mubr.msk.bf16.mxu0 %vm554_vm3, %v6224_v41  ;;  %v6838_v45 = vcombine.low %v1552_v56, %v1566_v30  ;;  %v1787_v34 = vrot.slane %v5350_v29, 5  ;;  %v5360_v51 = vld [vmem:[%s6440_s17 + $0x4c] sm:$0x1]  ;;  %v5376_v30 = vld [vmem:[%s6440_s17 + $0x40] sm:$0xe] }
  0x58   : > { %v1587_v52 = vrot.slane %v1585_v63, 5  ;;  %v5381_v7 = vrot.slane %v5373_v53, 9  ;;  %v1593_v58 = vrot.slane %v1591_v15, 5  ;;  %v1791_v47 = vrot.slane %v5352_v17, 5  ;;  %6153 = vmatprep.subr.msk.bf16.mxu0 %vm567_vm0, %v6435_v16 }
  0x59   : > { %v1575_v2 = vrot.slane %v1574_v6, 4  ;;  %v1596_v54 = vshrl.u32 %v5353_v43, 16  ;;  %v6846_v33 = vsel %vm6568_vm7, %v5380_v26, %v1787_v34  ;;  %v1599_v39 = vshll.u32 %v5353_v43, 16  ;;  %v5377_v6 = vld [vmem:[%s6440_s17 + $0x48] sm:$0xe] }
  0x5a   : > { %v1588_v19 = vor.u32 %v1587_v52, %v1584_v57  ;;  %v1605_v35 = vshll.u32 %v5354_v5, 16  ;;  %v6854_v23 = vsel %vm6568_vm7, %v5381_v7, %v1791_v47  ;;  %v1610_v16 = vshrl.u32 %v5355_v8, 16  ;;  %v2029_v7 = vld [vmem:[%s6861_s8] sm:$0xf]  ;;  %v6902_v47 = vld [vmem:[%s6861_s8 + $0x4] sm:$0x1] }
  0x5b   : > { %v1580_v29 = vsel %vm6502_vm4, %v1575_v2, %v1579_v14  ;;  %v1598_v9 = vrot.slane %v1596_v54, 4  ;;  %5923 = vmatmul.mubr.msk.bf16.vlgmr.msra.gmra.mxu1 %vm554_vm3, %v5321_v50  ;;  %v5388_v41 = vcombine.low %v6846_v33, %v6854_v23  ;;  %v1601_v21 = vrot.slane %v1599_v39, 5  ;;  %v6907_v54 = vld [vmem:[%s7845_s3 + $0x18] sm:$0x3]  ;;  %v2031_v33 = vld [vmem:[%s6861_s8 + $0x8] sm:$0xf] }
  0x5c   : > { %v1589_v32 = vrot.slane %v1588_v19, 4  ;;  %v1607_v17 = vrot.slane %v1605_v35, 5  ;;  %5941 = vmatpush3.bf16.msra.mxu1 %v6448_v18  ;;  %5926 = vmatprep.mubr.msk.bf16.mxu1 %vm554_vm3, %v5322_v60  ;;  %v1612_v22 = vrot.slane %v1610_v16, 4  ;;  %v1613_v24 = vshll.u32 %v5355_v8, 16  ;;  %v5359_v18 = vld [vmem:[%s6440_s17 + $0x48] sm:$0xf]  ;;  %s7259_s17 = scalar_lea.vmem %s7844_s2, %s5221_s11  ;;  %s406_s11 = scalar_lea.vmem %s7848_s6, %s398_s7 }
  0x5d   : > { %v1619_v4 = vshll.u32 %v5356_v3, 16  ;;  %v5382_v61 = vrot.slane %v5374_v38, 9  ;;  %6152 = vmatprep.subr.msk.bf16.mxu1 %vm567_vm0, %v6418_v12  ;;  %v1602_v62 = vor.u32 %v1601_v21, %v1598_v9  ;;  %v1795_v44 = vrot.slane %v5354_v5, 5  ;;  %v2033_v23 = vld [vmem:[%s6861_s8 + $0x10] sm:$0xf] }
  0x5e   : > { %v1594_v50 = vsel %vm6502_vm4, %v1589_v32, %v1593_v58  ;;  %v5383_v11 = vrot.slane %v5375_v13, 9  ;;  %5937 = vmatmul.mubr.msk.bf16.gmra.mxu0 %vm554_vm3, %v6225_v46  ;;  %v1615_v36 = vrot.slane %v1613_v24, 5  ;;  %v1799_v27 = vrot.slane %v5356_v3, 5 }
  0x5f   : > { %v6881_v59 = vcombine.low %v1580_v29, %v1594_v50  ;;  %v1621_v60 = vrot.slane %v1619_v4, 5  ;;  %5952 = vmatprep.mubr.msk.bf16.mxu0 %vm554_vm3, %v5387_v0  ;;  %v1603_v12 = vrot.slane %v1602_v62, 4  ;;  %v1796_v10 = vsel %vm6568_vm7, %v5382_v61, %v1795_v44  ;;  %v6917_v29 = vld [vmem:[%s6861_s8 + $0xc] sm:$0x1]  ;;  %v5421_v4 = vld [vmem:[%s7845_s3 + $0x16] sm:$0x3] }
  0x60   : > { %v1624_v53 = vshrl.u32 %v5357_v37, 16  ;;  %v1627_v56 = vshll.u32 %v5357_v37, 16  ;;  %v1616_v14 = vor.u32 %v1615_v36, %v1612_v22  ;;  %v1800_v57 = vsel %vm6568_vm7, %v5383_v11, %v1799_v27  ;;  %v2035_v44 = vld [vmem:[%s6861_s8 + $0x18] sm:$0xf]  ;;  %v6941_v27 = vld [vmem:[%s6861_s8 + $0x1c] sm:$0x1] }
  0x61   : > { %v1633_v63 = vshll.u32 %v5358_v48, 16  ;;  %v1638_v43 = vshrl.u32 %v5359_v18, 16  ;;  %v1608_v25 = vsel %vm6502_vm4, %v1603_v12, %v1607_v17  ;;  %v5389_v40 = vcombine.low %v1796_v10, %v1800_v57 }
  0x62   : > { %v1626_v0 = vrot.slane %v1624_v53, 4  ;;  %v1629_v15 = vrot.slane %v1627_v56, 5  ;;  %v1617_v26 = vrot.slane %v1616_v14, 4  ;;  %v1641_v34 = vshll.u32 %v5359_v18, 16 }
  0x63   : > { %v1635_v5 = vrot.slane %v1633_v63, 5  ;;  %v1640_v52 = vrot.slane %v1638_v43, 4  ;;  %5927 = vmatmul.mubr.msk.bf16.gmra.mxu1 %vm554_vm3, %v5323_v1  ;;  %v1647_v46 = vshll.u32 %v5360_v51, 16  ;;  %v5384_v2 = vrot.slane %v5376_v30, 9  ;;  %v2037_v30 = vld [vmem:[%s6861_s8 + $0x20] sm:$0xf] }
  0x64   : > { %v1630_v8 = vor.u32 %v1629_v15, %v1626_v0  ;;  %v1803_v58 = vrot.slane %v5358_v48, 5  ;;  %5942 = vmatprep.mubr.msk.bf16.mxu1 %vm554_vm3, %v6838_v45  ;;  %v1622_v42 = vsel %vm6502_vm4, %v1617_v26, %v1621_v60  ;;  %v1643_v31 = vrot.slane %v1641_v34, 5  ;;  %v6226_v0 = vld [vmem:[%s6861_s8] ss:$8 sps:$4 sm:$0xff]  }
  0x65   : > { %v5385_v1 = vrot.slane %v5377_v6, 9  ;;  %v1807_v19 = vrot.slane %v5360_v51, 5  ;;  %v5364_v3 = vcombine.low %v1608_v25, %v1622_v42  ;;  %v1649_v35 = vrot.slane %v1647_v46, 5  ;;  %v2039_v34 = vld [vmem:[%s6861_s8 + $0x28] sm:$0xf] }
  0x66   : > { %v1631_v39 = vrot.slane %v1630_v8, 4  ;;  %v1804_v38 = vsel %vm6568_vm7, %v5384_v2, %v1803_v58  ;;  %5953 = vmatmul.mubr.msk.bf16.vlgmr.msra.gmra.mxu0 %vm554_vm3, %v5388_v41  ;;  %v1644_v45 = vor.u32 %v1643_v31, %v1640_v52  ;;  %v2046_v16 = vshrl.u32 %v2029_v7, 16  ;;  %v2041_v42 = vld [vmem:[%s6861_s8 + $0x30] sm:$0xf] }
  0x67   : > { %v1808_v9 = vsel %vm6568_vm7, %v5385_v1, %v1807_v19  ;;  %v2049_v13 = vshll.u32 %v2029_v7, 16  ;;  %5971 = vmatpush3.bf16.msra.mxu0 %v6475_v28  ;;  %5956 = vmatprep.mubr.msk.bf16.mxu0 %vm554_vm3, %v5389_v40  ;;  %v2055_v21 = vshll.u32 %v6902_v47, 16  ;;  %v2060_v17 = vshrl.u32 %v2031_v33, 16  ;;  %v6932_v28 = vld [vmem:[%s6861_s8 + $0x14] sm:$0x1] }
  0x68   : > { %v1636_v37 = vsel %vm6502_vm4, %v1631_v39, %v1635_v5  ;;  %v5390_v32 = vcombine.low %v1804_v38, %v1808_v9  ;;  %v1645_v41 = vrot.slane %v1644_v45, 4  ;;  %v2048_v48 = vrot.slane %v2046_v16, 4  ;;  %6155 = vmatprep.subr.msk.bf16.mxu0 %vm567_vm0, %v6907_v54  ;;  %v6963_v7 = vld [vmem:[%s6861_s8 + $0x2c] sm:$0x1]  ;;  %v2043_v45 = vld [vmem:[%s6861_s8 + $0x38] sm:$0xf] }
  0x69   : > { %v2051_v22 = vrot.slane %v2049_v13, 5  ;;  %v2063_v24 = vshll.u32 %v2031_v33, 16  ;;  %v2057_v61 = vrot.slane %v2055_v21, 5  ;;  %v2062_v50 = vrot.slane %v2060_v17, 4  ;;  %v6981_v17 = vld [vmem:[%s6861_s8 + $0x3c] sm:$0x1] }
  0x6a   : > { %v2069_v62 = vshll.u32 %v6917_v29, 16  ;;  %v2074_v11 = vshrl.u32 %v2033_v23, 16  ;;  %v1650_v18 = vsel %vm6502_vm4, %v1645_v41, %v1649_v35  ;;  %v2077_v12 = vshll.u32 %v2033_v23, 16 }
  0x6b   : > { %v2052_v36 = vor.u32 %v2051_v22, %v2048_v48  ;;  %v2065_v60 = vrot.slane %v2063_v24, 5  ;;  %5943 = vmatmul.mubr.msk.bf16.vlgmr.msra.gmra.mxu1 %vm554_vm3, %v6881_v59  ;;  %v5365_v10 = vcombine.low %v1636_v37, %v1650_v18  ;;  %v2083_v56 = vshll.u32 %v6932_v28, 16 }
  0x6c   : > { %v2071_v51 = vrot.slane %v2069_v62, 5  ;;  %v2076_v53 = vrot.slane %v2074_v11, 4  ;;  %5961 = vmatpush3.bf16.msra.mxu1 %v6456_v20  ;;  %5946 = vmatprep.mubr.msk.bf16.mxu1 %vm554_vm3, %v5364_v3  ;;  %v2079_v63 = vrot.slane %v2077_v12, 5  ;;  %v2088_v43 = vshrl.u32 %v2035_v44, 16  ;;  %v6955_v20 = vld [vmem:[%s6861_s8 + $0x24] sm:$0x1] }
  0x6d   : > { %v2053_v14 = vrot.slane %v2052_v36, 4  ;;  %v2066_v57 = vor.u32 %v2065_v60, %v2062_v50  ;;  %6154 = vmatprep.subr.msk.bf16.mxu1 %vm567_vm0, %v5421_v4  ;;  %v2085_v59 = vrot.slane %v2083_v56, 5  ;;  %v2091_v6 = vshll.u32 %v2035_v44, 16  ;;  %v6972_v3 = vld [vmem:[%s6861_s8 + $0x34] sm:$0x1] }
  0x6e   : > { %v2097_v25 = vshll.u32 %v6941_v27, 16  ;;  %v6952_v40 = vsel %vm567_vm0, %v5421_v4, 0  ;;  %5957 = vmatmul.mubr.msk.bf16.gmra.mxu0 %vm554_vm3, %v5390_v32  ;;  %v2080_v5 = vor.u32 %v2079_v63, %v2076_v53  ;;  %v2090_v52 = vrot.slane %v2088_v43, 4  ;;  %v6227_v50 = vld [vmem:[%s6861_s8 + $0x10] ss:$8 sps:$4 sm:$0xff]  }
  0x6f   : > { %v2058_v15 = vsel %vm6502_vm4, %v2053_v14, %v2057_v61  ;;  %v2067_v26 = vrot.slane %v2066_v57, 4  ;;  %v2093_v8 = vrot.slane %v2091_v6, 5  ;;  %v2461_v2 = vsel %vm567_vm0, %v6907_v54, 0  ;;  %v2259_v61 = vld [vmem:[%s6861_s8] sm:$0xe] }
  0x70   : > { %v2099_v46 = vrot.slane %v2097_v25, 5  ;;  %v2102_v58 = vshrl.u32 %v2037_v30, 16  ;;  %v2081_v1 = vrot.slane %v2080_v5, 4  ;;  %v2105_v19 = vshll.u32 %v2037_v30, 16  ;;  %v2260_v36 = vld [vmem:[%s6861_s8 + $0x8] sm:$0xe] }
  0x71   : > { %v2072_v31 = vsel %vm6502_vm4, %v2067_v26, %v2071_v51  ;;  %v2111_v33 = vshll.u32 %v6955_v20, 16  ;;  %v2094_v35 = vor.u32 %v2093_v8, %v2090_v52  ;;  %v2116_v23 = vshrl.u32 %v2039_v34, 16  ;;  %v6228_v12 = vld [vmem:[%s6861_s8 + $0x20] ss:$8 sps:$4 sm:$0xff]   ;;  %v2261_v56 = vld [vmem:[%s6861_s8 + $0x10] sm:$0xe] }
  0x72   : > { %v5405_v39 = vcombine.low %v2058_v15, %v2072_v31  ;;  %v2104_v38 = vrot.slane %v2102_v58, 4  ;;  %v2086_v54 = vsel %vm6502_vm4, %v2081_v1, %v2085_v59  ;;  %v2107_v9 = vrot.slane %v2105_v19, 5  ;;  %v5488_v15 = vld [vmem:[%s7845_s3 + $0x1c] sm:$0x3]  ;;  %v2262_v8 = vld [vmem:[%s6861_s8 + $0x18] sm:$0xe] }
  0x73   : > { %v2113_v16 = vrot.slane %v2111_v33, 5  ;;  %v2119_v13 = vshll.u32 %v2039_v34, 16  ;;  %5947 = vmatmul.mubr.msk.bf16.gmra.mxu1 %vm554_vm3, %v5365_v10  ;;  %v2095_v37 = vrot.slane %v2094_v35, 4  ;;  %v2118_v32 = vrot.slane %v2116_v23, 4  ;;  %v2263_v1 = vld [vmem:[%s6861_s8 + $0x20] sm:$0xe] }
  0x74   : > { %5972 = vmatprep.mubr.msk.bf16.mxu0 %vm554_vm3, %v5405_v39  ;;  %v2125_v21 = vshll.u32 %v6963_v7, 16  ;;  %v2130_v41 = vshrl.u32 %v2041_v42, 16  ;;  %5962 = vmatprep.mubr.msk.bf16.mxu1 %vm554_vm3, %v6226_v0  ;;  %v2108_v48 = vor.u32 %v2107_v9, %v2104_v38  ;;  %v2133_v24 = vshll.u32 %v2041_v42, 16  ;;  %v5463_v0 = vld [vmem:[%s7845_s3 + $0x1a] sm:$0x3] }
  0x75   : > { %v2121_v22 = vrot.slane %v2119_v13, 5  ;;  %v2139_v4 = vshll.u32 %v6972_v3, 16  ;;  %v2100_v62 = vsel %vm6502_vm4, %v2095_v37, %v2099_v46  ;;  %v2144_v18 = vshrl.u32 %v2043_v45, 16  ;;  %v2264_v23 = vld [vmem:[%s6861_s8 + $0x28] sm:$0xe] }
  0x76   : > { %v2127_v44 = vrot.slane %v2125_v21, 5  ;;  %v2132_v11 = vrot.slane %v2130_v41, 4  ;;  %v5406_v60 = vcombine.low %v2086_v54, %v2100_v62  ;;  %v2109_v10 = vrot.slane %v2108_v48, 4  ;;  %v6230_v48 = vld [vmem:[%s6861_s8 + $0x8] ss:$8 sps:$4 sm:$0xff]  }
  0x77   : > { %v2122_v51 = vor.u32 %v2121_v22, %v2118_v32  ;;  %v2135_v53 = vrot.slane %v2133_v24, 5  ;;  %v2141_v14 = vrot.slane %v2139_v4, 5  ;;  %v2146_v57 = vrot.slane %v2144_v18, 4  ;;  %v5449_v18 = vld [vmem:[%s6861_s8 + $0x10] sm:$0xf] }
  0x78   : > { %v2147_v63 = vshll.u32 %v2043_v45, 16  ;;  %v2153_v43 = vshll.u32 %v6981_v17, 16  ;;  %5973 = vmatmul.mubr.msk.bf16.vlgmr.msra.gmra.mxu0 %vm554_vm3, %v5406_v60  ;;  %v2114_v30 = vsel %vm6502_vm4, %v2109_v10, %v2113_v16  ;;  %v5413_v25 = vrot.slane %v2259_v61, 9  ;;  %v2265_v45 = vld [vmem:[%s6861_s8 + $0x30] sm:$0xe] }
  0x79   : > { %v2123_v59 = vrot.slane %v2122_v51, 4  ;;  %v2136_v6 = vor.u32 %v2135_v53, %v2132_v11  ;;  %5991 = vmatpush3.bf16.msra.mxu0 %v2461_v2  ;;  %v2285_v52 = vrot.slane %v6902_v47, 5  ;;  %v5414_v34 = vrot.slane %v2260_v36, 9  ;;  %v5447_v61 = vld [vmem:[%s6861_s8 + $0x8] sm:$0xf] }
  0x7a   : > { %v2149_v26 = vrot.slane %v2147_v63, 5  ;;  %v2155_v5 = vrot.slane %v2153_v43, 5  ;;  %v2289_v42 = vrot.slane %v6917_v29, 5  ;;  %v5415_v31 = vrot.slane %v2261_v56, 9  ;;  %6157 = vmatprep.subr.msk.bf16.mxu0 %vm567_vm0, %v5488_v15  ;;  %v5448_v11 = vld [vmem:[%s6861_s8 + $0xc] sm:$0x1] }
  0x7b   : > { %v2128_v46 = vsel %vm6502_vm4, %v2123_v59, %v2127_v44  ;;  %v2137_v58 = vrot.slane %v2136_v6, 4  ;;  %5963 = vmatmul.mubr.msk.bf16.vlgmr.msra.gmra.mxu1 %vm554_vm3, %v6227_v50  ;;  %v2286_v47 = vsel %vm6568_vm7, %v5413_v25, %v2285_v52  ;;  %v2293_v33 = vrot.slane %v6932_v28, 5  ;;  %v6229_v28 = vld [vmem:[%s6861_s8 + $0x30] ss:$8 sps:$4 sm:$0xff]  }
  0x7c   : > { %v5407_v2 = vcombine.low %v2114_v30, %v2128_v46  ;;  %v2150_v19 = vor.u32 %v2149_v26, %v2146_v57  ;;  %5981 = vmatpush3.bf16.msra.mxu1 %v6952_v40  ;;  %5966 = vmatprep.mubr.msk.bf16.mxu1 %vm554_vm3, %v6228_v12  ;;  %v2290_v39 = vsel %vm6568_vm7, %v5414_v34, %v2289_v42  ;;  %v5416_v35 = vrot.slane %v2262_v8, 9  ;;  %v5450_v12 = vld [vmem:[%s6861_s8 + $0x14] sm:$0x1]  ;;  %v5473_v30 = vld [vmem:[%s6861_s8 + $0x10] sm:$0xe] }
  0x7d   : > { %v2142_v29 = vsel %vm6502_vm4, %v2137_v58, %v2141_v14  ;;  %v2297_v38 = vrot.slane %v6941_v27, 5  ;;  %v5422_v40 = vcombine.low %v2286_v47, %v2290_v39  ;;  %6156 = vmatprep.subr.msk.bf16.mxu1 %vm567_vm0, %v5463_v0  ;;  %v7027_v9 = vsel %vm6568_vm7, %v5415_v31, %v2293_v33  ;;  %v2266_v27 = vld [vmem:[%s6861_s8 + $0x38] sm:$0xe]  ;;  %v5472_v14 = vld [vmem:[%s6861_s8 + $0x8] sm:$0xe] }
  0x7e   : > { %5976 = vmatprep.mubr.msk.bf16.mxu0 %vm554_vm3, %v5407_v2  ;;  %v2151_v54 = vrot.slane %v2150_v19, 4  ;;  %v7030_v16 = vsel %vm567_vm0, %v5463_v0, 0  ;;  %v7038_v37 = vsel %vm567_vm0, %v5488_v15, 0  ;;  %v5417_v32 = vrot.slane %v2263_v1, 9  ;;  %v6231_v59 = vld [vmem:[%s6861_s8 + $0x18] ss:$8 sps:$4 sm:$0xff]  }
  0x7f   : > { %v7035_v13 = vsel %vm6568_vm7, %v5416_v35, %v2297_v38  ;;  %v2301_v21 = vrot.slane %v6955_v20, 5  ;;  %v5418_v24 = vrot.slane %v2264_v23, 9  ;;  %v2305_v4 = vrot.slane %v6963_v7, 5  ;;  %v5451_v26 = vld [vmem:[%s6861_s8 + $0x18] sm:$0xf] }
  0x80   : > { %v2156_v41 = vsel %vm6502_vm4, %v2151_v54, %v2155_v5  ;;  %v5423_v22 = vcombine.low %v7027_v9, %v7035_v13  ;;  %v5419_v44 = vrot.slane %v2265_v45, 9  ;;  %v2309_v20 = vrot.slane %v6972_v3, 5  ;;  %v5452_v46 = vld [vmem:[%s6861_s8 + $0x1c] sm:$0x1]  ;;  %v5453_v2 = vld [vmem:[%s6861_s8 + $0x20] sm:$0xf] }
  0x81   : > { %v5408_v50 = vcombine.low %v2142_v29, %v2156_v41  ;;  %v7050_v62 = vsel %vm6568_vm7, %v5417_v32, %v2301_v21  ;;  %v7057_v36 = vsel %vm6568_vm7, %v5418_v24, %v2305_v4  ;;  %v5420_v60 = vrot.slane %v2266_v27, 9  ;;  %v6232_v19 = vld [vmem:[%s6861_s8 + $0x28] ss:$8 sps:$4 sm:$0xff]   ;;  %v5454_v29 = vld [vmem:[%s6861_s8 + $0x24] sm:$0x1] }
  0x82   : > { %v2313_v7 = vrot.slane %v6981_v17, 5  ;;  %v2553_v10 = vshrl.u32 %v5447_v61, 16  ;;  %v5424_v51 = vcombine.low %v7050_v62, %v7057_v36  ;;  %v7066_v3 = vsel %vm6568_vm7, %v5419_v44, %v2309_v20  ;;  %v5474_v54 = vld [vmem:[%s6861_s8 + $0x18] sm:$0xe]  ;;  %v5475_v41 = vld [vmem:[%s6861_s8 + $0x20] sm:$0xe] }
  0x83   : > { %5977 = vmatmul.mubr.msk.bf16.gmra.mxu0 %vm554_vm3, %v5408_v50  ;;  %v2556_v53 = vshll.u32 %v5447_v61, 16  ;;  %v2562_v56 = vshll.u32 %v5448_v11, 16  ;;  %5967 = vmatmul.mubr.msk.bf16.gmra.mxu1 %vm554_vm3, %v6229_v28  ;;  %v2567_v63 = vshrl.u32 %v5449_v18, 16  ;;  %v2570_v43 = vshll.u32 %v5449_v18, 16  ;;  %v5505_v24 = vld [vmem:[%s7845_s3 + $0x1e] sm:$0x3] }
  0x84   : > { %5992 = vmatprep.mubr.msk.bf16.mxu0 %vm554_vm3, %v6230_v48  ;;  %v7073_v17 = vsel %vm6568_vm7, %v5420_v60, %v2313_v7  ;;  %v2555_v57 = vrot.slane %v2553_v10, 4  ;;  %5982 = vmatprep.mubr.msk.bf16.mxu1 %vm554_vm3, %v5422_v40  ;;  %v2576_v15 = vshll.u32 %v5450_v12, 16  ;;  %v5480_v34 = vrot.slane %v5472_v14, 9  ;;  %v5530_v18 = vld [vmem:[%s7845_s3 + $0x20] sm:$0x3] }
  0x85   : > { %v5425_v6 = vcombine.low %v7066_v3, %v7073_v17  ;;  %v2558_v25 = vrot.slane %v2556_v53, 5  ;;  %v2564_v0 = vrot.slane %v2562_v56, 5  ;;  %v2569_v5 = vrot.slane %v2567_v63, 4  ;;  %v5455_v36 = vld [vmem:[%s6861_s8 + $0x28] sm:$0xf] }
  0x86   : > { %v2572_v52 = vrot.slane %v2570_v43, 5  ;;  %v2792_v8 = vrot.slane %v5448_v11, 5  ;;  %v2578_v42 = vrot.slane %v2576_v15, 5  ;;  %v5481_v31 = vrot.slane %v5473_v30, 9  ;;  %v5456_v60 = vld [vmem:[%s6861_s8 + $0x2c] sm:$0x1] }
  0x87   : > { %v2559_v58 = vor.u32 %v2558_v25, %v2555_v57  ;;  %v2796_v1 = vrot.slane %v5450_v12, 5  ;;  %v2581_v39 = vshrl.u32 %v5451_v26, 16  ;;  %v2584_v35 = vshll.u32 %v5451_v26, 16  ;;  %v5458_v63 = vld [vmem:[%s6861_s8 + $0x34] sm:$0x1] }
  0x88   : > { %v2573_v47 = vor.u32 %v2572_v52, %v2569_v5  ;;  %v7086_v33 = vsel %vm6568_vm7, %v5480_v34, %v2792_v8  ;;  %v2590_v45 = vshll.u32 %v5452_v46, 16  ;;  %v2595_v28 = vshrl.u32 %v5453_v2, 16  ;;  %v5476_v15 = vld [vmem:[%s6861_s8 + $0x28] sm:$0xe]  ;;  %v5477_v26 = vld [vmem:[%s6861_s8 + $0x30] sm:$0xe] }
  0x89   : > { %v2560_v38 = vrot.slane %v2559_v58, 4  ;;  %v7091_v23 = vsel %vm6568_vm7, %v5481_v31, %v2796_v1  ;;  %v2583_v32 = vrot.slane %v2581_v39, 4  ;;  %v2586_v21 = vrot.slane %v2584_v35, 5  ;;  %v5461_v35 = vld [vmem:[%s6861_s8 + $0x40] sm:$0xf] }
  0x8a   : > { %v2574_v40 = vrot.slane %v2573_v47, 4  ;;  %v5489_v27 = vcombine.low %v7086_v33, %v7091_v23  ;;  %v2592_v4 = vrot.slane %v2590_v45, 5  ;;  %v2597_v61 = vrot.slane %v2595_v28, 4 }
  0x8b   : > { %5993 = vmatmul.mubr.msk.bf16.vlgmr.msra.gmra.mxu0 %vm554_vm3, %v6231_v59  ;;  %v2565_v48 = vsel %vm6502_vm4, %v2560_v38, %v2564_v0  ;;  %v2598_v50 = vshll.u32 %v5453_v2, 16  ;;  %5983 = vmatmul.mubr.msk.bf16.vlgmr.msra.gmra.mxu1 %vm554_vm3, %v5423_v22  ;;  %v2587_v44 = vor.u32 %v2586_v21, %v2583_v32  ;;  %v2604_v20 = vshll.u32 %v5454_v29, 16  ;;  %v5460_v2 = vld [vmem:[%s6861_s8 + $0x3c] sm:$0x1] }
  0x8c   : > { %6011 = vmatpush3.bf16.msra.mxu0 %v7038_v37  ;;  %v2579_v62 = vsel %vm6502_vm4, %v2574_v40, %v2578_v42  ;;  %v5482_v11 = vrot.slane %v5474_v54, 9  ;;  %6001 = vmatpush3.bf16.msra.mxu1 %v7030_v16  ;;  %v2800_v37 = vrot.slane %v5452_v46, 5  ;;  %v5483_v22 = vrot.slane %v5475_v41, 9  ;;  %v5457_v16 = vld [vmem:[%s6861_s8 + $0x30] sm:$0xf] }
  0x8d   : > { %5986 = vmatprep.mubr.msk.bf16.mxu1 %vm554_vm3, %v5424_v51  ;;  %v5464_v9 = vcombine.low %v2565_v48, %v2579_v62  ;;  %v2600_v13 = vrot.slane %v2598_v50, 5  ;;  %5996 = vmatprep.mubr.msk.bf16.mxu0 %vm554_vm3, %v6232_v19  ;;  %v2588_v7 = vrot.slane %v2587_v44, 4  ;;  %v2606_v12 = vrot.slane %v2604_v20, 5  ;;  %v6233_v51 = vld [vmem:[%s6861_s8 + $0x38] ss:$8 sps:$4 sm:$0xff]  }
  0x8e   : > { %6158 = vmatprep.subr.msk.bf16.mxu1 %vm567_vm0, %v5505_v24  ;;  %v2804_v10 = vrot.slane %v5454_v29, 5  ;;  %v7120_v53 = vsel %vm567_vm0, %v5505_v24, 0  ;;  %v7126_v14 = vsel %vm6568_vm7, %v5482_v11, %v2800_v37  ;;  %6159 = vmatprep.subr.msk.bf16.mxu0 %vm567_vm0, %v5530_v18  ;;  %v7130_v57 = vsel %vm567_vm0, %v5530_v18, 0  ;;  %v5459_v46 = vld [vmem:[%s6861_s8 + $0x38] sm:$0xf] }
  0x8f   : > { %v2601_v56 = vor.u32 %v2600_v13, %v2597_v61  ;;  %v2609_v43 = vshrl.u32 %v5455_v36, 16  ;;  %v2593_v30 = vsel %vm6502_vm4, %v2588_v7, %v2592_v4  ;;  %v2612_v25 = vshll.u32 %v5455_v36, 16  ;;  %v5478_v41 = vld [vmem:[%s6861_s8 + $0x38] sm:$0xe]  ;;  %v5479_v50 = vld [vmem:[%s6861_s8 + $0x40] sm:$0xe] }
  0x90   : > { %v2805_v59 = vsel %vm6568_vm7, %v5483_v22, %v2804_v10  ;;  %v2618_v0 = vshll.u32 %v5456_v60, 16  ;;  %v2623_v8 = vshrl.u32 %v5457_v16, 16  ;;  %v2626_v31 = vshll.u32 %v5457_v16, 16  ;;  %v5514_v18 = vld [vmem:[%s6861_s8 + $0x10] sm:$0xf] }
  0x91   : > { %v2602_v5 = vrot.slane %v2601_v56, 4  ;;  %v5490_v52 = vcombine.low %v7126_v14, %v2805_v59  ;;  %v2611_v34 = vrot.slane %v2609_v43, 4  ;;  %v2614_v58 = vrot.slane %v2612_v25, 5  ;;  %v7173_v36 = vld [vmem:[%s6861_s8 + $0x14] sm:$0x1] }
  0x92   : > { %v2620_v42 = vrot.slane %v2618_v0, 5  ;;  %v2632_v1 = vshll.u32 %v5458_v63, 16  ;;  %v2625_v47 = vrot.slane %v2623_v8, 4  ;;  %v5484_v29 = vrot.slane %v5476_v15, 9  ;;  %v7180_v43 = vld [vmem:[%s6861_s8 + $0x1c] sm:$0x1] }
  0x93   : > { %5997 = vmatmul.mubr.msk.bf16.gmra.mxu0 %vm554_vm3, %v6233_v51  ;;  %v2607_v19 = vsel %vm6502_vm4, %v2602_v5, %v2606_v12  ;;  %v2808_v39 = vrot.slane %v5456_v60, 5  ;;  %5987 = vmatmul.mubr.msk.bf16.gmra.mxu1 %vm554_vm3, %v5425_v6  ;;  %v2615_v45 = vor.u32 %v2614_v58, %v2611_v34  ;;  %v2628_v28 = vrot.slane %v2626_v31, 5  ;;  %v5462_v6 = vld [vmem:[%s6861_s8 + $0x44] sm:$0x1]  ;;  %v5516_v60 = vld [vmem:[%s6861_s8 + $0x18] sm:$0xf] }
  0x94   : > { %6012 = vmatprep.mubr.msk.bf16.mxu0 %vm554_vm3, %v5489_v27  ;;  %v5465_v38 = vcombine.low %v2593_v30, %v2607_v19  ;;  %v2634_v54 = vrot.slane %v2632_v1, 5  ;;  %6002 = vmatprep.mubr.msk.bf16.mxu1 %vm554_vm3, %v5464_v9  ;;  %v5485_v3 = vrot.slane %v5477_v26, 9  ;;  %v2812_v17 = vrot.slane %v5458_v63, 5  ;;  %v5555_v30 = vld [vmem:[%s7845_s3 + $0x22] sm:$0x3] }
  0x95   : > { %v2809_v40 = vsel %vm6568_vm7, %v5484_v29, %v2808_v39  ;;  %v2637_v32 = vshrl.u32 %v5459_v46, 16  ;;  %v2616_v33 = vrot.slane %v2615_v45, 4  ;;  %v2629_v23 = vor.u32 %v2628_v28, %v2625_v47  ;;  %v5518_v26 = vld [vmem:[%s6861_s8 + $0x20] sm:$0xf]  ;;  %v5520_v31 = vld [vmem:[%s6861_s8 + $0x28] sm:$0xf] }
  0x96   : > { %v2640_v27 = vshll.u32 %v5459_v46, 16  ;;  %v2646_v21 = vshll.u32 %v5460_v2, 16  ;;  %v2813_v48 = vsel %vm6568_vm7, %v5485_v3, %v2812_v17  ;;  %v2651_v4 = vshrl.u32 %v5461_v35, 16  ;;  %v7200_v46 = vld [vmem:[%s6861_s8 + $0x24] sm:$0x1] }
  0x97   : > { %v2639_v24 = vrot.slane %v2637_v32, 4  ;;  %v2654_v61 = vshll.u32 %v5461_v35, 16  ;;  %v2621_v62 = vsel %vm6502_vm4, %v2616_v33, %v2620_v42  ;;  %v2630_v44 = vrot.slane %v2629_v23, 4  ;;  %v5564_v1 = vld [vmem:[%s7845_s3 + $0x24] sm:$0x3] }
  0x98   : > { %v5491_v20 = vcombine.low %v2809_v40, %v2813_v48  ;;  %v2642_v11 = vrot.slane %v2640_v27, 5  ;;  %v2648_v9 = vrot.slane %v2646_v21, 5  ;;  %v2653_v13 = vrot.slane %v2651_v4, 4  ;;  %v6234_v35 = vld [vmem:[%s6861_s8 + $0x10] ss:$8 sps:$4 sm:$0xff]  }
  0x99   : > { %v2656_v37 = vrot.slane %v2654_v61, 5  ;;  %v2660_v22 = vshll.u32 %v5462_v6, 16  ;;  %v2635_v7 = vsel %vm6502_vm4, %v2630_v44, %v2634_v54  ;;  %v5486_v10 = vrot.slane %v5478_v41, 9  ;;  %v7219_v40 = vld [vmem:[%s6861_s8 + $0x2c] sm:$0x1] }
  0x9a   : > { %v2643_v12 = vor.u32 %v2642_v11, %v2639_v24  ;;  %v2816_v16 = vrot.slane %v5460_v2, 5  ;;  %v5466_v51 = vcombine.low %v2621_v62, %v2635_v7  ;;  %v5487_v63 = vrot.slane %v5479_v50, 9  ;;  %v5522_v21 = vld [vmem:[%s6861_s8 + $0x30] sm:$0xf]  ;;  %v7225_v61 = vld [vmem:[%s6861_s8 + $0x34] sm:$0x1] }
  0x9b   : > { %6013 = vmatmul.mubr.msk.bf16.vlgmr.msra.gmra.mxu0 %vm554_vm3, %v5490_v52  ;;  %v2657_v56 = vor.u32 %v2656_v37, %v2653_v13  ;;  %v2662_v14 = vrot.slane %v2660_v22, 5  ;;  %6003 = vmatmul.mubr.msk.bf16.vlgmr.msra.gmra.mxu1 %vm554_vm3, %v5465_v38  ;;  %v2820_v0 = vrot.slane %v5462_v6, 5  ;;  %v3060_v15 = vshrl.u32 %v5514_v18, 16  ;;  %v5524_v11 = vld [vmem:[%s6861_s8 + $0x38] sm:$0xf] }
  0x9c   : > { %6031 = vmatpush3.bf16.msra.mxu0 %v7130_v57  ;;  %v2644_v59 = vrot.slane %v2643_v12, 4  ;;  %v2817_v25 = vsel %vm6568_vm7, %v5486_v10, %v2816_v16  ;;  %6021 = vmatpush3.bf16.msra.mxu1 %v7120_v53  ;;  %v3063_v52 = vshll.u32 %v5514_v18, 16  ;;  %v3069_v34 = vshll.u32 %v7173_v36, 16  ;;  %v7242_v10 = vld [vmem:[%s6861_s8 + $0x3c] sm:$0x1] }
  0x9d   : > { %6006 = vmatprep.mubr.msk.bf16.mxu1 %vm554_vm3, %v5466_v51  ;;  %v2658_v5 = vrot.slane %v2657_v56, 4  ;;  %v3074_v8 = vshrl.u32 %v5516_v60, 16  ;;  %6016 = vmatprep.mubr.msk.bf16.mxu0 %vm554_vm3, %v5491_v20  ;;  %v2821_v58 = vsel %vm6568_vm7, %v5487_v63, %v2820_v0  ;;  %v3062_v53 = vrot.slane %v3060_v15, 4 }
  0x9e   : > { %v2649_v57 = vsel %vm6502_vm4, %v2644_v59, %v2648_v9  ;;  %v3077_v42 = vshll.u32 %v5516_v60, 16  ;;  %6160 = vmatprep.subr.msk.bf16.mxu1 %vm567_vm0, %v5555_v30  ;;  %v5492_v19 = vcombine.low %v2817_v25, %v2821_v58  ;;  %v3065_v47 = vrot.slane %v3063_v52, 5  ;;  %6161 = vmatprep.subr.msk.bf16.mxu0 %vm567_vm0, %v5564_v1  ;;  %v6235_v60 = vld [vmem:[%s6861_s8 + $0x20] ss:$8 sps:$4 sm:$0xff]   ;;  %v6236_v25 = vld [vmem:[%s6861_s8 + $0x30] ss:$8 sps:$4 sm:$0xff]  }
  0x9f   : > { %v2663_v2 = vsel %vm6502_vm4, %v2658_v5, %v2662_v14  ;;  %v3071_v29 = vrot.slane %v3069_v34, 5  ;;  %v3076_v38 = vrot.slane %v3074_v8, 4  ;;  %v3083_v28 = vshll.u32 %v7180_v43, 16  ;;  %v7249_v5 = vld [vmem:[%s6861_s8 + $0x44] sm:$0x1] }
  0xa0   : > { %v5467_v39 = vcombine.low %v2649_v57, %v2663_v2  ;;  %v3079_v45 = vrot.slane %v3077_v42, 5  ;;  %v3066_v54 = vor.u32 %v3065_v47, %v3062_v53  ;;  %v3088_v3 = vshrl.u32 %v5518_v26, 16  ;;  %v5528_v58 = vld [vmem:[%s6861_s8 + $0x48] sm:$0xf] }
  0xa1   : > { %v3091_v17 = vshll.u32 %v5518_v26, 16  ;;  %v3097_v6 = vshll.u32 %v7200_v46, 16  ;;  %v3085_v33 = vrot.slane %v3083_v28, 5  ;;  %v3102_v23 = vshrl.u32 %v5520_v31, 16 }
  0xa2   : > { %v3080_v32 = vor.u32 %v3079_v45, %v3076_v38  ;;  %v3105_v27 = vshll.u32 %v5520_v31, 16  ;;  %v3067_v41 = vrot.slane %v3066_v54, 4  ;;  %v3090_v48 = vrot.slane %v3088_v3, 4 }
  0xa3   : > { %6017 = vmatmul.mubr.msk.bf16.gmra.mxu0 %vm554_vm3, %v5492_v19  ;;  %v3093_v24 = vrot.slane %v3091_v17, 5  ;;  %v3099_v4 = vrot.slane %v3097_v6, 5  ;;  %6007 = vmatmul.mubr.msk.bf16.gmra.mxu1 %vm554_vm3, %v5467_v39  ;;  %v3104_v62 = vrot.slane %v3102_v23, 4  ;;  %v3111_v20 = vshll.u32 %v7219_v40, 16 }
  0xa4   : > { %v3081_v50 = vrot.slane %v3080_v32, 4  ;;  %v3107_v44 = vrot.slane %v3105_v27, 5  ;;  %6022 = vmatprep.mubr.msk.bf16.mxu1 %vm554_vm3, %v6234_v35  ;;  %v3072_v18 = vsel %vm6502_vm4, %v3067_v41, %v3071_v29  ;;  %v3356_v13 = vsel %vm567_vm0, %v5555_v30, 0  ;;  %v5526_v30 = vld [vmem:[%s6861_s8 + $0x40] sm:$0xf] }
  0xa5   : > { %v3094_v9 = vor.u32 %v3093_v24, %v3090_v48  ;;  %v3474_v37 = vsel %vm567_vm0, %v5564_v1, 0  ;;  %v3113_v12 = vrot.slane %v3111_v20, 5  ;;  %v3116_v16 = vshrl.u32 %v5522_v21, 16  ;;  %v7264_v1 = vld [vmem:[%s6861_s8 + $0x4c] sm:$0x1] }
  0xa6   : > { %v3086_v22 = vsel %vm6502_vm4, %v3081_v50, %v3085_v33  ;;  %v3108_v7 = vor.u32 %v3107_v44, %v3104_v62  ;;  %v3119_v14 = vshll.u32 %v5522_v21, 16  ;;  %v3125_v63 = vshll.u32 %v7225_v61, 16  ;;  %v5539_v35 = vld [vmem:[%s6861_s8 + $0x10] sm:$0xe]  ;;  %v5540_v33 = vld [vmem:[%s6861_s8 + $0x18] sm:$0xe] }
  0xa7   : > { %v5531_v51 = vcombine.low %v3072_v18, %v3086_v22  ;;  %v3095_v56 = vrot.slane %v3094_v9, 4  ;;  %v3118_v0 = vrot.slane %v3116_v16, 4  ;;  %v3130_v15 = vshrl.u32 %v5524_v11, 16  ;;  %v6237_v27 = vld [vmem:[%s6861_s8 + $0x40] ss:$8 sps:$4 sm:$0xff]  }
  0xa8   : > { %v3109_v59 = vrot.slane %v3108_v7, 4  ;;  %v3133_v26 = vshll.u32 %v5524_v11, 16  ;;  %v3121_v34 = vrot.slane %v3119_v14, 5  ;;  %v3127_v8 = vrot.slane %v3125_v63, 5  ;;  %v5573_v24 = vld [vmem:[%s7845_s3 + $0x26] sm:$0x3] }
  0xa9   : > { %6032 = vmatprep.mubr.msk.bf16.mxu0 %vm554_vm3, %v5531_v51  ;;  %v3100_v52 = vsel %vm6502_vm4, %v3095_v56, %v3099_v4  ;;  %v3139_v57 = vshll.u32 %v7242_v10, 16  ;;  %v3132_v42 = vrot.slane %v3130_v15, 4  ;;  %v3144_v2 = vshrl.u32 %v5526_v30, 16  ;;  %v5541_v20 = vld [vmem:[%s6861_s8 + $0x20] sm:$0xe] }
  0xaa   : > { %v3114_v53 = vsel %vm6502_vm4, %v3109_v59, %v3113_v12  ;;  %v3135_v31 = vrot.slane %v3133_v26, 5  ;;  %v3122_v47 = vor.u32 %v3121_v34, %v3118_v0  ;;  %v3147_v39 = vshll.u32 %v5526_v30, 16  ;;  %v5542_v11 = vld [vmem:[%s6861_s8 + $0x28] sm:$0xe] }
  0xab   : > { %v5532_v19 = vcombine.low %v3100_v52, %v3114_v53  ;;  %v3141_v29 = vrot.slane %v3139_v57, 5  ;;  %6023 = vmatmul.mubr.msk.bf16.vlgmr.msra.gmra.mxu1 %vm554_vm3, %v6235_v60  ;;  %v3146_v45 = vrot.slane %v3144_v2, 4  ;;  %v3153_v28 = vshll.u32 %v7249_v5, 16  ;;  %v6238_v52 = vld [vmem:[%s7259_s17] ss:$8 sps:$4 sm:$0xff]  }
  0xac   : > { %v3136_v38 = vor.u32 %v3135_v31, %v3132_v42  ;;  %v3158_v54 = vshrl.u32 %v5528_v58, 16  ;;  %6041 = vmatpush3.bf16.msra.mxu1 %v3356_v13  ;;  %v3123_v3 = vrot.slane %v3122_v47, 4  ;;  %v3149_v17 = vrot.slane %v3147_v39, 5  ;;  %6026 = vmatprep.mubr.msk.bf16.mxu1 %vm554_vm3, %v6236_v25  ;;  %v5545_v57 = vld [vmem:[%s6861_s8 + $0x40] sm:$0xe] }
  0xad   : > { %6033 = vmatmul.mubr.msk.bf16.vlgmr.msra.gmra.mxu0 %vm554_vm3, %v5532_v19  ;;  %v3161_v6 = vshll.u32 %v5528_v58, 16  ;;  %v3167_v32 = vshll.u32 %v7264_v1, 16  ;;  %v3155_v21 = vrot.slane %v3153_v28, 5  ;;  %v5547_v48 = vrot.slane %v5539_v35, 9  ;;  %6162 = vmatprep.subr.msk.bf16.mxu1 %vm567_vm0, %v5573_v24  ;;  %v5546_v42 = vld [vmem:[%s6861_s8 + $0x48] sm:$0xe] }
  0xae   : > { %6051 = vmatpush3.bf16.msra.mxu0 %v3474_v37  ;;  %v3137_v23 = vrot.slane %v3136_v38, 4  ;;  %v3160_v41 = vrot.slane %v3158_v54, 4  ;;  %v3128_v4 = vsel %vm6502_vm4, %v3123_v3, %v3127_v8  ;;  %v3150_v50 = vor.u32 %v3149_v17, %v3146_v45  ;;  %v3549_v39 = vld [vmem:[%s7259_s17] sm:$0xf]  ;;  %v3550_v35 = vld [vmem:[%s7259_s17 + $0x4] sm:$0x1] }
  0xaf   : > { %v3163_v62 = vrot.slane %v3161_v6, 5  ;;  %v3169_v44 = vrot.slane %v3167_v32, 5  ;;  %v3299_v9 = vrot.slane %v7173_v36, 5  ;;  %v5548_v13 = vrot.slane %v5540_v33, 9  ;;  %v5590_v36 = vld [vmem:[%s7845_s3 + $0x28] sm:$0x3] }
  0xb0   : > { %v3142_v18 = vsel %vm6502_vm4, %v3137_v23, %v3141_v29  ;;  %v3303_v37 = vrot.slane %v7180_v43, 5  ;;  %v3151_v60 = vrot.slane %v3150_v50, 4  ;;  %v5549_v12 = vrot.slane %v5541_v20, 9  ;;  %v5543_v43 = vld [vmem:[%s6861_s8 + $0x30] sm:$0xe]  ;;  %6163 = vmatprep.subr.msk.bf16.mxu0 %vm567_vm0, %v5590_v36 }
  0xb1   : > { %v5533_v22 = vcombine.low %v3128_v4, %v3142_v18  ;;  %v3164_v7 = vor.u32 %v3163_v62, %v3160_v41  ;;  %v3300_v16 = vsel %vm6568_vm7, %v5547_v48, %v3299_v9  ;;  %v3307_v56 = vrot.slane %v7200_v46, 5  ;;  %v5544_v46 = vld [vmem:[%s6861_s8 + $0x38] sm:$0xe]  ;;  %v3552_v28 = vld [vmem:[%s7259_s17 + $0xc] sm:$0x1] }
  0xb2   : > { %v3304_v51 = vsel %vm6568_vm7, %v5548_v13, %v3303_v37  ;;  %v5550_v14 = vrot.slane %v5542_v11, 9  ;;  %v3156_v63 = vsel %vm6502_vm4, %v3151_v60, %v3155_v21  ;;  %v3311_v25 = vrot.slane %v7219_v40, 5  ;;  %v6239_v3 = vld [vmem:[%s7259_s17 + $0x10] ss:$8 sps:$4 sm:$0xff]   ;;  %v3779_v23 = vld [vmem:[%s7259_s17] sm:$0xe] }
  0xb3   : > { %6036 = vmatprep.mubr.msk.bf16.mxu0 %vm554_vm3, %v5533_v22  ;;  %v3165_v30 = vrot.slane %v3164_v7, 4  ;;  %v5556_v59 = vcombine.low %v3300_v16, %v3304_v51  ;;  %6027 = vmatmul.mubr.msk.bf16.gmra.mxu1 %vm554_vm3, %v6237_v27  ;;  %v3308_v0 = vsel %vm6568_vm7, %v5549_v12, %v3307_v56  ;;  %v5551_v15 = vrot.slane %v5543_v43, 9  ;;  %v6240_v27 = vld [vmem:[%s7259_s17 + $0x20] ss:$8 sps:$4 sm:$0xff]   ;;  %v3553_v22 = vld [vmem:[%s7259_s17 + $0x10] sm:$0xf] }
  0xb4   : > { %v3312_v34 = vsel %vm6568_vm7, %v5550_v14, %v3311_v25  ;;  %v3315_v40 = vrot.slane %v7225_v61, 5  ;;  %v5552_v8 = vrot.slane %v5544_v46, 9  ;;  %v3319_v53 = vrot.slane %v7242_v10, 5  ;;  %v5607_v11 = vld [vmem:[%s7845_s3 + $0x2a] sm:$0x3] }
  0xb5   : > { %v3170_v26 = vsel %vm6502_vm4, %v3165_v30, %v3169_v44  ;;  %6042 = vmatprep.mubr.msk.bf16.mxu1 %vm554_vm3, %v5556_v59  ;;  %v5553_v31 = vrot.slane %v5545_v57, 9  ;;  %v3323_v19 = vrot.slane %v7249_v5, 5  ;;  %v5554_v47 = vrot.slane %v5546_v42, 9  ;;  %v3554_v51 = vld [vmem:[%s7259_s17 + $0x14] sm:$0x1] }
  0xb6   : > { %v5534_v58 = vcombine.low %v3156_v63, %v3170_v26  ;;  %v3316_v2 = vsel %vm6568_vm7, %v5551_v15, %v3315_v40  ;;  %v3327_v29 = vrot.slane %v7264_v1, 5  ;;  %v5557_v61 = vcombine.low %v3308_v0, %v3312_v34  ;;  %v3551_v1 = vld [vmem:[%s7259_s17 + $0x8] sm:$0xf]  ;;  %v3555_v56 = vld [vmem:[%s7259_s17 + $0x18] sm:$0xf] }
  0xb7   : > { %v3320_v10 = vsel %vm6568_vm7, %v5552_v8, %v3319_v53  ;;  %v3704_v38 = vsel %vm567_vm0, %v5573_v24, 0  ;;  %v7327_v5 = vsel %vm6568_vm7, %v5553_v31, %v3323_v19  ;;  %v3566_v54 = vshrl.u32 %v3549_v39, 16  ;;  %v3780_v24 = vld [vmem:[%s7259_s17 + $0x8] sm:$0xe]  ;;  %v3556_v43 = vld [vmem:[%s7259_s17 + $0x1c] sm:$0x1] }
  0xb8   : > { %6037 = vmatmul.mubr.msk.bf16.gmra.mxu0 %vm554_vm3, %v5534_v58  ;;  %v5558_v45 = vcombine.low %v3316_v2, %v3320_v10  ;;  %v3328_v17 = vsel %vm6568_vm7, %v5554_v47, %v3327_v29  ;;  %v3569_v6 = vshll.u32 %v3549_v39, 16  ;;  %v3575_v32 = vshll.u32 %v3550_v35, 16  ;;  %v3781_v59 = vld [vmem:[%s7259_s17 + $0x10] sm:$0xe]  ;;  %v5632_v26 = vld [vmem:[%s7845_s3 + $0x2c] sm:$0x3] }
  0xb9   : > { %6052 = vmatprep.mubr.msk.bf16.mxu0 %vm554_vm3, %v6238_v52  ;;  %v3580_v33 = vshrl.u32 %v3551_v1, 16  ;;  %v3568_v21 = vrot.slane %v3566_v54, 4  ;;  %v3583_v41 = vshll.u32 %v3551_v1, 16  ;;  %v3589_v48 = vshll.u32 %v3552_v28, 16  ;;  %v3782_v57 = vld [vmem:[%s7259_s17 + $0x18] sm:$0xe] }
  0xba   : > { %v5582_v4 = vrot.slane %v3779_v23, 9  ;;  %v3862_v50 = vsel %vm567_vm0, %v5590_v36, 0  ;;  %v3571_v62 = vrot.slane %v3569_v6, 5  ;;  %v3805_v20 = vrot.slane %v3550_v35, 5  ;;  %v6241_v2 = vld [vmem:[%s7259_s17 + $0x30] ss:$8 sps:$4 sm:$0xff]  }
  0xbb   : > { %6043 = vmatmul.mubr.msk.bf16.vlgmr.msra.gmra.mxu1 %vm554_vm3, %v5557_v61  ;;  %v3582_v44 = vrot.slane %v3580_v33, 4  ;;  %v5559_v18 = vcombine.low %v7327_v5, %v3328_v17  ;;  %v3585_v9 = vrot.slane %v3583_v41, 5  ;;  %v5583_v13 = vrot.slane %v3780_v24, 9  ;;  %v3557_v10 = vld [vmem:[%s7259_s17 + $0x20] sm:$0xf] }
  0xbc   : > { %6061 = vmatpush3.bf16.msra.mxu1 %v3704_v38  ;;  %6046 = vmatprep.mubr.msk.bf16.mxu1 %vm554_vm3, %v5558_v45  ;;  %v3809_v37 = vrot.slane %v3552_v28, 5  ;;  %v3572_v60 = vor.u32 %v3571_v62, %v3568_v21  ;;  %v3577_v7 = vrot.slane %v3575_v32, 5  ;;  %v3591_v12 = vrot.slane %v3589_v48, 5  ;;  %v3558_v5 = vld [vmem:[%s7259_s17 + $0x24] sm:$0x1] }
  0xbd   : > { %v7347_v16 = vsel %vm6568_vm7, %v5582_v4, %v3805_v20  ;;  %6164 = vmatprep.subr.msk.bf16.mxu1 %vm567_vm0, %v5607_v11  ;;  %v3586_v14 = vor.u32 %v3585_v9, %v3582_v44  ;;  %v3594_v63 = vshrl.u32 %v3553_v22, 16  ;;  %v3597_v30 = vshll.u32 %v3553_v22, 16  ;;  %v3559_v17 = vld [vmem:[%s7259_s17 + $0x28] sm:$0xf]  ;;  %v3560_v33 = vld [vmem:[%s7259_s17 + $0x2c] sm:$0x1] }
  0xbe   : > { %v3810_v36 = vsel %vm6568_vm7, %v5583_v13, %v3809_v37  ;;  %v3573_v25 = vrot.slane %v3572_v60, 4  ;;  %v3603_v0 = vshll.u32 %v3554_v51, 16  ;;  %v3608_v15 = vshrl.u32 %v3555_v56, 16  ;;  %v3783_v4 = vld [vmem:[%s7259_s17 + $0x20] sm:$0xe] }
  0xbf   : > { %v5591_v46 = vcombine.low %v7347_v16, %v3810_v36  ;;  %v3587_v52 = vrot.slane %v3586_v14, 4  ;;  %v3596_v34 = vrot.slane %v3594_v63, 4  ;;  %v3599_v40 = vrot.slane %v3597_v30, 5  ;;  %v3562_v60 = vld [vmem:[%s7259_s17 + $0x34] sm:$0x1] }
  0xc0   : > { %6053 = vmatmul.mubr.msk.bf16.vlgmr.msra.gmra.mxu0 %vm554_vm3, %v6239_v3  ;;  %v3611_v8 = vshll.u32 %v3555_v56, 16  ;;  %v3578_v58 = vsel %vm6502_vm4, %v3573_v25, %v3577_v7  ;;  %v3605_v53 = vrot.slane %v3603_v0, 5  ;;  %v3610_v42 = vrot.slane %v3608_v15, 4  ;;  %v3563_v56 = vld [vmem:[%s7259_s17 + $0x38] sm:$0xf] }
  0xc1   : > { %6071 = vmatpush3.bf16.msra.mxu0 %v3862_v50  ;;  %6056 = vmatprep.mubr.msk.bf16.mxu0 %vm554_vm3, %v6240_v27  ;;  %v3617_v31 = vshll.u32 %v3556_v43, 16  ;;  %v3592_v19 = vsel %vm6502_vm4, %v3587_v52, %v3591_v12  ;;  %v3600_v47 = vor.u32 %v3599_v40, %v3596_v34  ;;  %v5584_v61 = vrot.slane %v3781_v59, 9  ;;  %v3784_v50 = vld [vmem:[%s7259_s17 + $0x28] sm:$0xe]  ;;  %v3785_v40 = vld [vmem:[%s7259_s17 + $0x30] sm:$0xe] }
  0xc2   : > { %6165 = vmatprep.subr.msk.bf16.mxu0 %vm567_vm0, %v5632_v26  ;;  %v3613_v29 = vrot.slane %v3611_v8, 5  ;;  %v5574_v39 = vcombine.low %v3578_v58, %v3592_v19  ;;  %v3813_v38 = vrot.slane %v3554_v51, 5  ;;  %v5585_v45 = vrot.slane %v3782_v57, 9 }
  0xc3   : > { %6047 = vmatmul.mubr.msk.bf16.gmra.mxu1 %vm554_vm3, %v5559_v18  ;;  %v3619_v35 = vrot.slane %v3617_v31, 5  ;;  %v3601_v1 = vrot.slane %v3600_v47, 4  ;;  %v3817_v54 = vrot.slane %v3556_v43, 5  ;;  %v3981_v3 = vsel %vm567_vm0, %v5607_v11, 0  ;;  %v3561_v18 = vld [vmem:[%s7259_s17 + $0x30] sm:$0xf] }
  0xc4   : > { %v3614_v28 = vor.u32 %v3613_v29, %v3610_v42  ;;  %6062 = vmatprep.mubr.msk.bf16.mxu1 %vm554_vm3, %v5574_v39  ;;  %v3814_v6 = vsel %vm6568_vm7, %v5584_v61, %v3813_v38  ;;  %v4211_v32 = vsel %vm567_vm0, %v5632_v26, 0  ;;  %v3622_v23 = vshrl.u32 %v3557_v10, 16  ;;  %v3564_v26 = vld [vmem:[%s7259_s17 + $0x3c] sm:$0x1]  ;;  %v3786_v42 = vld [vmem:[%s7259_s17 + $0x38] sm:$0xe] }
  0xc5   : > { %v3625_v27 = vshll.u32 %v3557_v10, 16  ;;  %v3606_v21 = vsel %vm6502_vm4, %v3601_v1, %v3605_v53  ;;  %v3818_v48 = vsel %vm6568_vm7, %v5585_v45, %v3817_v54  ;;  %v3631_v24 = vshll.u32 %v3558_v5, 16  ;;  %v5616_v31 = vld [vmem:[%s7259_s17 + $0x8] sm:$0xf]  ;;  %v7404_v61 = vld [vmem:[%s7259_s17 + $0xc] sm:$0x1] }
  0xc6   : > { %v3615_v41 = vrot.slane %v3614_v28, 4  ;;  %v5592_v62 = vcombine.low %v3814_v6, %v3818_v48  ;;  %v3624_v44 = vrot.slane %v3622_v23, 4  ;;  %v3636_v11 = vshrl.u32 %v3559_v17, 16  ;;  %v7409_v10 = vld [vmem:[%s7845_s3 + $0x2e] sm:$0x3] }
  0xc7   : > { %v3627_v20 = vrot.slane %v3625_v27, 5  ;;  %v3633_v13 = vrot.slane %v3631_v24, 5  ;;  %v3639_v37 = vshll.u32 %v3559_v17, 16  ;;  %v3645_v22 = vshll.u32 %v3560_v33, 16  ;;  %v5618_v23 = vld [vmem:[%s7259_s17 + $0x10] sm:$0xf] }
  0xc8   : > { %6057 = vmatmul.mubr.msk.bf16.gmra.mxu0 %vm554_vm3, %v6241_v2  ;;  %v3620_v9 = vsel %vm6502_vm4, %v3615_v41, %v3619_v35  ;;  %v3638_v16 = vrot.slane %v3636_v11, 4  ;;  %v5586_v51 = vrot.slane %v3783_v4, 9  ;;  %v3821_v43 = vrot.slane %v3558_v5, 5  ;;  %v5620_v24 = vld [vmem:[%s7259_s17 + $0x18] sm:$0xf] }
  0xc9   : > { %6072 = vmatprep.mubr.msk.bf16.mxu0 %vm554_vm3, %v5591_v46  ;;  %v5575_v7 = vcombine.low %v3606_v21, %v3620_v9  ;;  %v3628_v12 = vor.u32 %v3627_v20, %v3624_v44  ;;  %v3641_v14 = vrot.slane %v3639_v37, 5  ;;  %v3647_v36 = vrot.slane %v3645_v22, 5  ;;  %v7423_v21 = vld [vmem:[%s7259_s17 + $0x14] sm:$0x1]  ;;  %v7431_v20 = vld [vmem:[%s7259_s17 + $0x1c] sm:$0x1] }
  0xca   : > { %v5587_v63 = vrot.slane %v3784_v50, 9  ;;  %v3825_v59 = vrot.slane %v3560_v33, 5  ;;  %v3650_v25 = vshrl.u32 %v3561_v18, 16  ;;  %v3653_v46 = vshll.u32 %v3561_v18, 16  ;;  %v5622_v37 = vld [vmem:[%s7259_s17 + $0x20] sm:$0xf] }
  0xcb   : > { %6063 = vmatmul.mubr.msk.bf16.vlgmr.msra.gmra.mxu1 %vm554_vm3, %v5575_v7  ;;  %v3629_v30 = vrot.slane %v3628_v12, 4  ;;  %v3642_v0 = vor.u32 %v3641_v14, %v3638_v16  ;;  %v3822_v15 = vsel %vm6568_vm7, %v5586_v51, %v3821_v43  ;;  %v3659_v52 = vshll.u32 %v3562_v60, 16  ;;  %v7435_v22 = vld [vmem:[%s7259_s17 + $0x24] sm:$0x1] }
  0xcc   : > { %6081 = vmatpush3.bf16.msra.mxu1 %v3981_v3  ;;  %v3664_v34 = vshrl.u32 %v3563_v56, 16  ;;  %v3826_v57 = vsel %vm6568_vm7, %v5587_v63, %v3825_v59  ;;  %v3652_v58 = vrot.slane %v3650_v25, 4  ;;  %v3655_v53 = vrot.slane %v3653_v46, 5 }
  0xcd   : > { %v3634_v8 = vsel %vm6502_vm4, %v3629_v30, %v3633_v13  ;;  %v3643_v2 = vrot.slane %v3642_v0, 4  ;;  %v5593_v19 = vcombine.low %v3822_v15, %v3826_v57  ;;  %v3661_v47 = vrot.slane %v3659_v52, 5  ;;  %6166 = vmatprep.subr.msk.bf16.mxu1 %vm567_vm0, %v7409_v10  ;;  %v6242_v30 = vld [vmem:[%s7259_s17 + $0x8] ss:$8 sps:$4 sm:$0xff]  }
  0xce   : > { %v3666_v29 = vrot.slane %v3664_v34, 4  ;;  %v3656_v39 = vor.u32 %v3655_v53, %v3652_v58  ;;  %v3667_v35 = vshll.u32 %v3563_v56, 16  ;;  %v3673_v38 = vshll.u32 %v3564_v26, 16  ;;  %v5624_v34 = vld [vmem:[%s7259_s17 + $0x28] sm:$0xf] }
  0xcf   : > { %v5588_v45 = vrot.slane %v3785_v40, 9  ;;  %v3648_v5 = vsel %vm6502_vm4, %v3643_v2, %v3647_v36  ;;  %v3829_v1 = vrot.slane %v3562_v60, 5  ;;  %v5589_v28 = vrot.slane %v3786_v42, 9  ;;  %v5674_v60 = vld [vmem:[%s7845_s3 + $0x30] sm:$0x3] }
  0xd0   : > { %6073 = vmatmul.mubr.msk.bf16.vlgmr.msra.gmra.mxu0 %vm554_vm3, %v5592_v62  ;;  %v3833_v54 = vrot.slane %v3564_v26, 5  ;;  %v5576_v3 = vcombine.low %v3634_v8, %v3648_v5  ;;  %v3657_v17 = vrot.slane %v3656_v39, 4  ;;  %v3669_v6 = vrot.slane %v3667_v35, 5  ;;  %v7450_v53 = vld [vmem:[%s7259_s17 + $0x2c] sm:$0x1] }
  0xd1   : > { %6091 = vmatpush3.bf16.msra.mxu0 %v4211_v32  ;;  %6076 = vmatprep.mubr.msk.bf16.mxu0 %vm554_vm3, %v5593_v19  ;;  %v3675_v33 = vrot.slane %v3673_v38, 5  ;;  %v3830_v27 = vsel %vm6568_vm7, %v5588_v45, %v3829_v1  ;;  %v4073_v41 = vshrl.u32 %v5616_v31, 16  ;;  %v4076_v48 = vshll.u32 %v5616_v31, 16  ;;  %v6243_v5 = vld [vmem:[%s7259_s17 + $0x18] ss:$8 sps:$4 sm:$0xff]  }
  0xd2   : > { %v3834_v32 = vsel %vm6568_vm7, %v5589_v28, %v3833_v54  ;;  %6066 = vmatprep.mubr.msk.bf16.mxu1 %vm554_vm3, %v5576_v3  ;;  %v3662_v4 = vsel %vm6502_vm4, %v3657_v17, %v3661_v47  ;;  %v3670_v50 = vor.u32 %v3669_v6, %v3666_v29  ;;  %v4082_v44 = vshll.u32 %v7404_v61, 16  ;;  %6167 = vmatprep.subr.msk.bf16.mxu0 %vm567_vm0, %v5674_v60  ;;  %v5626_v47 = vld [vmem:[%s7259_s17 + $0x30] sm:$0xf]  ;;  %v7464_v28 = vld [vmem:[%s7259_s17 + $0x34] sm:$0x1] }
  0xd3   : > { %v5594_v62 = vcombine.low %v3830_v27, %v3834_v32  ;;  %v4075_v11 = vrot.slane %v4073_v41, 4  ;;  %v4078_v18 = vrot.slane %v4076_v48, 5  ;;  %v4087_v9 = vshrl.u32 %v5618_v23, 16  ;;  %v6244_v6 = vld [vmem:[%s7259_s17 + $0x28] ss:$8 sps:$4 sm:$0xff]  }
  0xd4   : > { %v4090_v13 = vshll.u32 %v5618_v23, 16  ;;  %v3671_v7 = vrot.slane %v3670_v50, 4  ;;  %v4084_v12 = vrot.slane %v4082_v44, 5  ;;  %v4096_v16 = vshll.u32 %v7423_v21, 16  ;;  %v5628_v27 = vld [vmem:[%s7259_s17 + $0x38] sm:$0xf] }
  0xd5   : > { %v4101_v51 = vshrl.u32 %v5620_v24, 16  ;;  %v4079_v56 = vor.u32 %v4078_v18, %v4075_v11  ;;  %v4089_v14 = vrot.slane %v4087_v9, 4  ;;  %v4104_v43 = vshll.u32 %v5620_v24, 16  ;;  %v7470_v32 = vld [vmem:[%s7259_s17 + $0x3c] sm:$0x1] }
  0xd6   : > { %v4092_v36 = vrot.slane %v4090_v13, 5  ;;  %v3676_v63 = vsel %vm6502_vm4, %v3671_v7, %v3675_v33  ;;  %v4098_v59 = vrot.slane %v4096_v16, 5  ;;  %v4110_v46 = vshll.u32 %v7431_v20, 16  ;;  %v5630_v50 = vld [vmem:[%s7259_s17 + $0x40] sm:$0xf] }
  0xd7   : > { %v4103_v25 = vrot.slane %v4101_v51, 4  ;;  %v5577_v0 = vcombine.low %v3662_v4, %v3676_v63  ;;  %v4080_v15 = vrot.slane %v4079_v56, 4  ;;  %v4106_v52 = vrot.slane %v4104_v43, 5  ;;  %v7478_v9 = vld [vmem:[%s7259_s17 + $0x44] sm:$0x1] }
  0xd8   : > { %6077 = vmatmul.mubr.msk.bf16.gmra.mxu0 %vm554_vm3, %v5594_v62  ;;  %v4093_v26 = vor.u32 %v4092_v36, %v4089_v14  ;;  %v4112_v40 = vrot.slane %v4110_v46, 5  ;;  %v4115_v8 = vshrl.u32 %v5622_v37, 16  ;;  %v4118_v57 = vshll.u32 %v5622_v37, 16  ;;  %v5642_v36 = vld [vmem:[%s7259_s17 + $0x10] sm:$0xe] }
  0xd9   : > { %v4124_v58 = vshll.u32 %v7435_v22, 16  ;;  %6067 = vmatmul.mubr.msk.bf16.gmra.mxu1 %vm554_vm3, %v5577_v0  ;;  %v4085_v42 = vsel %vm6502_vm4, %v4080_v15, %v4084_v12  ;;  %v4107_v2 = vor.u32 %v4106_v52, %v4103_v25  ;;  %v4369_v19 = vsel %vm567_vm0, %v7409_v10, 0  ;;  %v5641_v12 = vld [vmem:[%s7259_s17 + $0x8] sm:$0xe] }
  0xda   : > { %v4094_v31 = vrot.slane %v4093_v26, 4  ;;  %6082 = vmatprep.mubr.msk.bf16.mxu1 %vm554_vm3, %v6242_v30  ;;  %v4117_v29 = vrot.slane %v4115_v8, 4  ;;  %v4120_v39 = vrot.slane %v4118_v57, 5  ;;  %v4488_v38 = vsel %vm567_vm0, %v5674_v60, 0  ;;  %v5699_v57 = vld [vmem:[%s7845_s3 + $0x32] sm:$0x3] }
  0xdb   : > { %v4126_v35 = vrot.slane %v4124_v58, 5  ;;  %v4108_v1 = vrot.slane %v4107_v2, 4  ;;  %v4129_v54 = vshrl.u32 %v5624_v34, 16  ;;  %v4132_v10 = vshll.u32 %v5624_v34, 16  ;;  %v6245_v34 = vld [vmem:[%s7259_s17 + $0x38] ss:$8 sps:$4 sm:$0xff]  }
  0xdc   : > { %v4099_v45 = vsel %vm6502_vm4, %v4094_v31, %v4098_v59  ;;  %v4121_v17 = vor.u32 %v4120_v39, %v4117_v29  ;;  %v4138_v33 = vshll.u32 %v7450_v53, 16  ;;  %v4143_v23 = vshrl.u32 %v5626_v47, 16 }
  0xdd   : > { %v5633_v3 = vcombine.low %v4085_v42, %v4099_v45  ;;  %v4113_v41 = vsel %vm6502_vm4, %v4108_v1, %v4112_v40  ;;  %v4131_v48 = vrot.slane %v4129_v54, 4  ;;  %v4134_v24 = vrot.slane %v4132_v10, 5 }
  0xde   : > { %v4146_v4 = vshll.u32 %v5626_v47, 16  ;;  %v4122_v62 = vrot.slane %v4121_v17, 4  ;;  %v4140_v44 = vrot.slane %v4138_v33, 5  ;;  %v4145_v11 = vrot.slane %v4143_v23, 4  ;;  %v5724_v23 = vld [vmem:[%s7845_s3 + $0x34] sm:$0x3] }
  0xdf   : > { %6092 = vmatprep.mubr.msk.bf16.mxu0 %vm554_vm3, %v5633_v3  ;;  %v4152_v18 = vshll.u32 %v7464_v28, 16  ;;  %v4135_v13 = vor.u32 %v4134_v24, %v4131_v48  ;;  %v4157_v60 = vshrl.u32 %v5628_v27, 16  ;;  %v4160_v7 = vshll.u32 %v5628_v27, 16  ;;  %v5645_v27 = vld [vmem:[%s7259_s17 + $0x28] sm:$0xe] }
  0xe0   : > { %v4148_v37 = vrot.slane %v4146_v4, 5  ;;  %v4127_v16 = vsel %vm6502_vm4, %v4122_v62, %v4126_v35  ;;  %v4166_v56 = vshll.u32 %v7470_v32, 16  ;;  %v4171_v14 = vshrl.u32 %v5630_v50, 16  ;;  %v5644_v35 = vld [vmem:[%s7259_s17 + $0x20] sm:$0xe] }
  0xe1   : > { %v4154_v51 = vrot.slane %v4152_v18, 5  ;;  %6083 = vmatmul.mubr.msk.bf16.vlgmr.msra.gmra.mxu1 %vm554_vm3, %v6243_v5  ;;  %v5634_v43 = vcombine.low %v4113_v41, %v4127_v16  ;;  %v4136_v63 = vrot.slane %v4135_v13, 4  ;;  %v4159_v59 = vrot.slane %v4157_v60, 4  ;;  %v6246_v24 = vld [vmem:[%s7259_s17 + $0x10] ss:$8 sps:$4 sm:$0xff]  }
  0xe2   : > { %v4149_v30 = vor.u32 %v4148_v37, %v4145_v11  ;;  %6101 = vmatpush3.bf16.msra.mxu1 %v4369_v19  ;;  %6086 = vmatprep.mubr.msk.bf16.mxu1 %vm554_vm3, %v6244_v6  ;;  %v4162_v25 = vrot.slane %v4160_v7, 5  ;;  %v4168_v46 = vrot.slane %v4166_v56, 5  ;;  %v4173_v0 = vrot.slane %v4171_v14, 4  ;;  %v5643_v19 = vld [vmem:[%s7259_s17 + $0x18] sm:$0xe] }
  0xe3   : > { %v4174_v15 = vshll.u32 %v5630_v50, 16  ;;  %6093 = vmatmul.mubr.msk.bf16.vlgmr.msra.gmra.mxu0 %vm554_vm3, %v5634_v43  ;;  %v4141_v26 = vsel %vm6502_vm4, %v4136_v63, %v4140_v44  ;;  %v4180_v40 = vshll.u32 %v7478_v9, 16  ;;  %v5649_v8 = vrot.slane %v5641_v12, 9  ;;  %6168 = vmatprep.subr.msk.bf16.mxu1 %vm567_vm0, %v5699_v57  ;;  %v5647_v18 = vld [vmem:[%s7259_s17 + $0x38] sm:$0xe] }
  0xe4   : > { %v4150_v52 = vrot.slane %v4149_v30, 4  ;;  %6111 = vmatpush3.bf16.msra.mxu0 %v4488_v38  ;;  %v4163_v58 = vor.u32 %v4162_v25, %v4159_v59  ;;  %v4312_v31 = vrot.slane %v7404_v61, 5  ;;  %v5650_v2 = vrot.slane %v5642_v36, 9  ;;  %v5648_v13 = vld [vmem:[%s7259_s17 + $0x40] sm:$0xe] }
  0xe5   : > { %v4176_v42 = vrot.slane %v4174_v15, 5  ;;  %v4182_v29 = vrot.slane %v4180_v40, 5  ;;  %v4316_v39 = vrot.slane %v7423_v21, 5  ;;  %v5651_v45 = vrot.slane %v5643_v19, 9  ;;  %6169 = vmatprep.subr.msk.bf16.mxu0 %vm567_vm0, %v5724_v23  ;;  %v5683_v14 = vld [vmem:[%s7259_s17 + $0x10] sm:$0xf] }
  0xe6   : > { %v4155_v47 = vsel %vm6502_vm4, %v4150_v52, %v4154_v51  ;;  %v4164_v1 = vrot.slane %v4163_v58, 4  ;;  %v4313_v61 = vsel %vm6568_vm7, %v5649_v8, %v4312_v31  ;;  %v4320_v10 = vrot.slane %v7431_v20, 5  ;;  %v5684_v63 = vld [vmem:[%s7259_s17 + $0x14] sm:$0x1]  ;;  %v5685_v30 = vld [vmem:[%s7259_s17 + $0x18] sm:$0xf] }
  0xe7   : > { %v5635_v5 = vcombine.low %v4141_v26, %v4155_v47  ;;  %v4177_v38 = vor.u32 %v4176_v42, %v4173_v0  ;;  %v4317_v54 = vsel %vm6568_vm7, %v5650_v2, %v4316_v39  ;;  %v5652_v3 = vrot.slane %v5644_v35, 9  ;;  %v5686_v59 = vld [vmem:[%s7259_s17 + $0x1c] sm:$0x1]  ;;  %v6247_v25 = vld [vmem:[%s7259_s17 + $0x20] ss:$8 sps:$4 sm:$0xff]  }
  0xe8   : > { %v4324_v17 = vrot.slane %v7435_v22, 5  ;;  %v4169_v21 = vsel %vm6502_vm4, %v4164_v1, %v4168_v46  ;;  %v5658_v33 = vcombine.low %v4313_v61, %v4317_v54  ;;  %v4321_v20 = vsel %vm6568_vm7, %v5651_v45, %v4320_v10  ;;  %v5646_v22 = vld [vmem:[%s7259_s17 + $0x30] sm:$0xe]  ;;  %v5709_v42 = vld [vmem:[%s7259_s17 + $0x18] sm:$0xe] }
  0xe9   : > { %6096 = vmatprep.mubr.msk.bf16.mxu0 %vm554_vm3, %v5635_v5  ;;  %v4178_v6 = vrot.slane %v4177_v38, 4  ;;  %6087 = vmatmul.mubr.msk.bf16.gmra.mxu1 %vm554_vm3, %v6245_v34  ;;  %v5653_v41 = vrot.slane %v5645_v27, 9  ;;  %v4328_v50 = vrot.slane %v7450_v53, 5  ;;  %v5654_v62 = vrot.slane %v5646_v22, 9  ;;  %v5708_v34 = vld [vmem:[%s7259_s17 + $0x10] sm:$0xe] }
  0xea   : > { %6102 = vmatprep.mubr.msk.bf16.mxu1 %vm554_vm3, %v5658_v33  ;;  %v4325_v4 = vsel %vm6568_vm7, %v5652_v3, %v4324_v17  ;;  %v4332_v11 = vrot.slane %v7464_v28, 5  ;;  %v4336_v37 = vrot.slane %v7470_v32, 5  ;;  %v5655_v7 = vrot.slane %v5647_v18, 9  ;;  %v6248_v40 = vld [vmem:[%s7259_s17 + $0x30] ss:$8 sps:$4 sm:$0xff]  }
  0xeb   : > { %v4183_v48 = vsel %vm6502_vm4, %v4178_v6, %v4182_v29  ;;  %v4329_v60 = vsel %vm6568_vm7, %v5653_v41, %v4328_v50  ;;  %v5656_v12 = vrot.slane %v5648_v13, 9  ;;  %v4340_v53 = vrot.slane %v7478_v9, 5  ;;  %v5687_v35 = vld [vmem:[%s7259_s17 + $0x20] sm:$0xf]  ;;  %v5688_v54 = vld [vmem:[%s7259_s17 + $0x24] sm:$0x1] }
  0xec   : > { %v5636_v44 = vcombine.low %v4169_v21, %v4183_v48  ;;  %v5659_v16 = vcombine.low %v4321_v20, %v4325_v4  ;;  %v4718_v28 = vsel %vm567_vm0, %v5699_v57, 0  ;;  %v4876_v51 = vsel %vm567_vm0, %v5724_v23, 0  ;;  %v5689_v6 = vld [vmem:[%s7259_s17 + $0x28] sm:$0xf]  ;;  %v5690_v20 = vld [vmem:[%s7259_s17 + $0x2c] sm:$0x1] }
  0xed   : > { %v4333_v32 = vsel %vm6568_vm7, %v5654_v62, %v4332_v11  ;;  %v7545_v9 = vsel %vm6568_vm7, %v5655_v7, %v4336_v37  ;;  %v7549_v43 = vsel %vm6568_vm7, %v5656_v12, %v4340_v53  ;;  %v4580_v15 = vshrl.u32 %v5683_v14, 16  ;;  %v5710_v11 = vld [vmem:[%s7259_s17 + $0x20] sm:$0xe]  ;;  %v5711_v12 = vld [vmem:[%s7259_s17 + $0x28] sm:$0xe] }
  0xee   : > { %6097 = vmatmul.mubr.msk.bf16.gmra.mxu0 %vm554_vm3, %v5636_v44  ;;  %v7539_v56 = vpop.f32.mrf.mxu0  ;;  %v5660_v36 = vcombine.low %v4329_v60, %v4333_v32  ;;  %v5661_v46 = vcombine.low %v7545_v9, %v7549_v43  ;;  %v4583_v26 = vshll.u32 %v5683_v14, 16  ;;  %v4589_v52 = vshll.u32 %v5684_v63, 16  ;;  %v5691_v14 = vld [vmem:[%s7259_s17 + $0x30] sm:$0xf] }
  0xef   : > { %6112 = vmatprep.mubr.msk.bf16.mxu0 %vm554_vm3, %v6246_v24  ;;  %v4594_v8 = vshrl.u32 %v5685_v30, 16  ;;  %v4597_v57 = vshll.u32 %v5685_v30, 16  ;;  %v4603_v58 = vshll.u32 %v5686_v59, 16  ;;  %v5716_v31 = vrot.slane %v5708_v34, 9 }
  0xf0   : > { %v7557_v0 = vpop.f32.mrf.mxu0  ;;  %v4582_v19 = vrot.slane %v4580_v15, 4  ;;  %v4585_v47 = vrot.slane %v4583_v26, 5  ;;  %v4591_v29 = vrot.slane %v4589_v52, 5  ;;  %v4819_v39 = vrot.slane %v5684_v63, 5  ;;  %v5692_v15 = vld [vmem:[%s7259_s17 + $0x34] sm:$0x1] }
  0xf1   : > { %6103 = vmatmul.mubr.msk.bf16.vlgmr.msra.gmra.mxu1 %vm554_vm3, %v5659_v16  ;;  %v4596_v5 = vrot.slane %v4594_v8, 4  ;;  %v4599_v1 = vrot.slane %v4597_v57, 5  ;;  %v4605_v38 = vrot.slane %v4603_v58, 5  ;;  %v5717_v61 = vrot.slane %v5709_v42, 9  ;;  %v6249_v26 = vld [vmem:[%s7259_s17 + $0x40] ss:$8 sps:$4 sm:$0xff]  }
  0xf2   : > { %v7563_v2 = vpop.f32.mrf.mxu0  ;;  %6121 = vmatpush3.bf16.msra.mxu1 %v4718_v28  ;;  %6106 = vmatprep.mubr.msk.bf16.mxu1 %vm554_vm3, %v5660_v36  ;;  %v4586_v3 = vor.u32 %v4585_v47, %v4582_v19  ;;  %v7574_v17 = vsel %vm6568_vm7, %v5716_v31, %v4819_v39  ;;  %v4823_v21 = vrot.slane %v5686_v59, 5  ;;  %v4608_v33 = vshrl.u32 %v5687_v35, 16  ;;  %v5693_v58 = vld [vmem:[%s7259_s17 + $0x38] sm:$0xf] }
  0xf3   : > { %v7567_v45 = vpop.f32.mrf.mxu1  ;;  %v4600_v27 = vor.u32 %v4599_v1, %v4596_v5  ;;  %v4611_v22 = vshll.u32 %v5687_v35, 16  ;;  %v4617_v41 = vshll.u32 %v5688_v54, 16  ;;  %v4622_v48 = vshrl.u32 %v5689_v6, 16 }
  0xf4   : > { %v7570_v10 = vpop.f32.mrf.mxu0  ;;  %v4587_v24 = vrot.slane %v4586_v3, 4  ;;  %v4824_v4 = vsel %vm6568_vm7, %v5717_v61, %v4823_v21  ;;  %v4610_v62 = vrot.slane %v4608_v33, 4  ;;  %v4625_v44 = vshll.u32 %v5689_v6, 16  ;;  %v5694_v61 = vld [vmem:[%s7259_s17 + $0x3c] sm:$0x1] }
  0xf5   : > { %v7577_v23 = vpop.f32.mrf.mxu1  ;;  %v4601_v13 = vrot.slane %v4600_v27, 4  ;;  %v5725_v37 = vcombine.low %v7574_v17, %v4824_v4  ;;  %v4613_v60 = vrot.slane %v4611_v22, 5  ;;  %v4619_v7 = vrot.slane %v4617_v41, 5  ;;  %v5712_v33 = vld [vmem:[%s7259_s17 + $0x30] sm:$0xe] }
  0xf6   : > { %6113 = vmatmul.mubr.msk.bf16.vlgmr.msra.gmra.mxu0 %vm554_vm3, %v6247_v25  ;;  %v5894_v50 = vpop.f32.mrf.mxu0  ;;  %v4592_v53 = vsel %vm6502_vm4, %v4587_v24, %v4591_v29  ;;  %v4624_v16 = vrot.slane %v4622_v48, 4  ;;  %v4627_v28 = vrot.slane %v4625_v44, 5  ;;  %v4631_v32 = vshll.u32 %v5690_v20, 16  ;;  %v5713_v27 = vld [vmem:[%s7259_s17 + $0x38] sm:$0xe] }
  0xf7   : > { %6131 = vmatpush3.bf16.msra.mxu0 %v4876_v51  ;;  %6116 = vmatprep.mubr.msk.bf16.mxu0 %vm554_vm3, %v6248_v40  ;;  %v7585_v18 = vpop.f32.mrf.mxu1  ;;  %v4606_v63 = vsel %vm6502_vm4, %v4601_v13, %v4605_v38  ;;  %v4614_v30 = vor.u32 %v4613_v60, %v4610_v62  ;;  %v5718_v59 = vrot.slane %v5710_v11, 9  ;;  %v4827_v25 = vrot.slane %v5688_v54, 5  ;;  %v5695_v13 = vld [vmem:[%s7259_s17 + $0x40] sm:$0xf] }
  0xf8   : > { %v858_v51 = vpop.f32.mrf.mxu0  ;;  %v5700_v52 = vcombine.low %v4592_v53, %v4606_v63  ;;  %v4628_v34 = vor.u32 %v4627_v28, %v4624_v16  ;;  %v4633_v40 = vrot.slane %v4631_v32, 5  ;;  %v5719_v8 = vrot.slane %v5711_v12, 9 }
  0xf9   : > { %v7592_v36 = vpop.f32.mrf.mxu1  ;;  %6107 = vmatmul.mubr.msk.bf16.gmra.mxu1 %vm554_vm3, %v5661_v46  ;;  %v4615_v31 = vrot.slane %v4614_v30, 4  ;;  %v7605_v19 = vsel %vm6568_vm7, %v5718_v59, %v4827_v25  ;;  %v4831_v47 = vrot.slane %v5690_v20, 5  ;;  %v4636_v29 = vshrl.u32 %v5691_v14, 16 }
  0xfa   : > { %v5895_v57 = vpop.f32.mrf.mxu0  ;;  %6122 = vmatprep.mubr.msk.bf16.mxu1 %vm554_vm3, %v5700_v52  ;;  %v4629_v43 = vrot.slane %v4628_v34, 4  ;;  %v4639_v39 = vshll.u32 %v5691_v14, 16  ;;  %v4645_v35 = vshll.u32 %v5692_v15, 16  ;;  %v4650_v3 = vshrl.u32 %v5693_v58, 16 }
  0xfb   : > { %v5884_v42 = vpop.f32.mrf.mxu1  ;;  %v4620_v5 = vsel %vm6502_vm4, %v4615_v31, %v4619_v7  ;;  %v4832_v1 = vsel %vm6568_vm7, %v5719_v8, %v4831_v47  ;;  %v4638_v54 = vrot.slane %v4636_v29, 4  ;;  %v4653_v44 = vshll.u32 %v5693_v58, 16  ;;  %v5698_v8 = vld [vmem:[%s7259_s17 + $0x4c] sm:$0x1]  ;;  %v5714_v47 = vld [vmem:[%s7259_s17 + $0x40] sm:$0xe] }
  0xfc   : > { %v714_v9 = vadd.f32 %v5884_v42, %v7539_v56  ;;  %v861_v46 = vpop.f32.mrf.mxu0  ;;  %v4634_v56 = vsel %vm6502_vm4, %v4629_v43, %v4633_v40  ;;  %v5726_v21 = vcombine.low %v7605_v19, %v4832_v1  ;;  %v4641_v48 = vrot.slane %v4639_v39, 5  ;;  %v5697_v40 = vld [vmem:[%s7259_s17 + $0x48] sm:$0xf] }
  0xfd   : > { %v705_v38 = vpop.f32.mrf.mxu1  ;;  %v5701_v22 = vcombine.low %v4620_v5, %v4634_v56  ;;  %v4647_v24 = vrot.slane %v4645_v35, 5  ;;  %v4652_v4 = vrot.slane %v4650_v3, 4  ;;  %v4659_v11 = vshll.u32 %v5694_v61, 16 }
  0xfe   : > { %6117 = vmatmul.mubr.msk.bf16.gmra.mxu0 %vm554_vm3, %v6249_v26  ;;  %v7615_v17 = vadd.f32 %v5894_v50, %v714_v9  ;;  %v706_v6 = vadd.f32 %v705_v38, %v7557_v0  ;;  %v5898_v20 = vpop.f32.mrf.mxu0  ;;  %v4642_v7 = vor.u32 %v4641_v48, %v4638_v54  ;;  %v5720_v12 = vrot.slane %v5712_v33, 9 }
  0xff   : > { %6132 = vmatprep.mubr.msk.bf16.mxu0 %vm554_vm3, %v5725_v37  ;;  %v5885_v41 = vpop.f32.mrf.mxu1  ;;  %v4835_v53 = vrot.slane %v5692_v15, 5  ;;  %v5721_v37 = vrot.slane %v5713_v27, 9  ;;  %v4655_v32 = vrot.slane %v4653_v44, 5  ;;  %v4839_v59 = vrot.slane %v5694_v61, 5  ;;  %v5715_v61 = vld [vmem:[%s7259_s17 + $0x48] sm:$0xe] }
 0x100   : > { %v7624_v50 = vadd.f32 %v858_v51, %v706_v6  ;;  %v717_v62 = vadd.f32 %v5885_v41, %v7563_v2  ;;  %v7628_v60 = vpop.f32.mrf.mxu0  ;;  %v4661_v2 = vrot.slane %v4659_v11, 5  ;;  %v5696_v51 = vld [vmem:[%s7259_s17 + $0x44] sm:$0x1]  ;;  %v4643_v63 = vrot.slane %v4642_v7, 4  ;;  %s5222_s17 = sshll.u32 %s7880_s21, 3 }
 0x101   : > { %v708_v0 = vpop.f32.mrf.mxu1  ;;  %6123 = vmatmul.mubr.msk.bf16.vlgmr.msra.gmra.mxu1 %vm554_vm3, %v5701_v22  ;;  %v4836_v30 = vsel %vm6568_vm7, %v5720_v12, %v4835_v53  ;;  %v4664_v15 = vshrl.u32 %v5695_v13, 16  ;;  %v4656_v52 = vor.u32 %v4655_v32, %v4652_v4  ;;  %v4840_v42 = vsel %vm6568_vm7, %v5721_v37, %v4839_v59  ;;  %s390_s19 = sadd.s32 %s5223_s18, %s5222_s17 }
 0x102   : > { %v7631_v16 = vadd.f32 %v5895_v57, %v717_v62  ;;  %v709_v28 = vadd.f32 %v708_v0, %v7570_v10  ;;  %v5899_v14 = vpop.f32.mrf.mxu0  ;;  %v4667_v10 = vshll.u32 %v5695_v13, 16  ;;  %v4648_v58 = vsel %vm6502_vm4, %v4643_v63, %v4647_v24  ;;  %s5224_s20 = sshll.u32 %s390_s19, 3 }
 0x103   : > { %v5888_v25 = vpop.f32.mrf.mxu1  ;;  %v4666_v31 = vrot.slane %v4664_v15, 4  ;;  %v4673_v19 = vshll.u32 %v5696_v51, 16  ;;  %v4657_v9 = vrot.slane %v4656_v52, 4  ;;  %v5727_v43 = vcombine.low %v4836_v30, %v4840_v42  ;;  %s7795_s29 = scalar_lea.vmem %s7846_s4, %s5224_s20 }
 0x104   : > { %v7637_v26 = vadd.f32 %v861_v46, %v709_v28  ;;  %v730_v34 = vadd.f32 %v5888_v25, %v7567_v45  ;;  %v877_v57 = vpop.f32.mrf.mxu0  ;;  %v4669_v46 = vrot.slane %v4667_v10, 5  ;;  %v4678_v5 = vshrl.u32 %v5697_v40, 16 }
 0x105   : > { %v721_v29 = vpop.f32.mrf.mxu1  ;;  %v4675_v35 = vrot.slane %v4673_v19, 5  ;;  %v4681_v1 = vshll.u32 %v5697_v40, 16  ;;  %v4687_v38 = vshll.u32 %v5698_v8, 16  ;;  %v4662_v3 = vsel %vm6502_vm4, %v4657_v9, %v4661_v2 }
 0x106   : > { %6133 = vmatmul.mubr.msk.bf16.vlgmr.msra.gmra.mxu0 %vm554_vm3, %v5726_v21  ;;  %v895_v45 = vadd.f32 %v5898_v20, %v730_v34  ;;  %v5914_v39 = vpop.f32.mrf.mxu0  ;;  %v4670_v56 = vor.u32 %v4669_v46, %v4666_v31  ;;  %v5722_v6 = vrot.slane %v5714_v47, 9  ;;  %v4843_v33 = vrot.slane %v5696_v51, 5 }
 0x107   : > { %v5889_v54 = vpop.f32.mrf.mxu1  ;;  %6136 = vmatprep.mubr.msk.bf16.mxu0 %vm554_vm3, %v5727_v43  ;;  %v5702_v27 = vcombine.low %v4648_v58, %v4662_v3  ;;  %v4680_v22 = vrot.slane %v4678_v5, 4  ;;  %v4683_v20 = vrot.slane %v4681_v1, 5  ;;  %v4689_v41 = vrot.slane %v4687_v38, 5 }
 0x108   : > { %v1207_v21 = vpop.f32.mrf.mxu0  ;;  %v4671_v24 = vrot.slane %v4670_v56, 4  ;;  %v4844_v4 = vsel %vm6568_vm7, %v5722_v6, %v4843_v33  ;;  %v5723_v62 = vrot.slane %v5715_v61, 9  ;;  %v4847_v44 = vrot.slane %v5698_v8, 5 }
 0x109   : > { %v724_v48 = vpop.f32.mrf.mxu1  ;;  %6126 = vmatprep.mubr.msk.bf16.mxu1 %vm554_vm3, %v5702_v27  ;;  %v4684_v13 = vor.u32 %v4683_v20, %v4680_v22  ;;  %v722_v0 = vadd.f32 %v721_v29, %v7577_v23  ;;  %v733_v7 = vadd.f32 %v5889_v54, %v7585_v18 }
 0x10a   : > { %v5915_v11 = vpop.f32.mrf.mxu0  ;;  %v725_v12 = vadd.f32 %v724_v48, %v7592_v36  ;;  %v4676_v37 = vsel %vm6502_vm4, %v4671_v24, %v4675_v35  ;;  %v4848_v28 = vsel %vm6568_vm7, %v5723_v62, %v4847_v44 }
 0x10b   : > { %v5904_v53 = vpop.f32.mrf.mxu1  ;;  %v4685_v51 = vrot.slane %v4684_v13, 4  ;;  %v5728_v63 = vcombine.low %v4844_v4, %v4848_v28  ;;  %v893_v30 = vadd.f32 %v7628_v60, %v722_v0  ;;  %v896_v59 = vadd.f32 %v5899_v14, %v733_v7 }
 0x10c   : > { %v1010_v32 = vadd.f32 %v5904_v53, %v7615_v17  ;;  %v1210_v2 = vpop.f32.mrf.mxu0  ;;  %v894_v25 = vadd.f32 %v877_v57, %v725_v12 }
 0x10d   : > { %v977_v23 = vpop.f32.mrf.mxu1  ;;  %v4690_v52 = vsel %vm6502_vm4, %v4685_v51, %v4689_v41 }
 0x10e   : > { %v1240_v18 = vadd.f32 %v5914_v39, %v1010_v32  ;;  %v1008_v36 = vadd.f32 %v977_v23, %v7624_v50  ;;  %v5918_v15 = vpop.f32.mrf.mxu0  ;;  %6137 = vmatmul.mubr.msk.bf16.gmra.mxu0 %vm554_vm3, %v5728_v63  ;;  %v5703_v34 = vcombine.low %v4676_v37, %v4690_v52 }
 0x10f   : > { %v5905_v55 = vpop.f32.mrf.mxu1 }
 0x110   : > { %v1238_v17 = vadd.f32 %v1207_v21, %v1008_v36  ;;  %v1011_v40 = vadd.f32 %v5905_v55, %v7631_v16  ;;  %v1223_v8 = vpop.f32.mrf.mxu0  ;;  %6127 = vmatmul.mubr.msk.bf16.gmra.mxu1 %vm554_vm3, %v5703_v34 }
 0x111   : > { %v980_v10 = vpop.f32.mrf.mxu1 }
 0x112   : > { %v1241_v60 = vadd.f32 %v5915_v11, %v1011_v40  ;;  %v1009_v14 = vadd.f32 %v980_v10, %v7637_v26  ;;  %v5919_v57 = vpop.f32.mrf.mxu0 }
 0x113   : > { %v5908_v50 = vpop.f32.mrf.mxu1 }
 0x114   : > { %v1239_v58 = vadd.f32 %v1210_v2, %v1009_v14  ;;  %v1014_v42 = vadd.f32 %v5908_v50, %v895_v45  ;;  %v1226_v49 = vpop.f32.mrf.mxu0 }
 0x115   : > { %v993_v31 = vpop.f32.mrf.mxu1 }
 0x116   : > { %v1244_v19 = vadd.f32 %v5918_v15, %v1014_v42  ;;  %v1012_v47 = vadd.f32 %v993_v31, %v893_v30  ;;  %v5934_v29 = vpop.f32.mrf.mxu0 }
 0x117   : > { %v5909_v9 = vpop.f32.mrf.mxu1 }
 0x118   : > { %v1242_v43 = vadd.f32 %v1223_v8, %v1012_v47  ;;  %v1015_v46 = vadd.f32 %v5909_v9, %v896_v59  ;;  %v1484_v16 = vpop.f32.mrf.mxu0 }
 0x119   : > { %v996_v39 = vpop.f32.mrf.mxu1 }
 0x11a   : > { %v1245_v35 = vadd.f32 %v5919_v57, %v1015_v46  ;;  %v1013_v5 = vadd.f32 %v996_v39, %v894_v25  ;;  %v5935_v1 = vpop.f32.mrf.mxu0 }
 0x11b   : > { %v5924_v38 = vpop.f32.mrf.mxu1 }
 0x11c   : > { %v1243_v61 = vadd.f32 %v1226_v49, %v1013_v5  ;;  %v1398_v26 = vadd.f32 %v5924_v38, %v1240_v18  ;;  %v1487_v54 = vpop.f32.mrf.mxu0 }
 0x11d   : > { %v1365_v3 = vpop.f32.mrf.mxu1 }
 0x11e   : > { %v1517_v56 = vadd.f32 %v5934_v29, %v1398_v26  ;;  %v1396_v45 = vadd.f32 %v1365_v3, %v1238_v17  ;;  %v5938_v6 = vpop.f32.mrf.mxu0 }
 0x11f   : > { %v5925_v33 = vpop.f32.mrf.mxu1 }
 0x120   : > { %v1515_v21 = vadd.f32 %v1484_v16, %v1396_v45  ;;  %v1399_v27 = vadd.f32 %v5925_v33, %v1241_v60  ;;  %v1500_v22 = vpop.f32.mrf.mxu0 }
 0x121   : > { %v1368_v20 = vpop.f32.mrf.mxu1 }
 0x122   : > { %v1518_v41 = vadd.f32 %v5935_v1, %v1399_v27  ;;  %v1397_v48 = vadd.f32 %v1368_v20, %v1239_v58  ;;  %v5939_v24 = vpop.f32.mrf.mxu0 }
 0x123   : > { %v5928_v4 = vpop.f32.mrf.mxu1 }
 0x124   : > { %v1516_v62 = vadd.f32 %v1487_v54, %v1397_v48  ;;  %v1402_v44 = vadd.f32 %v5928_v4, %v1244_v19  ;;  %v1503_v11 = vpop.f32.mrf.mxu0 }
 0x125   : > { %v1381_v13 = vpop.f32.mrf.mxu1 }
 0x126   : > { %v1521_v0 = vadd.f32 %v5938_v6, %v1402_v44  ;;  %v1400_v7 = vadd.f32 %v1381_v13, %v1242_v43  ;;  %v5954_v12 = vpop.f32.mrf.mxu0 }
 0x127   : > { %v5929_v53 = vpop.f32.mrf.mxu1 }
 0x128   : > { %v1519_v37 = vadd.f32 %v1500_v22, %v1400_v7  ;;  %v1403_v28 = vadd.f32 %v5929_v53, %v1245_v35  ;;  %v1872_v32 = vpop.f32.mrf.mxu0 }
 0x129   : > { %v1384_v2 = vpop.f32.mrf.mxu1 }
 0x12a   : > { %v1522_v51 = vadd.f32 %v5939_v24, %v1403_v28  ;;  %v1401_v63 = vadd.f32 %v1384_v2, %v1243_v61  ;;  %v5955_v30 = vpop.f32.mrf.mxu0 }
 0x12b   : > { %v5944_v59 = vpop.f32.mrf.mxu1 }
 0x12c   : > { %v1520_v23 = vadd.f32 %v1503_v11, %v1401_v63  ;;  %v1747_v25 = vadd.f32 %v5944_v59, %v1517_v56  ;;  %v1875_v18 = vpop.f32.mrf.mxu0 }
 0x12d   : > { %v1714_v36 = vpop.f32.mrf.mxu1 }
 0x12e   : > { %v1905_v15 = vadd.f32 %v5954_v12, %v1747_v25  ;;  %v1745_v52 = vadd.f32 %v1714_v36, %v1515_v21  ;;  %v5958_v55 = vpop.f32.mrf.mxu0 }
 0x12f   : > { %v5945_v34 = vpop.f32.mrf.mxu1 }
 0x130   : > { %v1903_v17 = vadd.f32 %v1872_v32, %v1745_v52  ;;  %v1748_v40 = vadd.f32 %v5945_v34, %v1518_v41  ;;  %v1888_v8 = vpop.f32.mrf.mxu0 }
 0x131   : > { %v1717_v10 = vpop.f32.mrf.mxu1 }
 0x132   : > { %v1906_v60 = vadd.f32 %v5955_v30, %v1748_v40  ;;  %v1746_v14 = vadd.f32 %v1717_v10, %v1516_v62  ;;  %v5959_v57 = vpop.f32.mrf.mxu0 }
 0x133   : > { %v5948_v50 = vpop.f32.mrf.mxu1 }
 0x134   : > { %v1904_v58 = vadd.f32 %v1875_v18, %v1746_v14  ;;  %v1751_v42 = vadd.f32 %v5948_v50, %v1521_v0  ;;  %v1891_v49 = vpop.f32.mrf.mxu0 }
 0x135   : > { %v1730_v31 = vpop.f32.mrf.mxu1 }
 0x136   : > { %v1909_v19 = vadd.f32 %v5958_v55, %v1751_v42  ;;  %v1749_v47 = vadd.f32 %v1730_v31, %v1519_v37 }
 0x137   : > { %v5949_v29 = vpop.f32.mrf.mxu1 }
 0x138   : > { %v1907_v9 = vadd.f32 %v1888_v8, %v1749_v47  ;;  %v1752_v43 = vadd.f32 %v5949_v29, %v1522_v51  ;;  %v5974_v46 = vpop.f32.mrf.mxu0 }
 0x139   : > { %v1733_v16 = vpop.f32.mrf.mxu1 }
 0x13a   : > { %v1910_v39 = vadd.f32 %v5959_v57, %v1752_v43  ;;  %v1750_v35 = vadd.f32 %v1733_v16, %v1520_v23  ;;  %v2220_v5 = vpop.f32.mrf.mxu0 }
 0x13b   : > { %v5964_v1 = vpop.f32.mrf.mxu1 }
 0x13c   : > { %v1908_v38 = vadd.f32 %v1891_v49, %v1750_v35  ;;  %v2023_v61 = vadd.f32 %v5964_v1, %v1905_v15  ;;  %v5975_v26 = vpop.f32.mrf.mxu0 }
 0x13d   : > { %v1990_v54 = vpop.f32.mrf.mxu1 }
 0x13e   : > { %v2253_v3 = vadd.f32 %v5974_v46, %v2023_v61  ;;  %v2021_v56 = vadd.f32 %v1990_v54, %v1903_v17  ;;  %v2223_v45 = vpop.f32.mrf.mxu0 }
 0x13f   : > { %v5965_v6 = vpop.f32.mrf.mxu1 }
 0x140   : > { %v2251_v33 = vadd.f32 %v2220_v5, %v2021_v56  ;;  %v2024_v21 = vadd.f32 %v5965_v6, %v1906_v60 }
 0x141   : > { %v1993_v27 = vpop.f32.mrf.mxu1 }
 0x142   : > { %v2254_v22 = vadd.f32 %v5975_v26, %v2024_v21  ;;  %v2022_v20 = vadd.f32 %v1993_v27, %v1904_v58 }
 0x143   : > { %v5978_v41 = vpop.f32.mrf.mxu0  ;;  %v5968_v48 = vpop.f32.mrf.mxu1 }
 0x144   : > { %v2252_v24 = vadd.f32 %v2223_v45, %v2022_v20  ;;  %v2027_v4 = vadd.f32 %v5968_v48, %v1909_v19 }
 0x145   : > { %v2236_v62 = vpop.f32.mrf.mxu0  ;;  %v2006_v44 = vpop.f32.mrf.mxu1 }
 0x146   : > { %v2257_v11 = vadd.f32 %v5978_v41, %v2027_v4  ;;  %v2025_v13 = vadd.f32 %v2006_v44, %v1907_v9 }
 0x147   : > { %v5979_v0 = vpop.f32.mrf.mxu0  ;;  %v5969_v7 = vpop.f32.mrf.mxu1 }
 0x148   : > { %v2255_v12 = vadd.f32 %v2236_v62, %v2025_v13  ;;  %v2028_v53 = vadd.f32 %v5969_v7, %v1910_v39 }
 0x149   : > { %v2239_v37 = vpop.f32.mrf.mxu0  ;;  %v2009_v28 = vpop.f32.mrf.mxu1 }
 0x14a   : > { %v2258_v32 = vadd.f32 %v5979_v0, %v2028_v53  ;;  %v2026_v2 = vadd.f32 %v2009_v28, %v1908_v38 }
 0x14b   : > { %v5994_v51 = vpop.f32.mrf.mxu0  ;;  %v5984_v63 = vpop.f32.mrf.mxu1 }
 0x14c   : > { %v2256_v30 = vadd.f32 %v2239_v37, %v2026_v2  ;;  %v2411_v59 = vadd.f32 %v5984_v63, %v2253_v3 }
 0x14d   : > { %v2497_v23 = vpop.f32.mrf.mxu0  ;;  %v2378_v25 = vpop.f32.mrf.mxu1 }
 0x14e   : > { %v2530_v18 = vadd.f32 %v5994_v51, %v2411_v59  ;;  %v2409_v36 = vadd.f32 %v2378_v25, %v2251_v33 }
 0x14f   : > { %v5995_v15 = vpop.f32.mrf.mxu0  ;;  %v5985_v52 = vpop.f32.mrf.mxu1 }
 0x150   : > { %v2528_v55 = vadd.f32 %v2497_v23, %v2409_v36  ;;  %v2412_v34 = vadd.f32 %v5985_v52, %v2254_v22 }
 0x151   : > { %v2500_v17 = vpop.f32.mrf.mxu0  ;;  %v2381_v40 = vpop.f32.mrf.mxu1 }
 0x152   : > { %v2531_v8 = vadd.f32 %v5995_v15, %v2412_v34  ;;  %v2410_v10 = vadd.f32 %v2381_v40, %v2252_v24 }
 0x153   : > { %v5998_v60 = vpop.f32.mrf.mxu0  ;;  %v5988_v14 = vpop.f32.mrf.mxu1 }
 0x154   : > { %v2529_v57 = vadd.f32 %v2500_v17, %v2410_v10  ;;  %v2415_v50 = vadd.f32 %v5988_v14, %v2257_v11 }
 0x155   : > { %v2513_v58 = vpop.f32.mrf.mxu0  ;;  %v2394_v42 = vpop.f32.mrf.mxu1 }
 0x156   : > { %v2534_v49 = vadd.f32 %v5998_v60, %v2415_v50  ;;  %v2413_v31 = vadd.f32 %v2394_v42, %v2255_v12 }
 0x157   : > { %v5999_v19 = vpop.f32.mrf.mxu0  ;;  %v5989_v47 = vpop.f32.mrf.mxu1 }
 0x158   : > { %v2532_v29 = vadd.f32 %v2513_v58, %v2413_v31  ;;  %v2416_v9 = vadd.f32 %v5989_v47, %v2258_v32 }
 0x159   : > { %v2516_v43 = vpop.f32.mrf.mxu0  ;;  %v2397_v46 = vpop.f32.mrf.mxu1 }
 0x15a   : > { %v2535_v16 = vadd.f32 %v5999_v19, %v2416_v9  ;;  %v2414_v39 = vadd.f32 %v2397_v46, %v2256_v30 }
 0x15b   : > { %v6014_v35 = vpop.f32.mrf.mxu0  ;;  %v6004_v5 = vpop.f32.mrf.mxu1 }
 0x15c   : > { %v2533_v1 = vadd.f32 %v2516_v43, %v2414_v39  ;;  %v2760_v38 = vadd.f32 %v6004_v5, %v2530_v18 }
 0x15d   : > { %v2885_v61 = vpop.f32.mrf.mxu0  ;;  %v2727_v26 = vpop.f32.mrf.mxu1 }
 0x15e   : > { %v7671_v54 = vadd.f32 %v6014_v35, %v2760_v38  ;;  %v2758_v3 = vadd.f32 %v2727_v26, %v2528_v55 }
 0x15f   : > { %v6015_v56 = vpop.f32.mrf.mxu0  ;;  %v6005_v45 = vpop.f32.mrf.mxu1 }
 0x160   : > { %v7673_v6 = vadd.f32 %v2885_v61, %v2758_v3  ;;  %v2761_v33 = vadd.f32 %v6005_v45, %v2531_v8 }
 0x161   : > { %v2888_v21 = vpop.f32.mrf.mxu0  ;;  %v2730_v27 = vpop.f32.mrf.mxu1 }
 0x162   : > { %v7675_v22 = vadd.f32 %v6015_v56, %v2761_v33  ;;  %v2759_v20 = vadd.f32 %v2730_v27, %v2529_v57 }
 0x163   : > { %v6018_v41 = vpop.f32.mrf.mxu0  ;;  %v6008_v48 = vpop.f32.mrf.mxu1 }
 0x164   : > { %v7677_v24 = vadd.f32 %v2888_v21, %v2759_v20  ;;  %v2764_v4 = vadd.f32 %v6008_v48, %v2534_v49 }
 0x165   : > { %v2901_v62 = vpop.f32.mrf.mxu0  ;;  %v2743_v44 = vpop.f32.mrf.mxu1 }
 0x166   : > { %v2922_v11 = vadd.f32 %v6018_v41, %v2764_v4  ;;  %v2762_v13 = vadd.f32 %v2743_v44, %v2532_v29 }
 0x167   : > { %v6019_v0 = vpop.f32.mrf.mxu0  ;;  %v6009_v7 = vpop.f32.mrf.mxu1 }
 0x168   : > { %v2920_v12 = vadd.f32 %v2901_v62, %v2762_v13  ;;  %v2765_v53 = vadd.f32 %v6009_v7, %v2535_v16 }
 0x169   : > { %v2904_v37 = vpop.f32.mrf.mxu0  ;;  %v2746_v28 = vpop.f32.mrf.mxu1 }
 0x16a   : > { %v2923_v32 = vadd.f32 %v6019_v0, %v2765_v53  ;;  %v2763_v2 = vadd.f32 %v2746_v28, %v2533_v1 }
 0x16b   : > { %v6024_v51 = vpop.f32.mrf.mxu1 }
 0x16c   : > { %v2921_v63 = vadd.f32 %v2904_v37, %v2763_v2 }
 0x16d   : > { %v7679_v30 = vpop.f32.mrf.mxu0  ;;  %v3004_v59 = vpop.f32.mrf.mxu1 }
 0x16f   : > { %v7681_v23 = vpop.f32.mrf.mxu0  ;;  %v6025_v25 = vpop.f32.mrf.mxu1 }
 0x171   : > { %v7683_v18 = vpop.f32.mrf.mxu0  ;;  %v7685_v36 = vpop.f32.mrf.mxu1 }
 0x173   : > { %v7687_v15 = vpop.f32.mrf.mxu0  ;;  %v6028_v52 = vpop.f32.mrf.mxu1 }
 0x174   : > { %v3041_v55 = vadd.f32 %v6028_v52, %v2922_v11 }
 0x175   : > { %v3020_v34 = vpop.f32.mrf.mxu1 }
 0x176   : > { %v3039_v17 = vadd.f32 %v3020_v34, %v2920_v12  ;;  %v3035_v34 = vadd.f32 %v3004_v59, %v7673_v6 }
 0x177   : > { %v6029_v8 = vpop.f32.mrf.mxu1 }
 0x178   : > { %v6038_v40 = vpop.f32.mrf.mxu0  ;;  %v3042_v60 = vadd.f32 %v6029_v8, %v2923_v32 }
 0x179   : > { %v7689_v10 = vadd.f32 %v6038_v40, %v3041_v55  ;;  %v3023_v57 = vpop.f32.mrf.mxu1 }
 0x17a   : > { %v3250_v14 = vpop.f32.mrf.mxu0  ;;  %v3040_v58 = vadd.f32 %v3023_v57, %v2921_v63  ;;  %v3037_v63 = vadd.f32 %v6024_v51, %v7671_v54 }
 0x17b   : > { %v7691_v50 = vadd.f32 %v3250_v14, %v3039_v17  ;;  %v6044_v49 = vpop.f32.mrf.mxu1 }
 0x17c   : > { %v6039_v42 = vpop.f32.mrf.mxu0  ;;  %v3267_v8 = vadd.f32 %v7679_v30, %v3037_v63 }
 0x17d   : > { %v7693_v31 = vadd.f32 %v6039_v42, %v3042_v60  ;;  %v3392_v47 = vpop.f32.mrf.mxu1  ;;  %v3038_v60 = vadd.f32 %v6025_v25, %v7675_v22  ;;  %v3036_v42 = vadd.f32 %v7685_v36, %v7677_v24 }
 0x17e   : > { %v3253_v19 = vpop.f32.mrf.mxu0  ;;  %v3425_v54 = vadd.f32 %v6044_v49, %v3267_v8 }
 0x17f   : > { %v7695_v29 = vadd.f32 %v3253_v19, %v3040_v58  ;;  %v6045_v43 = vpop.f32.mrf.mxu1  ;;  %v3265_v58 = vadd.f32 %v7681_v23, %v3035_v34  ;;  %v3268_v6 = vadd.f32 %v7683_v18, %v3038_v60  ;;  %v3266_v22 = vadd.f32 %v7687_v15, %v3036_v42 }
 0x180   : > { %v6054_v9 = vpop.f32.mrf.mxu0 }
 0x181   : > { %v3395_v16 = vpop.f32.mrf.mxu1  ;;  %v3423_v59 = vadd.f32 %v3392_v47, %v3265_v58  ;;  %v3543_v25 = vadd.f32 %v6054_v9, %v3425_v54  ;;  %v3426_v63 = vadd.f32 %v6045_v43, %v3268_v6 }
 0x182   : > { %v3510_v46 = vpop.f32.mrf.mxu0  ;;  %v3424_v36 = vadd.f32 %v3395_v16, %v3266_v22 }
 0x183   : > { %v7697_v35 = vpop.f32.mrf.mxu1  ;;  %v3541_v24 = vadd.f32 %v3510_v46, %v3423_v59 }
 0x184   : > { %v6055_v39 = vpop.f32.mrf.mxu0 }
 0x185   : > { %v7699_v1 = vpop.f32.mrf.mxu1  ;;  %v3544_v47 = vadd.f32 %v6055_v39, %v3426_v63  ;;  %v3429_v39 = vadd.f32 %v7697_v35, %v7689_v10 }
 0x186   : > { %v3513_v5 = vpop.f32.mrf.mxu0 }
 0x187   : > { %v7703_v61 = vpop.f32.mrf.mxu1  ;;  %v3542_v15 = vadd.f32 %v3513_v5, %v3424_v36 }
 0x188   : > { %v7701_v38 = vpop.f32.mrf.mxu0 }
 0x189   : > { %v7707_v3 = vpop.f32.mrf.mxu1 }
 0x18a   : > { %v7705_v26 = vpop.f32.mrf.mxu0 }
 0x18b   : > { %v6064_v45 = vpop.f32.mrf.mxu1 }
 0x18c   : > { %v7709_v56 = vpop.f32.mrf.mxu0  ;;  %v3773_v49 = vadd.f32 %v6064_v45, %v3543_v25 }
 0x18d   : > { %v3740_v21 = vpop.f32.mrf.mxu1 }
 0x18e   : > { %v7711_v33 = vpop.f32.mrf.mxu0  ;;  %v3771_v8 = vadd.f32 %v3740_v21, %v3541_v24  ;;  %v3547_v24 = vadd.f32 %v7701_v38, %v3429_v39 }
 0x18f   : > { %v6065_v41 = vpop.f32.mrf.mxu1 }
 0x190   : > { %v6074_v27 = vpop.f32.mrf.mxu0  ;;  %v3774_v42 = vadd.f32 %v6065_v41, %v3544_v47 }
 0x191   : > { %v3743_v62 = vpop.f32.mrf.mxu1  ;;  %v3931_v9 = vadd.f32 %v6074_v27, %v3773_v49 }
 0x192   : > { %v3898_v20 = vpop.f32.mrf.mxu0 }
 0x193   : > { %v3929_v6 = vadd.f32 %v3898_v20, %v3771_v8  ;;  %v3427_v20 = vadd.f32 %v7699_v1, %v7691_v50  ;;  %v3428_v1 = vadd.f32 %v7707_v3, %v7695_v29 }
 0x194   : > { %v6075_v48 = vpop.f32.mrf.mxu0 }
 0x195   : > { %v3932_v59 = vadd.f32 %v6075_v48, %v3774_v42  ;;  %v3545_v50 = vadd.f32 %v7705_v26, %v3427_v20  ;;  %v3546_v29 = vadd.f32 %v7711_v33, %v3428_v1 }
 0x196   : > { %v3901_v4 = vpop.f32.mrf.mxu0 }
 0x198   : > { %v7713_v44 = vpop.f32.mrf.mxu0 }
 0x199   : > { %v7717_v13 = vpop.f32.mrf.mxu1 }
 0x19a   : > { %v7715_v11 = vpop.f32.mrf.mxu0 }
 0x19b   : > { %v7719_v0 = vpop.f32.mrf.mxu1 }
 0x19c   : > { %v7721_v7 = vpop.f32.mrf.mxu0 }
 0x19d   : > { %v7723_v12 = vpop.f32.mrf.mxu1 }
 0x19e   : > { %v7727_v37 = vpop.f32.mrf.mxu0 }
 0x19f   : > { %v7725_v53 = vpop.f32.mrf.mxu1  ;;  %7859 = vst [vmem:[#allocation2_spill] sm:$0xff] %v7727_v37 }
 0x1a0   : > { %v3776_v42 = vadd.f32 %v7725_v53, %v3546_v29 }
 0x1a1   : > { %v6084_v28 = vpop.f32.mrf.mxu1 }
 0x1a2   : > { %v4050_v46 = vadd.f32 %v6084_v28, %v3931_v9 }
 0x1a3   : > { %v6094_v32 = vpop.f32.mrf.mxu0  ;;  %v4017_v2 = vpop.f32.mrf.mxu1 }
 0x1a4   : > { %v4048_v22 = vadd.f32 %v4017_v2, %v3929_v6  ;;  %v4280_v41 = vadd.f32 %v6094_v32, %v4050_v46 }
 0x1a5   : > { %v4247_v52 = vpop.f32.mrf.mxu0  ;;  %v6085_v55 = vpop.f32.mrf.mxu1 }
 0x1a6   : > { %v4051_v25 = vadd.f32 %v6085_v55, %v3932_v59  ;;  %v4278_v48 = vadd.f32 %v4247_v52, %v4048_v22  ;;  %v3777_v52 = vadd.f32 %v7717_v13, %v3547_v24 }
 0x1a7   : > { %v6095_v17 = vpop.f32.mrf.mxu0  ;;  %v4020_v40 = vpop.f32.mrf.mxu1 }
 0x1a8   : > { %v4281_v32 = vadd.f32 %v6095_v17, %v4051_v25  ;;  %v3935_v3 = vadd.f32 %v7713_v44, %v3777_v52 }
 0x1a9   : > { %v7733_v14 = vpop.f32.mrf.mxu0  ;;  %v7735_v57 = vpop.f32.mrf.mxu1 }
 0x1ab   : > { %v7740_v51 = vpop.f32.mrf.mxu1 }
 0x1ad   : > { %v7745_v30 = vpop.f32.mrf.mxu1 }
 0x1ae   : > { %v7743_v19 = vpop.f32.mrf.mxu0 }
 0x1af   : > { %v7750_v23 = vpop.f32.mrf.mxu1 }
 0x1b0   : > { %v7748_v37 = vpop.f32.mrf.mxu0  ;;  %7860 = vst [vmem:[#allocation3_spill] sm:$0xff] %v7750_v23  ;;  %v3772_v23 = vadd.f32 %v3743_v62, %v3542_v15 }
 0x1b1   : > { %v6104_v18 = vpop.f32.mrf.mxu1 }
 0x1b2   : > { %v7752_v34 = vpop.f32.mrf.mxu0  ;;  %v3930_v27 = vadd.f32 %v3901_v4, %v3772_v23  ;;  %v4438_v63 = vadd.f32 %v6104_v18, %v4280_v41  ;;  %v3430_v4 = vadd.f32 %v7703_v61, %v7693_v31  ;;  %v3775_v18 = vadd.f32 %v7719_v0, %v3545_v50 }
 0x1b3   : > { %v4405_v58 = vpop.f32.mrf.mxu1 }
 0x1b4   : > { %v7754_v60 = vpop.f32.mrf.mxu0  ;;  %v4049_v2 = vadd.f32 %v4020_v40, %v3930_v27  ;;  %v4436_v55 = vadd.f32 %v4405_v58, %v4278_v48  ;;  %v3548_v61 = vadd.f32 %v7709_v56, %v3430_v4  ;;  %v3933_v0 = vadd.f32 %v7715_v11, %v3775_v18 }
 0x1b5   : > { %v6105_v54 = vpop.f32.mrf.mxu1  ;;  %v4054_v56 = vadd.f32 %v7735_v57, %v3935_v3 }
 0x1b6   : > { %v6114_v43 = vpop.f32.mrf.mxu0  ;;  %v4279_v38 = vadd.f32 %v7733_v14, %v4049_v2  ;;  %v4439_v49 = vadd.f32 %v6105_v54, %v4281_v32  ;;  %v3778_v14 = vadd.f32 %v7723_v12, %v3548_v61  ;;  %v4052_v6 = vadd.f32 %v7740_v51, %v3933_v0 }
 0x1b7   : > { %v4408_v45 = vpop.f32.mrf.mxu1  ;;  %v4557_v36 = vadd.f32 %v6114_v43, %v4438_v63  ;;  %v4284_v22 = vadd.f32 %v7743_v19, %v4054_v56  ;;  %v7862_v41 = vld [vmem:[#allocation3_spill] sm:$0xff] }
 0x1b8   : > { %v4524_v16 = vpop.f32.mrf.mxu0  ;;  %v4437_v17 = vadd.f32 %v4408_v45, %v4279_v38  ;;  %v3936_v53 = vadd.f32 %v7721_v7, %v3778_v14  ;;  %v7861_v45 = vld [vmem:[#allocation2_spill] sm:$0xff]  ;;  %v4282_v51 = vadd.f32 %v7748_v37, %v4052_v6 }
 0x1b9   : > { %v7762_v21 = vpop.f32.mrf.mxu1  ;;  %v4555_v26 = vadd.f32 %v4524_v16, %v4436_v55  ;;  %v3934_v59 = vadd.f32 %v7861_v45, %v3776_v42 }
 0x1ba   : > { %v6115_v5 = vpop.f32.mrf.mxu0  ;;  %v4442_v20 = vadd.f32 %v7762_v21, %v4284_v22 }
 0x1bb   : > { %v7766_v28 = vpop.f32.mrf.mxu1  ;;  %v4558_v15 = vadd.f32 %v6115_v5, %v4439_v49  ;;  %v4055_v5 = vadd.f32 %v7745_v30, %v3936_v53  ;;  %v4053_v25 = vadd.f32 %v7862_v41, %v3934_v59 }
 0x1bc   : > { %v4527_v62 = vpop.f32.mrf.mxu0  ;;  %v4440_v48 = vadd.f32 %v7766_v28, %v4282_v51 }
 0x1bd   : > { %v7773_v35 = vpop.f32.mrf.mxu1  ;;  %v4556_v43 = vadd.f32 %v4527_v62, %v4437_v17  ;;  %v4285_v2 = vadd.f32 %v7752_v34, %v4055_v5  ;;  %v4283_v4 = vadd.f32 %v7754_v60, %v4053_v25 }
 0x1be   : > { %v7771_v10 = vpop.f32.mrf.mxu0 }
 0x1bf   : > { %v4424_v23 = vpop.f32.mrf.mxu1  ;;  %v4561_v37 = vadd.f32 %v7771_v10, %v4442_v20  ;;  %v4443_v32 = vadd.f32 %v7773_v35, %v4285_v2 }
 0x1c0   : > { %v4540_v40 = vpop.f32.mrf.mxu0  ;;  %v4441_v52 = vadd.f32 %v4424_v23, %v4283_v4 }
 0x1c1   : > { %v6124_v31 = vpop.f32.mrf.mxu1  ;;  %v4559_v1 = vadd.f32 %v4540_v40, %v4440_v48 }
 0x1c2   : > { %v7783_v47 = vpop.f32.mrf.mxu0  ;;  %v4787_v8 = vadd.f32 %v6124_v31, %v4557_v36 }
 0x1c3   : > { %v4754_v58 = vpop.f32.mrf.mxu1  ;;  %v4562_v60 = vadd.f32 %v7783_v47, %v4443_v32 }
 0x1c4   : > { %v4543_v13 = vpop.f32.mrf.mxu0  ;;  %v4785_v9 = vadd.f32 %v4754_v58, %v4555_v26 }
 0x1c5   : > { %v6125_v44 = vpop.f32.mrf.mxu1  ;;  %v4560_v40 = vadd.f32 %v4543_v13, %v4441_v52 }
 0x1c6   : > { %v6134_v33 = vpop.f32.mrf.mxu0  ;;  %v4788_v12 = vadd.f32 %v6125_v44, %v4558_v15 }
 0x1c7   : > { %v4945_v54 = vadd.f32 %v6134_v33, %v4787_v8  ;;  %v4757_v11 = vpop.f32.mrf.mxu1 }
 0x1c8   : > { %v4912_v46 = vpop.f32.mrf.mxu0  ;;  %v4786_v16 = vadd.f32 %v4757_v11, %v4556_v43 }
 0x1c9   : > { %4953 = vst [vmem:[%s7795_s29 + $0x10] sm:$0xff] %v4945_v54  ;;  %v4943_v57 = vadd.f32 %v4912_v46, %v4785_v9  ;;  %v4975_v55 = vmul.f32 %v4945_v54, %v4945_v54 }
 0x1ca   : > { %v6135_v39 = vpop.f32.mrf.mxu0 }
 0x1cb   : > { %4951 = vst [vmem:[%s7795_s29] sm:$0xff] %v4943_v57  ;;  %v4946_v27 = vadd.f32 %v6135_v39, %v4788_v12  ;;  %v4973_v63 = vmul.f32 %v4943_v57, %v4943_v57 }
 0x1cc   : > { %v4915_v7 = vpop.f32.mrf.mxu0 }
 0x1cd   : > { %4954 = vst [vmem:[%s7795_s29 + $0x18] sm:$0xff] %v4946_v27  ;;  %v4944_v62 = vadd.f32 %v4915_v7, %v4786_v16  ;;  %v4976_v34 = vmul.f32 %v4946_v27, %v4946_v27 }
 0x1ce   : > { %v6138_v30 = vpop.f32.mrf.mxu0 }
 0x1cf   : > { %4952 = vst [vmem:[%s7795_s29 + $0x8] sm:$0xff] %v4944_v62  ;;  %v4959_v19 = vadd.f32 %v4944_v62, %v4943_v57  ;;  %v4974_v24 = vmul.f32 %v4944_v62, %v4944_v62 }
 0x1d0   : > { %v6128_v28 = vpop.f32.mrf.mxu1  ;;  %v4928_v38 = vpop.f32.mrf.mxu0 }
 0x1d1   : > { %v4960_v21 = vadd.f32 %v4959_v19, %v4945_v54  ;;  %v4981_v50 = vadd.f32 %v4974_v24, %v4973_v63  ;;  %v4791_v49 = vadd.f32 %v6128_v28, %v4561_v37 }
 0x1d2   : > { %v4770_v31 = vpop.f32.mrf.mxu1  ;;  %v6139_v17 = vpop.f32.mrf.mxu0 }
 0x1d3   : > { %v4982_v36 = vadd.f32 %v4981_v50, %v4975_v55  ;;  %v4961_v18 = vadd.f32 %v4960_v21, %v4946_v27  ;;  %v4949_v61 = vadd.f32 %v6138_v30, %v4791_v49  ;;  %v4789_v10 = vadd.f32 %v4770_v31, %v4559_v1 }
 0x1d4   : > { %v6129_v26 = vpop.f32.mrf.mxu1  ;;  %v4931_v9 = vpop.f32.mrf.mxu0 }
 0x1d5   : > { %v4983_v35 = vadd.f32 %v4982_v36, %v4976_v34  ;;  %4957 = vst [vmem:[%s7795_s29 + $0x30] sm:$0xff] %v4949_v61  ;;  %v4947_v23 = vadd.f32 %v4928_v38, %v4789_v10  ;;  %v4792_v8 = vadd.f32 %v6129_v26, %v4562_v60  ;;  %v4979_v33 = vmul.f32 %v4949_v61, %v4949_v61 }
 0x1d6   : > { %v4773_v29 = vpop.f32.mrf.mxu1 }
 0x1d7   : > { %4955 = vst [vmem:[%s7795_s29 + $0x20] sm:$0xff] %v4947_v23  ;;  %v4962_v3 = vadd.f32 %v4961_v18, %v4947_v23  ;;  %v4977_v58 = vmul.f32 %v4947_v23, %v4947_v23  ;;  %v4950_v14 = vadd.f32 %v6139_v17, %v4792_v8  ;;  %v4790_v15 = vadd.f32 %v4773_v29, %v4560_v40 }
 0x1d9   : > { %v4984_v0 = vadd.f32 %v4983_v35, %v4977_v58  ;;  %4958 = vst [vmem:[%s7795_s29 + $0x38] sm:$0xff] %v4950_v14  ;;  %v4948_v47 = vadd.f32 %v4931_v9, %v4790_v15  ;;  %v4980_v43 = vmul.f32 %v4950_v14, %v4950_v14 }
 0x1db   : > { %4956 = vst [vmem:[%s7795_s29 + $0x28] sm:$0xff] %v4948_v47  ;;  %v4963_v42 = vadd.f32 %v4962_v3, %v4948_v47  ;;  %v4978_v56 = vmul.f32 %v4948_v47, %v4948_v47 }
 0x1dd   : > { %v4964_v13 = vadd.f32 %v4963_v42, %v4949_v61  ;;  %v4985_v44 = vadd.f32 %v4984_v0, %v4978_v56 }
 0x1df   : > { %v4965_v54 = vadd.f32 %v4964_v13, %v4950_v14  ;;  %v4986_v12 = vadd.f32 %v4985_v44, %v4979_v33 }
 0x1e1   : > { %v4966_v6 = vrot.slane %v4965_v54, 4  ;;  %v4987_v46 = vadd.f32 %v4986_v12, %v4980_v43 }
 0x1e3   : > { %v4967_v11 = vadd.f32 %v4966_v6, %v4965_v54  ;;  %v4988_v53 = vrot.slane %v4987_v46, 4 }
 0x1e5   : > { %v4968_v57 = vrot.slane %v4967_v11, 2  ;;  %v4989_v16 = vadd.f32 %v4988_v53, %v4987_v46 }
 0x1e7   : > { %v4969_v45 = vadd.f32 %v4968_v57, %v4967_v11  ;;  %v4990_v59 = vrot.slane %v4989_v16, 2 }
 0x1e9   : > { %v4970_v22 = vrot.slane %v4969_v45, 1  ;;  %v4991_v39 = vadd.f32 %v4990_v59, %v4989_v16 }
 0x1eb   : > { %v4971_v5 = vadd.f32 %v4970_v22, %v4969_v45  ;;  %v4992_v27 = vrot.slane %v4991_v39, 1 }
 0x1ed   : > { %4972 = vst [vmem:[%s399_s12] sm:$0x1] %v4971_v5  ;;  %v4993_v51 = vadd.f32 %v4992_v27, %v4991_v39 }
 0x1ef   : > { %4994 = vst [vmem:[%s406_s11] sm:$0x1] %v4993_v51 }
 0x1f0 PF: > { %s17_s25 = sadd.s32 1, %s6288_s25   ;;  %s7863_s21 = smov %s6280_s23 }
 0x1f1   : > { %p14_p10 = scmp.ge.s32.totalorder %s17_s25, 18   ;;  %s7864_s22 = smov %s6284_s24 }
 0x1f2   : > { %s7865_s23 = smov %s7868_s26  ;;  %s7866_s24 = smov %s7872_s27 }
 0x1f3   :  { %16 = sbr.rel (!%p14_p10) target bundleno = 3 (0x3), region = 128 }

</bundles_post_ra>
